<compile_context>
chip_gen: v6e
topology: v6e:2x2x1
jax: 0.10.0
libtpu: 0.0.40
codegen_flags: <defaults>
</compile_context>

<pallas_src>
import functools
import math

import jax
import jax.numpy as jnp
from jax import lax
from jax.experimental import pallas as pl
from jax.experimental.pallas import tpu as pltpu


def mha_kernel(q_ref, k_ref, v_ref,
               wqkv_ref, bqkv_ref, wo_ref, bo_ref,
               out_ref,
               *, num_heads, head_dim, seq_len, batch_block):
    E = num_heads * head_dim
    S = seq_len
    scale = 1.0 / math.sqrt(head_dim)

    # bf16 MXU operands, f32 accumulation.
    xq = q_ref[...].astype(jnp.bfloat16)   # (bb*S, E)
    xk = k_ref[...].astype(jnp.bfloat16)
    xv = v_ref[...].astype(jnp.bfloat16)

    # Packed QKV weights/biases: static lane-aligned slices of single buffers.
    wq = wqkv_ref[:, 0:E]
    wk = wqkv_ref[:, E:2 * E]
    wv = wqkv_ref[:, 2 * E:3 * E]
    bq = bqkv_ref[:, 0:E]
    bk = bqkv_ref[:, E:2 * E]
    bv = bqkv_ref[:, 2 * E:3 * E]

    Qf = jnp.dot(xq, wq, preferred_element_type=jnp.float32) + bq   # (bb*S, E) f32
    Kf = jnp.dot(xk, wk, preferred_element_type=jnp.float32) + bk
    Vf = jnp.dot(xv, wv, preferred_element_type=jnp.float32) + bv

    # Fold the 1/sqrt(Dh) scale into Q once (saves a per-head (S,S) multiply).
    Qb = (Qf * scale).astype(jnp.bfloat16)
    Kb = Kf.astype(jnp.bfloat16)
    Vb = Vf.astype(jnp.bfloat16)

    Wo = wo_ref[...]        # (E, E) bf16; head slices below are 128-row aligned
    bo = bo_ref[...]        # (1, E) f32

    for b in range(batch_block):           # static unroll over batch elements
        r0 = b * S
        acc = jnp.zeros((S, E), jnp.float32)
        for h in range(num_heads):          # static unroll over heads
            lo = h * head_dim
            hi = lo + head_dim
            qh = Qb[r0:r0 + S, lo:hi]       # (S, Dh) bf16
            kh = Kb[r0:r0 + S, lo:hi]
            vh = Vb[r0:r0 + S, lo:hi]

            # QK^T without materializing a transpose: contract head dim of both.
            s = lax.dot_general(qh, kh, (((1,), (1,)), ((), ())),
                                preferred_element_type=jnp.float32)   # (S, S)
            m = jnp.max(s, axis=-1, keepdims=True)
            p = jnp.exp(s - m)
            denom = jnp.sum(p, axis=-1, keepdims=True)
            w = p * pl.reciprocal(denom, approx=True)                  # softmax

            head = jnp.dot(w.astype(jnp.bfloat16), vh,
                           preferred_element_type=jnp.float32)         # (S, Dh)
            # Fold the head straight into the output projection (no concat).
            acc = acc + jnp.dot(head.astype(jnp.bfloat16), Wo[lo:hi, :],
                                preferred_element_type=jnp.float32)    # (S, E)

        out_ref[r0:r0 + S, :] = acc + bo


def _pick_batch_block(batch, seq_len, target_rows=256):
    """Smallest divisor of `batch` giving ~target_rows projection rows per step."""
    want = max(1, min(batch, -(-target_rows // seq_len)))
    for bb in range(want, batch + 1):
        if batch % bb == 0 and (bb == batch or (bb * seq_len) % 8 == 0):
            return bb
    return batch


def multi_head_attention(query, key, value, params, *, num_heads, batch_block=None):
    B, S, E = query.shape
    head_dim = E // num_heads
    assert head_dim * num_heads == E

    wq, bq, wk, bk, wv, bv, wo, bo = params  # w*: (E, E) pre-transposed, b*: (1, E)

    if batch_block is None:
        batch_block = _pick_batch_block(B, S)
    bb = batch_block
    assert B % bb == 0

    # Pack QKV weights/biases into single buffers; stream weights as bf16
    # (accumulation stays f32 on the MXU). Biases stay f32 (added post-matmul).
    wqkv = jnp.concatenate([wq, wk, wv], axis=1).astype(jnp.bfloat16)   # (E, 3E)
    bqkv = jnp.concatenate([bq, bk, bv], axis=1)                        # (1, 3E)
    wo_b = wo.astype(jnp.bfloat16)                                      # (E, E)

    # Flatten batch*seq rows so projections see bb*S rows per grid step.
    q2 = query.reshape(B * S, E)
    k2 = key.reshape(B * S, E)
    v2 = value.reshape(B * S, E)

    rows = bb * S
    act_spec = pl.BlockSpec((rows, E), lambda i: (i, 0))
    wqkv_spec = pl.BlockSpec((E, 3 * E), lambda i: (0, 0))
    bqkv_spec = pl.BlockSpec((1, 3 * E), lambda i: (0, 0))
    wo_spec = pl.BlockSpec((E, E), lambda i: (0, 0))
    bo_spec = pl.BlockSpec((1, E), lambda i: (0, 0))

    kernel = functools.partial(mha_kernel, num_heads=num_heads, head_dim=head_dim,
                               seq_len=S, batch_block=bb)

    flops = 8 * B * S * E * E + 4 * B * num_heads * S * S * head_dim
    transcendentals = B * num_heads * S * S
    bytes_accessed = (4 * 4 * B * S * E                 # q, k, v (f32 in) + out (f32)
                      + 2 * (E * 3 * E + E * E)         # bf16 weights
                      + 4 * (3 * E + E))                # f32 biases

    out = pl.pallas_call(
        kernel,
        out_shape=jax.ShapeDtypeStruct((B * S, E), jnp.float32),
        grid_spec=pltpu.PrefetchScalarGridSpec(
            num_scalar_prefetch=0,
            grid=(B // bb,),
            in_specs=[act_spec, act_spec, act_spec,
                      wqkv_spec, bqkv_spec, wo_spec, bo_spec],
            out_specs=act_spec,
        ),
        compiler_params=pltpu.CompilerParams(
            dimension_semantics=("parallel",),
            vmem_limit_bytes=32 * 1024 * 1024,   # safe on v5e/v6e/v7x at these shapes
        ),
        cost_estimate=pl.CostEstimate(flops=flops,
                                      transcendentals=transcendentals,
                                      bytes_accessed=bytes_accessed),
    )(q2, k2, v2, wqkv, bqkv, wo_b, bo)

    return out.reshape(B, S, E)


def mha_reference(query, key, value, params, *, num_heads):
    """Pure-JAX f32 reference mirroring the PyTorch forward, for validation."""
    wq, bq, wk, bk, wv, bv, wo, bo = params
    B, S, E = query.shape
    Dh = E // num_heads

    Q = (query @ wq + bq).reshape(B, S, num_heads, Dh).transpose(0, 2, 1, 3)
    K = (key @ wk + bk).reshape(B, S, num_heads, Dh).transpose(0, 2, 1, 3)
    V = (value @ wv + bv).reshape(B, S, num_heads, Dh).transpose(0, 2, 1, 3)

    scores = jnp.einsum("bhqd,bhkd->bhqk", Q, K) / math.sqrt(Dh)
    weights = jax.nn.softmax(scores, axis=-1)
    attn = jnp.einsum("bhqk,bhkd->bhqd", weights, V)
    attn = attn.transpose(0, 2, 1, 3).reshape(B, S, E)
    return attn @ wo + bo


if __name__ == "__main__":
    batch_size = 2
    seq_len = 10
    embed_dim = 512
    num_heads = 4

    key0 = jax.random.PRNGKey(0)
    keys = jax.random.split(key0, 11)

    # Deterministic synthetic parameters (nn.Linear: weight (E_out, E_in), bias (E,)).
    # Stored pre-transposed as (E_in, E_out); biases as (1, E).
    def linear_params(kw, kb, scale=0.02):
        w = scale * jax.random.normal(kw, (embed_dim, embed_dim), jnp.float32)
        b = scale * jax.random.normal(kb, (1, embed_dim), jnp.float32)
        return w, b

    wq, bq = linear_params(keys[0], keys[1])
    wk, bk = linear_params(keys[2], keys[3])
    wv, bv = linear_params(keys[4], keys[5])
    wo, bo = linear_params(keys[6], keys[7])
    params = (wq, bq, wk, bk, wv, bv, wo, bo)

    query = jax.random.uniform(keys[8], (batch_size, seq_len, embed_dim), jnp.float32)
    key_in = jax.random.uniform(keys[9], (batch_size, seq_len, embed_dim), jnp.float32)
    value = jax.random.uniform(keys[10], (batch_size, seq_len, embed_dim), jnp.float32)

    out = multi_head_attention(query, key_in, value, params, num_heads=num_heads)
    out = jax.block_until_ready(out)

    ref = mha_reference(query, key_in, value, params, num_heads=num_heads)
    assert out.shape == (batch_size, seq_len, embed_dim)
    # bf16 MXU operands (f32 accumulation) + approx reciprocal => relaxed tolerance.
    assert jnp.allclose(out, ref, atol=2e-2, rtol=2e-2), "mismatch vs reference"

    print("KERNEL_OK")
</pallas_src>

<mosaic_0001>
module attributes {stable_mosaic.version = 11 : i64} {
  func.func @mha_kernel(%arg0: i32, %arg1: memref<20x512xf32, #tpu.memory_space<vmem>>, %arg2: memref<20x512xf32, #tpu.memory_space<vmem>>, %arg3: memref<20x512xf32, #tpu.memory_space<vmem>>, %arg4: memref<512x1536xbf16, #tpu.memory_space<vmem>>, %arg5: memref<1x1536xf32, #tpu.memory_space<vmem>>, %arg6: memref<512x512xbf16, #tpu.memory_space<vmem>>, %arg7: memref<1x512xf32, #tpu.memory_space<vmem>>, %arg8: memref<20x512xf32, #tpu.memory_space<vmem>>) attributes {dimension_semantics = [#tpu.dimension_semantics<parallel>], iteration_bounds = array<i64: 1>, scalar_prefetch = 0 : i64, scratch_operands = 0 : i64, tpu.core_type = #tpu.core_type<tc>, window_params = [{transform_indices = @transform_0, window_bounds = array<i64: 20, 512>}, {transform_indices = @transform_1, window_bounds = array<i64: 20, 512>}, {transform_indices = @transform_2, window_bounds = array<i64: 20, 512>}, {pipeline_mode = #tpu.pipeline_mode<synchronous>, transform_indices = @transform_3, window_bounds = array<i64: 512, 1536>}, {pipeline_mode = #tpu.pipeline_mode<synchronous>, transform_indices = @transform_4, window_bounds = array<i64: 1, 1536>}, {pipeline_mode = #tpu.pipeline_mode<synchronous>, transform_indices = @transform_5, window_bounds = array<i64: 512, 512>}, {pipeline_mode = #tpu.pipeline_mode<synchronous>, transform_indices = @transform_6, window_bounds = array<i64: 1, 512>}, {transform_indices = @transform_7, window_bounds = array<i64: 20, 512>}]} {
    %c0 = arith.constant 0 : index
    %c0_0 = arith.constant 0 : index
    %0 = vector.load %arg1[%c0, %c0_0] : memref<20x512xf32, #tpu.memory_space<vmem>>, vector<20x512xf32>
    %1 = arith.truncf %0 : vector<20x512xf32> to vector<20x512xbf16>
    %c0_1 = arith.constant 0 : index
    %c0_2 = arith.constant 0 : index
    %2 = vector.load %arg2[%c0_1, %c0_2] : memref<20x512xf32, #tpu.memory_space<vmem>>, vector<20x512xf32>
    %3 = arith.truncf %2 : vector<20x512xf32> to vector<20x512xbf16>
    %c0_3 = arith.constant 0 : index
    %c0_4 = arith.constant 0 : index
    %4 = vector.load %arg3[%c0_3, %c0_4] : memref<20x512xf32, #tpu.memory_space<vmem>>, vector<20x512xf32>
    %5 = arith.truncf %4 : vector<20x512xf32> to vector<20x512xbf16>
    %c0_5 = arith.constant 0 : index
    %c0_6 = arith.constant 0 : index
    %6 = vector.load %arg4[%c0_5, %c0_6] : memref<512x1536xbf16, #tpu.memory_space<vmem>>, vector<512x512xbf16>
    %c0_7 = arith.constant 0 : index
    %c512 = arith.constant 512 : index
    %7 = vector.load %arg4[%c0_7, %c512] : memref<512x1536xbf16, #tpu.memory_space<vmem>>, vector<512x512xbf16>
    %c0_8 = arith.constant 0 : index
    %c1024 = arith.constant 1024 : index
    %8 = vector.load %arg4[%c0_8, %c1024] : memref<512x1536xbf16, #tpu.memory_space<vmem>>, vector<512x512xbf16>
    %c0_9 = arith.constant 0 : index
    %c0_10 = arith.constant 0 : index
    %9 = vector.load %arg5[%c0_9, %c0_10] : memref<1x1536xf32, #tpu.memory_space<vmem>>, vector<1x512xf32>
    %c0_11 = arith.constant 0 : index
    %c512_12 = arith.constant 512 : index
    %10 = vector.load %arg5[%c0_11, %c512_12] : memref<1x1536xf32, #tpu.memory_space<vmem>>, vector<1x512xf32>
    %c0_13 = arith.constant 0 : index
    %c1024_14 = arith.constant 1024 : index
    %11 = vector.load %arg5[%c0_13, %c1024_14] : memref<1x1536xf32, #tpu.memory_space<vmem>>, vector<1x512xf32>
    %cst = arith.constant dense<0.000000e+00> : vector<20x512xf32>
    %12 = tpu.matmul %1, %6, %cst {dimension_numbers = #tpu.dot_dimension_numbers<[1], [0], [0], [1], [0, 0, 1, 1], [], []>} : vector<20x512xbf16>, vector<512x512xbf16>, vector<20x512xf32> -> vector<20x512xf32>
    %13 = vector.broadcast %9 : vector<1x512xf32> to vector<20x512xf32>
    %14 = arith.addf %12, %13 : vector<20x512xf32>
    %cst_15 = arith.constant dense<0.000000e+00> : vector<20x512xf32>
    %15 = tpu.matmul %3, %7, %cst_15 {dimension_numbers = #tpu.dot_dimension_numbers<[1], [0], [0], [1], [0, 0, 1, 1], [], []>} : vector<20x512xbf16>, vector<512x512xbf16>, vector<20x512xf32> -> vector<20x512xf32>
    %16 = vector.broadcast %10 : vector<1x512xf32> to vector<20x512xf32>
    %17 = arith.addf %15, %16 : vector<20x512xf32>
    %cst_16 = arith.constant dense<0.000000e+00> : vector<20x512xf32>
    %18 = tpu.matmul %5, %8, %cst_16 {dimension_numbers = #tpu.dot_dimension_numbers<[1], [0], [0], [1], [0, 0, 1, 1], [], []>} : vector<20x512xbf16>, vector<512x512xbf16>, vector<20x512xf32> -> vector<20x512xf32>
    %19 = vector.broadcast %11 : vector<1x512xf32> to vector<20x512xf32>
    %20 = arith.addf %18, %19 : vector<20x512xf32>
    %cst_17 = arith.constant 0.0883883461 : f32
    %21 = vector.broadcast %cst_17 : f32 to vector<20x512xf32>
    %22 = arith.mulf %14, %21 : vector<20x512xf32>
    %23 = arith.truncf %22 : vector<20x512xf32> to vector<20x512xbf16>
    %24 = arith.truncf %17 : vector<20x512xf32> to vector<20x512xbf16>
    %25 = arith.truncf %20 : vector<20x512xf32> to vector<20x512xbf16>
    %c0_18 = arith.constant 0 : index
    %c0_19 = arith.constant 0 : index
    %26 = vector.load %arg6[%c0_18, %c0_19] : memref<512x512xbf16, #tpu.memory_space<vmem>>, vector<512x512xbf16>
    %c0_20 = arith.constant 0 : index
    %c0_21 = arith.constant 0 : index
    %27 = vector.load %arg7[%c0_20, %c0_21] : memref<1x512xf32, #tpu.memory_space<vmem>>, vector<1x512xf32>
    %cst_22 = arith.constant 0.000000e+00 : f32
    %28 = vector.broadcast %cst_22 : f32 to vector<10x512xf32>
    %29 = vector.extract_strided_slice %23 {offsets = [0, 0], sizes = [10, 128], strides = [1, 1]} : vector<20x512xbf16> to vector<10x128xbf16>
    %30 = vector.extract_strided_slice %24 {offsets = [0, 0], sizes = [10, 128], strides = [1, 1]} : vector<20x512xbf16> to vector<10x128xbf16>
    %31 = vector.extract_strided_slice %25 {offsets = [0, 0], sizes = [10, 128], strides = [1, 1]} : vector<20x512xbf16> to vector<10x128xbf16>
    %cst_23 = arith.constant dense<0.000000e+00> : vector<10x10xf32>
    %32 = tpu.matmul %29, %30, %cst_23 {dimension_numbers = #tpu.dot_dimension_numbers<[1], [1], [0], [0], [0, 0, 1, 0], [], []>} : vector<10x128xbf16>, vector<10x128xbf16>, vector<10x10xf32> -> vector<10x10xf32>
    %cst_24 = arith.constant dense<0xFF800000> : vector<10xf32>
    %33 = vector.multi_reduction <maximumf>, %32, %cst_24 [1] : vector<10x10xf32> to vector<10xf32>
    %34 = vector.shape_cast %33 : vector<10xf32> to vector<10x1xf32>
    %35 = vector.broadcast %34 : vector<10x1xf32> to vector<10x10xf32>
    %36 = arith.subf %32, %35 : vector<10x10xf32>
    %37 = math.exp %36 : vector<10x10xf32>
    %cst_25 = arith.constant dense<0.000000e+00> : vector<10xf32>
    %38 = vector.multi_reduction <add>, %37, %cst_25 [1] : vector<10x10xf32> to vector<10xf32>
    %39 = vector.shape_cast %38 : vector<10xf32> to vector<10x1xf32>
    %40 = tpu.reciprocal %39 {approx = true} : vector<10x1xf32> -> vector<10x1xf32>
    %41 = vector.broadcast %40 : vector<10x1xf32> to vector<10x10xf32>
    %42 = arith.mulf %37, %41 : vector<10x10xf32>
    %43 = arith.truncf %42 : vector<10x10xf32> to vector<10x10xbf16>
    %cst_26 = arith.constant dense<0.000000e+00> : vector<10x128xf32>
    %44 = tpu.matmul %43, %31, %cst_26 {dimension_numbers = #tpu.dot_dimension_numbers<[1], [0], [0], [1], [0, 0, 1, 1], [], []>} : vector<10x10xbf16>, vector<10x128xbf16>, vector<10x128xf32> -> vector<10x128xf32>
    %45 = arith.truncf %44 : vector<10x128xf32> to vector<10x128xbf16>
    %46 = vector.extract_strided_slice %26 {offsets = [0, 0], sizes = [128, 512], strides = [1, 1]} : vector<512x512xbf16> to vector<128x512xbf16>
    %cst_27 = arith.constant dense<0.000000e+00> : vector<10x512xf32>
    %47 = tpu.matmul %45, %46, %cst_27 {dimension_numbers = #tpu.dot_dimension_numbers<[1], [0], [0], [1], [0, 0, 1, 1], [], []>} : vector<10x128xbf16>, vector<128x512xbf16>, vector<10x512xf32> -> vector<10x512xf32>
    %48 = arith.addf %28, %47 : vector<10x512xf32>
    %49 = vector.extract_strided_slice %23 {offsets = [0, 128], sizes = [10, 128], strides = [1, 1]} : vector<20x512xbf16> to vector<10x128xbf16>
    %50 = vector.extract_strided_slice %24 {offsets = [0, 128], sizes = [10, 128], strides = [1, 1]} : vector<20x512xbf16> to vector<10x128xbf16>
    %51 = vector.extract_strided_slice %25 {offsets = [0, 128], sizes = [10, 128], strides = [1, 1]} : vector<20x512xbf16> to vector<10x128xbf16>
    %cst_28 = arith.constant dense<0.000000e+00> : vector<10x10xf32>
    %52 = tpu.matmul %49, %50, %cst_28 {dimension_numbers = #tpu.dot_dimension_numbers<[1], [1], [0], [0], [0, 0, 1, 0], [], []>} : vector<10x128xbf16>, vector<10x128xbf16>, vector<10x10xf32> -> vector<10x10xf32>
    %cst_29 = arith.constant dense<0xFF800000> : vector<10xf32>
    %53 = vector.multi_reduction <maximumf>, %52, %cst_29 [1] : vector<10x10xf32> to vector<10xf32>
    %54 = vector.shape_cast %53 : vector<10xf32> to vector<10x1xf32>
    %55 = vector.broadcast %54 : vector<10x1xf32> to vector<10x10xf32>
    %56 = arith.subf %52, %55 : vector<10x10xf32>
    %57 = math.exp %56 : vector<10x10xf32>
    %cst_30 = arith.constant dense<0.000000e+00> : vector<10xf32>
    %58 = vector.multi_reduction <add>, %57, %cst_30 [1] : vector<10x10xf32> to vector<10xf32>
    %59 = vector.shape_cast %58 : vector<10xf32> to vector<10x1xf32>
    %60 = tpu.reciprocal %59 {approx = true} : vector<10x1xf32> -> vector<10x1xf32>
    %61 = vector.broadcast %60 : vector<10x1xf32> to vector<10x10xf32>
    %62 = arith.mulf %57, %61 : vector<10x10xf32>
    %63 = arith.truncf %62 : vector<10x10xf32> to vector<10x10xbf16>
    %cst_31 = arith.constant dense<0.000000e+00> : vector<10x128xf32>
    %64 = tpu.matmul %63, %51, %cst_31 {dimension_numbers = #tpu.dot_dimension_numbers<[1], [0], [0], [1], [0, 0, 1, 1], [], []>} : vector<10x10xbf16>, vector<10x128xbf16>, vector<10x128xf32> -> vector<10x128xf32>
    %65 = arith.truncf %64 : vector<10x128xf32> to vector<10x128xbf16>
    %66 = vector.extract_strided_slice %26 {offsets = [128, 0], sizes = [128, 512], strides = [1, 1]} : vector<512x512xbf16> to vector<128x512xbf16>
    %cst_32 = arith.constant dense<0.000000e+00> : vector<10x512xf32>
    %67 = tpu.matmul %65, %66, %cst_32 {dimension_numbers = #tpu.dot_dimension_numbers<[1], [0], [0], [1], [0, 0, 1, 1], [], []>} : vector<10x128xbf16>, vector<128x512xbf16>, vector<10x512xf32> -> vector<10x512xf32>
    %68 = arith.addf %48, %67 : vector<10x512xf32>
    %69 = vector.extract_strided_slice %23 {offsets = [0, 256], sizes = [10, 128], strides = [1, 1]} : vector<20x512xbf16> to vector<10x128xbf16>
    %70 = vector.extract_strided_slice %24 {offsets = [0, 256], sizes = [10, 128], strides = [1, 1]} : vector<20x512xbf16> to vector<10x128xbf16>
    %71 = vector.extract_strided_slice %25 {offsets = [0, 256], sizes = [10, 128], strides = [1, 1]} : vector<20x512xbf16> to vector<10x128xbf16>
    %cst_33 = arith.constant dense<0.000000e+00> : vector<10x10xf32>
    %72 = tpu.matmul %69, %70, %cst_33 {dimension_numbers = #tpu.dot_dimension_numbers<[1], [1], [0], [0], [0, 0, 1, 0], [], []>} : vector<10x128xbf16>, vector<10x128xbf16>, vector<10x10xf32> -> vector<10x10xf32>
    %cst_34 = arith.constant dense<0xFF800000> : vector<10xf32>
    %73 = vector.multi_reduction <maximumf>, %72, %cst_34 [1] : vector<10x10xf32> to vector<10xf32>
    %74 = vector.shape_cast %73 : vector<10xf32> to vector<10x1xf32>
    %75 = vector.broadcast %74 : vector<10x1xf32> to vector<10x10xf32>
    %76 = arith.subf %72, %75 : vector<10x10xf32>
    %77 = math.exp %76 : vector<10x10xf32>
    %cst_35 = arith.constant dense<0.000000e+00> : vector<10xf32>
    %78 = vector.multi_reduction <add>, %77, %cst_35 [1] : vector<10x10xf32> to vector<10xf32>
    %79 = vector.shape_cast %78 : vector<10xf32> to vector<10x1xf32>
    %80 = tpu.reciprocal %79 {approx = true} : vector<10x1xf32> -> vector<10x1xf32>
    %81 = vector.broadcast %80 : vector<10x1xf32> to vector<10x10xf32>
    %82 = arith.mulf %77, %81 : vector<10x10xf32>
    %83 = arith.truncf %82 : vector<10x10xf32> to vector<10x10xbf16>
    %cst_36 = arith.constant dense<0.000000e+00> : vector<10x128xf32>
    %84 = tpu.matmul %83, %71, %cst_36 {dimension_numbers = #tpu.dot_dimension_numbers<[1], [0], [0], [1], [0, 0, 1, 1], [], []>} : vector<10x10xbf16>, vector<10x128xbf16>, vector<10x128xf32> -> vector<10x128xf32>
    %85 = arith.truncf %84 : vector<10x128xf32> to vector<10x128xbf16>
    %86 = vector.extract_strided_slice %26 {offsets = [256, 0], sizes = [128, 512], strides = [1, 1]} : vector<512x512xbf16> to vector<128x512xbf16>
    %cst_37 = arith.constant dense<0.000000e+00> : vector<10x512xf32>
    %87 = tpu.matmul %85, %86, %cst_37 {dimension_numbers = #tpu.dot_dimension_numbers<[1], [0], [0], [1], [0, 0, 1, 1], [], []>} : vector<10x128xbf16>, vector<128x512xbf16>, vector<10x512xf32> -> vector<10x512xf32>
    %88 = arith.addf %68, %87 : vector<10x512xf32>
    %89 = vector.extract_strided_slice %23 {offsets = [0, 384], sizes = [10, 128], strides = [1, 1]} : vector<20x512xbf16> to vector<10x128xbf16>
    %90 = vector.extract_strided_slice %24 {offsets = [0, 384], sizes = [10, 128], strides = [1, 1]} : vector<20x512xbf16> to vector<10x128xbf16>
    %91 = vector.extract_strided_slice %25 {offsets = [0, 384], sizes = [10, 128], strides = [1, 1]} : vector<20x512xbf16> to vector<10x128xbf16>
    %cst_38 = arith.constant dense<0.000000e+00> : vector<10x10xf32>
    %92 = tpu.matmul %89, %90, %cst_38 {dimension_numbers = #tpu.dot_dimension_numbers<[1], [1], [0], [0], [0, 0, 1, 0], [], []>} : vector<10x128xbf16>, vector<10x128xbf16>, vector<10x10xf32> -> vector<10x10xf32>
    %cst_39 = arith.constant dense<0xFF800000> : vector<10xf32>
    %93 = vector.multi_reduction <maximumf>, %92, %cst_39 [1] : vector<10x10xf32> to vector<10xf32>
    %94 = vector.shape_cast %93 : vector<10xf32> to vector<10x1xf32>
    %95 = vector.broadcast %94 : vector<10x1xf32> to vector<10x10xf32>
    %96 = arith.subf %92, %95 : vector<10x10xf32>
    %97 = math.exp %96 : vector<10x10xf32>
    %cst_40 = arith.constant dense<0.000000e+00> : vector<10xf32>
    %98 = vector.multi_reduction <add>, %97, %cst_40 [1] : vector<10x10xf32> to vector<10xf32>
    %99 = vector.shape_cast %98 : vector<10xf32> to vector<10x1xf32>
    %100 = tpu.reciprocal %99 {approx = true} : vector<10x1xf32> -> vector<10x1xf32>
    %101 = vector.broadcast %100 : vector<10x1xf32> to vector<10x10xf32>
    %102 = arith.mulf %97, %101 : vector<10x10xf32>
    %103 = arith.truncf %102 : vector<10x10xf32> to vector<10x10xbf16>
    %cst_41 = arith.constant dense<0.000000e+00> : vector<10x128xf32>
    %104 = tpu.matmul %103, %91, %cst_41 {dimension_numbers = #tpu.dot_dimension_numbers<[1], [0], [0], [1], [0, 0, 1, 1], [], []>} : vector<10x10xbf16>, vector<10x128xbf16>, vector<10x128xf32> -> vector<10x128xf32>
    %105 = arith.truncf %104 : vector<10x128xf32> to vector<10x128xbf16>
    %106 = vector.extract_strided_slice %26 {offsets = [384, 0], sizes = [128, 512], strides = [1, 1]} : vector<512x512xbf16> to vector<128x512xbf16>
    %cst_42 = arith.constant dense<0.000000e+00> : vector<10x512xf32>
    %107 = tpu.matmul %105, %106, %cst_42 {dimension_numbers = #tpu.dot_dimension_numbers<[1], [0], [0], [1], [0, 0, 1, 1], [], []>} : vector<10x128xbf16>, vector<128x512xbf16>, vector<10x512xf32> -> vector<10x512xf32>
    %108 = arith.addf %88, %107 : vector<10x512xf32>
    %109 = vector.broadcast %27 : vector<1x512xf32> to vector<10x512xf32>
    %110 = arith.addf %108, %109 : vector<10x512xf32>
    %c0_43 = arith.constant 0 : index
    %c0_44 = arith.constant 0 : index
    %111 = vector.load %arg8[%c0_43, %c0_44] : memref<20x512xf32, #tpu.memory_space<vmem>>, vector<10x512xf32>
    tpu.vector_store %arg8[%c0_43, %c0_44], %110 {strides = array<i32>} : memref<20x512xf32, #tpu.memory_space<vmem>>, vector<10x512xf32>,
    %cst_45 = arith.constant 0.000000e+00 : f32
    %112 = vector.broadcast %cst_45 : f32 to vector<10x512xf32>
    %113 = vector.extract_strided_slice %23 {offsets = [10, 0], sizes = [10, 128], strides = [1, 1]} : vector<20x512xbf16> to vector<10x128xbf16>
    %114 = vector.extract_strided_slice %24 {offsets = [10, 0], sizes = [10, 128], strides = [1, 1]} : vector<20x512xbf16> to vector<10x128xbf16>
    %115 = vector.extract_strided_slice %25 {offsets = [10, 0], sizes = [10, 128], strides = [1, 1]} : vector<20x512xbf16> to vector<10x128xbf16>
    %cst_46 = arith.constant dense<0.000000e+00> : vector<10x10xf32>
    %116 = tpu.matmul %113, %114, %cst_46 {dimension_numbers = #tpu.dot_dimension_numbers<[1], [1], [0], [0], [0, 0, 1, 0], [], []>} : vector<10x128xbf16>, vector<10x128xbf16>, vector<10x10xf32> -> vector<10x10xf32>
    %cst_47 = arith.constant dense<0xFF800000> : vector<10xf32>
    %117 = vector.multi_reduction <maximumf>, %116, %cst_47 [1] : vector<10x10xf32> to vector<10xf32>
    %118 = vector.shape_cast %117 : vector<10xf32> to vector<10x1xf32>
    %119 = vector.broadcast %118 : vector<10x1xf32> to vector<10x10xf32>
    %120 = arith.subf %116, %119 : vector<10x10xf32>
    %121 = math.exp %120 : vector<10x10xf32>
    %cst_48 = arith.constant dense<0.000000e+00> : vector<10xf32>
    %122 = vector.multi_reduction <add>, %121, %cst_48 [1] : vector<10x10xf32> to vector<10xf32>
    %123 = vector.shape_cast %122 : vector<10xf32> to vector<10x1xf32>
    %124 = tpu.reciprocal %123 {approx = true} : vector<10x1xf32> -> vector<10x1xf32>
    %125 = vector.broadcast %124 : vector<10x1xf32> to vector<10x10xf32>
    %126 = arith.mulf %121, %125 : vector<10x10xf32>
    %127 = arith.truncf %126 : vector<10x10xf32> to vector<10x10xbf16>
    %cst_49 = arith.constant dense<0.000000e+00> : vector<10x128xf32>
    %128 = tpu.matmul %127, %115, %cst_49 {dimension_numbers = #tpu.dot_dimension_numbers<[1], [0], [0], [1], [0, 0, 1, 1], [], []>} : vector<10x10xbf16>, vector<10x128xbf16>, vector<10x128xf32> -> vector<10x128xf32>
    %129 = arith.truncf %128 : vector<10x128xf32> to vector<10x128xbf16>
    %130 = vector.extract_strided_slice %26 {offsets = [0, 0], sizes = [128, 512], strides = [1, 1]} : vector<512x512xbf16> to vector<128x512xbf16>
    %cst_50 = arith.constant dense<0.000000e+00> : vector<10x512xf32>
    %131 = tpu.matmul %129, %130, %cst_50 {dimension_numbers = #tpu.dot_dimension_numbers<[1], [0], [0], [1], [0, 0, 1, 1], [], []>} : vector<10x128xbf16>, vector<128x512xbf16>, vector<10x512xf32> -> vector<10x512xf32>
    %132 = arith.addf %112, %131 : vector<10x512xf32>
    %133 = vector.extract_strided_slice %23 {offsets = [10, 128], sizes = [10, 128], strides = [1, 1]} : vector<20x512xbf16> to vector<10x128xbf16>
    %134 = vector.extract_strided_slice %24 {offsets = [10, 128], sizes = [10, 128], strides = [1, 1]} : vector<20x512xbf16> to vector<10x128xbf16>
    %135 = vector.extract_strided_slice %25 {offsets = [10, 128], sizes = [10, 128], strides = [1, 1]} : vector<20x512xbf16> to vector<10x128xbf16>
    %cst_51 = arith.constant dense<0.000000e+00> : vector<10x10xf32>
    %136 = tpu.matmul %133, %134, %cst_51 {dimension_numbers = #tpu.dot_dimension_numbers<[1], [1], [0], [0], [0, 0, 1, 0], [], []>} : vector<10x128xbf16>, vector<10x128xbf16>, vector<10x10xf32> -> vector<10x10xf32>
    %cst_52 = arith.constant dense<0xFF800000> : vector<10xf32>
    %137 = vector.multi_reduction <maximumf>, %136, %cst_52 [1] : vector<10x10xf32> to vector<10xf32>
    %138 = vector.shape_cast %137 : vector<10xf32> to vector<10x1xf32>
    %139 = vector.broadcast %138 : vector<10x1xf32> to vector<10x10xf32>
    %140 = arith.subf %136, %139 : vector<10x10xf32>
    %141 = math.exp %140 : vector<10x10xf32>
    %cst_53 = arith.constant dense<0.000000e+00> : vector<10xf32>
    %142 = vector.multi_reduction <add>, %141, %cst_53 [1] : vector<10x10xf32> to vector<10xf32>
    %143 = vector.shape_cast %142 : vector<10xf32> to vector<10x1xf32>
    %144 = tpu.reciprocal %143 {approx = true} : vector<10x1xf32> -> vector<10x1xf32>
    %145 = vector.broadcast %144 : vector<10x1xf32> to vector<10x10xf32>
    %146 = arith.mulf %141, %145 : vector<10x10xf32>
    %147 = arith.truncf %146 : vector<10x10xf32> to vector<10x10xbf16>
    %cst_54 = arith.constant dense<0.000000e+00> : vector<10x128xf32>
    %148 = tpu.matmul %147, %135, %cst_54 {dimension_numbers = #tpu.dot_dimension_numbers<[1], [0], [0], [1], [0, 0, 1, 1], [], []>} : vector<10x10xbf16>, vector<10x128xbf16>, vector<10x128xf32> -> vector<10x128xf32>
    %149 = arith.truncf %148 : vector<10x128xf32> to vector<10x128xbf16>
    %150 = vector.extract_strided_slice %26 {offsets = [128, 0], sizes = [128, 512], strides = [1, 1]} : vector<512x512xbf16> to vector<128x512xbf16>
    %cst_55 = arith.constant dense<0.000000e+00> : vector<10x512xf32>
    %151 = tpu.matmul %149, %150, %cst_55 {dimension_numbers = #tpu.dot_dimension_numbers<[1], [0], [0], [1], [0, 0, 1, 1], [], []>} : vector<10x128xbf16>, vector<128x512xbf16>, vector<10x512xf32> -> vector<10x512xf32>
    %152 = arith.addf %132, %151 : vector<10x512xf32>
    %153 = vector.extract_strided_slice %23 {offsets = [10, 256], sizes = [10, 128], strides = [1, 1]} : vector<20x512xbf16> to vector<10x128xbf16>
    %154 = vector.extract_strided_slice %24 {offsets = [10, 256], sizes = [10, 128], strides = [1, 1]} : vector<20x512xbf16> to vector<10x128xbf16>
    %155 = vector.extract_strided_slice %25 {offsets = [10, 256], sizes = [10, 128], strides = [1, 1]} : vector<20x512xbf16> to vector<10x128xbf16>
    %cst_56 = arith.constant dense<0.000000e+00> : vector<10x10xf32>
    %156 = tpu.matmul %153, %154, %cst_56 {dimension_numbers = #tpu.dot_dimension_numbers<[1], [1], [0], [0], [0, 0, 1, 0], [], []>} : vector<10x128xbf16>, vector<10x128xbf16>, vector<10x10xf32> -> vector<10x10xf32>
    %cst_57 = arith.constant dense<0xFF800000> : vector<10xf32>
    %157 = vector.multi_reduction <maximumf>, %156, %cst_57 [1] : vector<10x10xf32> to vector<10xf32>
    %158 = vector.shape_cast %157 : vector<10xf32> to vector<10x1xf32>
    %159 = vector.broadcast %158 : vector<10x1xf32> to vector<10x10xf32>
    %160 = arith.subf %156, %159 : vector<10x10xf32>
    %161 = math.exp %160 : vector<10x10xf32>
    %cst_58 = arith.constant dense<0.000000e+00> : vector<10xf32>
    %162 = vector.multi_reduction <add>, %161, %cst_58 [1] : vector<10x10xf32> to vector<10xf32>
    %163 = vector.shape_cast %162 : vector<10xf32> to vector<10x1xf32>
    %164 = tpu.reciprocal %163 {approx = true} : vector<10x1xf32> -> vector<10x1xf32>
    %165 = vector.broadcast %164 : vector<10x1xf32> to vector<10x10xf32>
    %166 = arith.mulf %161, %165 : vector<10x10xf32>
    %167 = arith.truncf %166 : vector<10x10xf32> to vector<10x10xbf16>
    %cst_59 = arith.constant dense<0.000000e+00> : vector<10x128xf32>
    %168 = tpu.matmul %167, %155, %cst_59 {dimension_numbers = #tpu.dot_dimension_numbers<[1], [0], [0], [1], [0, 0, 1, 1], [], []>} : vector<10x10xbf16>, vector<10x128xbf16>, vector<10x128xf32> -> vector<10x128xf32>
    %169 = arith.truncf %168 : vector<10x128xf32> to vector<10x128xbf16>
    %170 = vector.extract_strided_slice %26 {offsets = [256, 0], sizes = [128, 512], strides = [1, 1]} : vector<512x512xbf16> to vector<128x512xbf16>
    %cst_60 = arith.constant dense<0.000000e+00> : vector<10x512xf32>
    %171 = tpu.matmul %169, %170, %cst_60 {dimension_numbers = #tpu.dot_dimension_numbers<[1], [0], [0], [1], [0, 0, 1, 1], [], []>} : vector<10x128xbf16>, vector<128x512xbf16>, vector<10x512xf32> -> vector<10x512xf32>
    %172 = arith.addf %152, %171 : vector<10x512xf32>
    %173 = vector.extract_strided_slice %23 {offsets = [10, 384], sizes = [10, 128], strides = [1, 1]} : vector<20x512xbf16> to vector<10x128xbf16>
    %174 = vector.extract_strided_slice %24 {offsets = [10, 384], sizes = [10, 128], strides = [1, 1]} : vector<20x512xbf16> to vector<10x128xbf16>
    %175 = vector.extract_strided_slice %25 {offsets = [10, 384], sizes = [10, 128], strides = [1, 1]} : vector<20x512xbf16> to vector<10x128xbf16>
    %cst_61 = arith.constant dense<0.000000e+00> : vector<10x10xf32>
    %176 = tpu.matmul %173, %174, %cst_61 {dimension_numbers = #tpu.dot_dimension_numbers<[1], [1], [0], [0], [0, 0, 1, 0], [], []>} : vector<10x128xbf16>, vector<10x128xbf16>, vector<10x10xf32> -> vector<10x10xf32>
    %cst_62 = arith.constant dense<0xFF800000> : vector<10xf32>
    %177 = vector.multi_reduction <maximumf>, %176, %cst_62 [1] : vector<10x10xf32> to vector<10xf32>
    %178 = vector.shape_cast %177 : vector<10xf32> to vector<10x1xf32>
    %179 = vector.broadcast %178 : vector<10x1xf32> to vector<10x10xf32>
    %180 = arith.subf %176, %179 : vector<10x10xf32>
    %181 = math.exp %180 : vector<10x10xf32>
    %cst_63 = arith.constant dense<0.000000e+00> : vector<10xf32>
    %182 = vector.multi_reduction <add>, %181, %cst_63 [1] : vector<10x10xf32> to vector<10xf32>
    %183 = vector.shape_cast %182 : vector<10xf32> to vector<10x1xf32>
    %184 = tpu.reciprocal %183 {approx = true} : vector<10x1xf32> -> vector<10x1xf32>
    %185 = vector.broadcast %184 : vector<10x1xf32> to vector<10x10xf32>
    %186 = arith.mulf %181, %185 : vector<10x10xf32>
    %187 = arith.truncf %186 : vector<10x10xf32> to vector<10x10xbf16>
    %cst_64 = arith.constant dense<0.000000e+00> : vector<10x128xf32>
    %188 = tpu.matmul %187, %175, %cst_64 {dimension_numbers = #tpu.dot_dimension_numbers<[1], [0], [0], [1], [0, 0, 1, 1], [], []>} : vector<10x10xbf16>, vector<10x128xbf16>, vector<10x128xf32> -> vector<10x128xf32>
    %189 = arith.truncf %188 : vector<10x128xf32> to vector<10x128xbf16>
    %190 = vector.extract_strided_slice %26 {offsets = [384, 0], sizes = [128, 512], strides = [1, 1]} : vector<512x512xbf16> to vector<128x512xbf16>
    %cst_65 = arith.constant dense<0.000000e+00> : vector<10x512xf32>
    %191 = tpu.matmul %189, %190, %cst_65 {dimension_numbers = #tpu.dot_dimension_numbers<[1], [0], [0], [1], [0, 0, 1, 1], [], []>} : vector<10x128xbf16>, vector<128x512xbf16>, vector<10x512xf32> -> vector<10x512xf32>
    %192 = arith.addf %172, %191 : vector<10x512xf32>
    %193 = vector.broadcast %27 : vector<1x512xf32> to vector<10x512xf32>
    %194 = arith.addf %192, %193 : vector<10x512xf32>
    %c10 = arith.constant 10 : index
    %c0_66 = arith.constant 0 : index
    %195 = vector.load %arg8[%c10, %c0_66] : memref<20x512xf32, #tpu.memory_space<vmem>>, vector<10x512xf32>
    tpu.vector_store %arg8[%c10, %c0_66], %194 {strides = array<i32>} : memref<20x512xf32, #tpu.memory_space<vmem>>, vector<10x512xf32>,
    return
  }
  func.func @transform_0(%arg0: i32) -> (i32, i32) {
    %c0_i32 = arith.constant 0 : i32
    %c0_i32_0 = arith.constant 0 : i32
    return %arg0, %c0_i32 : i32, i32
  }
  func.func @transform_1(%arg0: i32) -> (i32, i32) {
    %c0_i32 = arith.constant 0 : i32
    %c0_i32_0 = arith.constant 0 : i32
    return %arg0, %c0_i32 : i32, i32
  }
  func.func @transform_2(%arg0: i32) -> (i32, i32) {
    %c0_i32 = arith.constant 0 : i32
    %c0_i32_0 = arith.constant 0 : i32
    return %arg0, %c0_i32 : i32, i32
  }
  func.func @transform_3(%arg0: i32) -> (i32, i32) {
    %c0_i32 = arith.constant 0 : i32
    %c0_i32_0 = arith.constant 0 : i32
    %c0_i32_1 = arith.constant 0 : i32
    return %c0_i32, %c0_i32_0 : i32, i32
  }
  func.func @transform_4(%arg0: i32) -> (i32, i32) {
    %c0_i32 = arith.constant 0 : i32
    %c0_i32_0 = arith.constant 0 : i32
    %c0_i32_1 = arith.constant 0 : i32
    return %c0_i32, %c0_i32_0 : i32, i32
  }
  func.func @transform_5(%arg0: i32) -> (i32, i32) {
    %c0_i32 = arith.constant 0 : i32
    %c0_i32_0 = arith.constant 0 : i32
    %c0_i32_1 = arith.constant 0 : i32
    return %c0_i32, %c0_i32_0 : i32, i32
  }
  func.func @transform_6(%arg0: i32) -> (i32, i32) {
    %c0_i32 = arith.constant 0 : i32
    %c0_i32_0 = arith.constant 0 : i32
    %c0_i32_1 = arith.constant 0 : i32
    return %c0_i32, %c0_i32_0 : i32, i32
  }
  func.func @transform_7(%arg0: i32) -> (i32, i32) {
    %c0_i32 = arith.constant 0 : i32
    %c0_i32_0 = arith.constant 0 : i32
    return %arg0, %c0_i32 : i32, i32
  }
}

</mosaic_0001>

<bundles_post_ra>
// kernel: tpu_custom_call.1
= control target key start
LH: loop header
LB: loop body
LE: loop exit
PB: predicated region body
PF: predicated region fallthrough
CT: control target
= control target key end

     0   :  { %12 = vsyncpa [#allocation3], 0  ;;  %s8455_s0 = inlined_call_operand.hbm [shape: f32[20,512], index: 0, kind: input, shape index: {}]   ;;  %s8456_s1 = inlined_call_operand.hbm [shape: f32[20,512], index: 1, kind: input, shape index: {}]   ;;  %s8457_s2 = inlined_call_operand.hbm [shape: f32[20,512], index: 2, kind: input, shape index: {}]   ;;  %s8458_s3 = inlined_call_operand.hbm [shape: bf16[512,1536], index: 3, kind: input, shape index: {}]   ;;  %s8459_s4 = inlined_call_operand.hbm [shape: f32[1,1536], index: 4, kind: input, shape index: {}]   ;;  %s8460_s5 = inlined_call_operand.hbm [shape: bf16[512,512], index: 5, kind: input, shape index: {}]   ;;  %s8461_s6 = inlined_call_operand.hbm [shape: f32[1,512], index: 6, kind: input, shape index: {}]   ;;  %s8462_s7 = inlined_call_operand.hbm [shape: f32[20,512], index: 7, kind: output, shape index: {}]  }
   0x1   :  { %13 = vsyncpa [#allocation6], 0 }
   0x2   :  { %14 = vsyncpa [#allocation9], 0 }
   0x3   :  { %15 = vsyncpa [#allocation12], 0 }
   0x4   :  { %16 = vsyncpa [#allocation4], 0  ;;  %s7439_s24 = smov [#allocation5]   ;;  %s7440_s26 = smov [#allocation8]  }
   0x5   :  { %s34_s25 = sshll.u32 %s7439_s24, 4  ;;  %s58_s27 = sshll.u32 %s7440_s26, 4  ;;  %s35_s25 = int_to_ptr.vmem [resolvable:$true] %s34_s25  ;;  %s59_s27 = int_to_ptr.vmem [resolvable:$true] %s58_s27 }
   0x6   :  { %s7277_s28 = scalar_lea.vmem %s35_s25, 1536  ;;  %p7282_p1 = scmp.lt.s32.totalorder %s35_s25, %s35_s25 }
   0x7   :  { %p7278_p0 = scmp.ne.s32.totalorder %s35_s25, %s7277_s28  ;;  %p7283_p2 = scmp.lt.s32.totalorder %s7277_s28, %s7277_s28 }
   0x9   :  { %p7284_p3 = por %p7283_p2, %p7282_p1 }
   0xb   :  { %p7285_p4 = pnand %p7284_p3, %p7278_p0 }
   0xd   :  { %7288 = shalt.err (!%p7285_p4)
}
   0xe   :  { %s7441_s29 = smov 512   ;;  %s7442_s30 = smov 32  }
   0xf   :  { %40 = dma.hbm_to_vmem [thread:$0]  %s8456_s1, 1536, %s35_s25, [#allocation6], %s7441_s29, %s7441_s29, %s7442_s30  }
  0x10   :  { %s7297_s10 = scalar_lea.vmem %s59_s27, 49152  ;;  %p7302_p6 = scmp.lt.s32.totalorder %s59_s27, %s59_s27 }
  0x11   :  { %p7298_p5 = scmp.ne.s32.totalorder %s59_s27, %s7297_s10  ;;  %p7303_p7 = scmp.lt.s32.totalorder %s7297_s10, %s7297_s10 }
  0x13   :  { %p7304_p8 = por %p7303_p7, %p7302_p6 }
  0x15   :  { %p7305_p9 = pnand %p7304_p8, %p7298_p5 }
  0x17   :  { %7308 = shalt.err (!%p7305_p9)
}
  0x18   :  { %s7443_s11 = smov 768   ;;  %s7444_s12 = smov 48  }
  0x19   :  { %64 = dma.hbm_to_vmem [thread:$0]  %s8458_s3, 49152, %s59_s27, [#allocation9], %s7443_s11, %s7443_s11, %s7444_s12  }
  0x1a   :  { %s7445_s15 = smov [#allocation11]  }
  0x1b   :  { %s80_s16 = sshll.u32 %s7445_s15, 4  ;;  %s81_s16 = int_to_ptr.vmem [resolvable:$true] %s80_s16 }
  0x1c   :  { %s7317_s17 = scalar_lea.vmem %s81_s16, 16384  ;;  %p7322_p11 = scmp.lt.s32.totalorder %s81_s16, %s81_s16 }
  0x1d   :  { %p7318_p10 = scmp.ne.s32.totalorder %s81_s16, %s7317_s17  ;;  %p7323_p12 = scmp.lt.s32.totalorder %s7317_s17, %s7317_s17 }
  0x1f   :  { %p7324_p13 = por %p7323_p12, %p7322_p11 }
  0x21   :  { %p7325_p0 = pnand %p7324_p13, %p7318_p10 }
  0x23   :  { %7328 = shalt.err (!%p7325_p0)
}
  0x24   :  { %s7446_s1 = smov 256   ;;  %s7447_s18 = smov 16  }
  0x25   :  { %86 = dma.hbm_to_vmem [thread:$0]  %s8460_s5, 16384, %s81_s16, [#allocation12], %s7446_s1, %s7446_s1, %s7447_s18  }
  0x26   :  { %s7448_s21 = smov [#allocation2]   ;;  %s7449_s3 = smov [#allocation7]  }
  0x27   :  { %s22_s22 = sshll.u32 %s7448_s21, 4  ;;  %s46_s23 = sshll.u32 %s7449_s3, 4  ;;  %s23_s22 = int_to_ptr.vmem [resolvable:$true] %s22_s22  ;;  %s47_s23 = int_to_ptr.vmem [resolvable:$true] %s46_s23 }
  0x28   :  { %s7337_s24 = scalar_lea.vmem %s23_s22, 1536  ;;  %p7342_p2 = scmp.lt.s32.totalorder %s23_s22, %s23_s22 }
  0x29   :  { %p7338_p1 = scmp.ne.s32.totalorder %s23_s22, %s7337_s24  ;;  %p7343_p3 = scmp.lt.s32.totalorder %s7337_s24, %s7337_s24 }
  0x2b   :  { %p7344_p4 = por %p7343_p3, %p7342_p2 }
  0x2d   :  { %p7345_p5 = pnand %p7344_p4, %p7338_p1 }
  0x2f   :  { %7348 = shalt.err (!%p7345_p5)
}
  0x30   :  { %28 = dma.hbm_to_vmem [thread:$0]  %s8455_s0, 1536, %s23_s22, [#allocation3], %s7441_s29, %s7441_s29, %s7442_s30  }
  0x31   :  { %s7357_s5 = scalar_lea.vmem %s47_s23, 1536  ;;  %p7362_p7 = scmp.lt.s32.totalorder %s47_s23, %s47_s23 }
  0x32   :  { %p7358_p6 = scmp.ne.s32.totalorder %s47_s23, %s7357_s5  ;;  %p7363_p8 = scmp.lt.s32.totalorder %s7357_s5, %s7357_s5 }
  0x34   :  { %p7364_p9 = por %p7363_p8, %p7362_p7 }
  0x36   :  { %p7365_p10 = pnand %p7364_p9, %p7358_p6 }
  0x38   :  { %7368 = shalt.err (!%p7365_p10)
}
  0x39   :  { %52 = dma.hbm_to_vmem [thread:$0]  %s8457_s2, 1536, %s47_s23, [#allocation6], %s7441_s29, %s7441_s29, %s7442_s30  }
  0x3a   :  { %s7450_s8 = smov [#allocation10]   ;;  %s7451_s10 = smov [#allocation13]  }
  0x3b   :  { %s71_s9 = sshll.u32 %s7450_s8, 4  ;;  %s93_s0 = sshll.u32 %s7451_s10, 4  ;;  %s72_s9 = int_to_ptr.vmem [resolvable:$true] %s71_s9  ;;  %s94_s0 = int_to_ptr.vmem [resolvable:$true] %s93_s0 }
  0x3c   :  { %s7377_s11 = scalar_lea.vmem %s72_s9, 192  ;;  %p7382_p12 = scmp.lt.s32.totalorder %s72_s9, %s72_s9 }
  0x3d   :  { %p7378_p11 = scmp.ne.s32.totalorder %s72_s9, %s7377_s11  ;;  %p7383_p13 = scmp.lt.s32.totalorder %s7377_s11, %s7377_s11 }
  0x3f   :  { %p7384_p0 = por %p7383_p13, %p7382_p12 }
  0x41   :  { %p7385_p1 = pnand %p7384_p0, %p7378_p11 }
  0x43   :  { %7388 = shalt.err (!%p7385_p1)
}
  0x44   :  { %74 = dma.hbm_to_vmem [thread:$0]  %s8459_s4, 192, %s72_s9, [#allocation9]  }
  0x45   :  { %s7397_s14 = scalar_lea.vmem %s94_s0, 64  ;;  %p7402_p3 = scmp.lt.s32.totalorder %s94_s0, %s94_s0 }
  0x46   :  { %p7398_p2 = scmp.ne.s32.totalorder %s94_s0, %s7397_s14  ;;  %p7403_p4 = scmp.lt.s32.totalorder %s7397_s14, %s7397_s14 }
  0x48   :  { %p7404_p5 = por %p7403_p4, %p7402_p3 }
  0x4a   :  { %p7405_p6 = pnand %p7404_p5, %p7398_p2 }
  0x4c   :  { %7408 = shalt.err (!%p7405_p6)
}
  0x4d   :  { %96 = dma.hbm_to_vmem [thread:$0]  %s8461_s6, 64, %s94_s0, [#allocation12]  }
  0x4e   :  { %7429 = dma.done.wait [#allocation3], 1536  }
  0x4f   :  { %7430 = vsyncadd [#allocation3], 4294965760 }
  0x50   :  { %7431 = dma.done.wait [#allocation6], 3072  }
  0x51   :  { %7432 = vsyncadd [#allocation6], 4294964224 }
  0x52   :  { %7433 = dma.done.wait [#allocation9], 49344  }
  0x53   :  { %7434 = vsyncadd [#allocation9], 4294917952 }
  0x54   :  { %7435 = dma.done.wait [#allocation12], 16448  }
  0x55   :  { %7436 = vsyncadd [#allocation12], 4294950848  ;;  %v6421_v0 = vld [vmem:[#allocation8 + $0x2a4] ss:$48 sps:$4 sm:$0xff]   ;;  %v6425_v2 = vld [vmem:[#allocation8 + $0x2a0] ss:$48 sps:$4 sm:$0xff]  }
  0x56   :  { %v6423_v1 = vld [vmem:[#allocation8 + $0x8a4] ss:$48 sps:$4 sm:$0xff]   ;;  %1227 = vmatprep.subr.bf16.mxu0 %v6421_v0  ;;  %v6426_v3 = vld [vmem:[#allocation8 + $0x8a0] ss:$48 sps:$4 sm:$0xff]   ;;  %v120_v46 = vld [vmem:[#allocation2 + $0x8] sm:$0xff]  ;;  %vm7453_vm0 = vmmov 0  }
  0x57   :  { %1278 = vmatprep.subr.bf16.mxu1 %v6423_v1  ;;  %v6427_v4 = vld [vmem:[#allocation8 + $0x244] ss:$48 sps:$4 sm:$0xff]   ;;  %1228 = vmatpush1.bf16.msra.mxu0 %v6425_v2  ;;  %v6431_v6 = vld [vmem:[#allocation8 + $0x240] ss:$48 sps:$4 sm:$0xff]   ;;  %v124_v47 = vld [vmem:[#allocation2 + $0x28] sm:$0xff]  ;;  %vm4816_vm1 = vcmask 1042432  }
  0x58   :  { %1279 = vmatpush1.bf16.msra.mxu1 %v6426_v3  ;;  %v6429_v5 = vld [vmem:[#allocation8 + $0x844] ss:$48 sps:$4 sm:$0xff]   ;;  %1229 = vmatprep.subr.bf16.mxu0 %v6427_v4  ;;  %v6432_v7 = vld [vmem:[#allocation8 + $0x840] ss:$48 sps:$4 sm:$0xff]   ;;  %v122_v48 = vld [vmem:[#allocation2 + $0x18] sm:$0xff]  ;;  %v7526_v53 = vpack.c.bf16 %v124_v47, %v120_v46  ;;  %vm3395_vm2 = vcmask 1044480  }
  0x59   :  { %1280 = vmatprep.subr.bf16.mxu1 %v6429_v5  ;;  %v6433_v8 = vld [vmem:[#allocation8 + $0x1e4] ss:$48 sps:$4 sm:$0xff]   ;;  %v6437_v10 = vld [vmem:[#allocation8 + $0x1e0] ss:$48 sps:$4 sm:$0xff]   ;;  %v126_v49 = vld [vmem:[#allocation2 + $0x38] sm:$0xff]  ;;  %vm3367_vm3 = vcmask 80896  }
  0x5a   :  { %v6435_v9 = vld [vmem:[#allocation8 + $0x7e4] ss:$48 sps:$4 sm:$0xff]   ;;  %v6438_v11 = vld [vmem:[#allocation8 + $0x7e0] ss:$48 sps:$4 sm:$0xff]   ;;  %v7528_v54 = vpack.c.bf16 %v126_v49, %v122_v48  ;;  %1259 = vmatprep.mubr.bf16.mxu0 %v7526_v53  ;;  %v6553_v46 = vld [vmem:[#allocation8 + $0x68] ss:$48 sps:$4 sm:$0xff]  }
  0x5b   :  { %1230 = vmatpush1.bf16.msra.mxu0 %v6431_v6  ;;  %v6439_v12 = vld [vmem:[#allocation8 + $0x184] ss:$48 sps:$4 sm:$0xff]   ;;  %v6443_v14 = vld [vmem:[#allocation8 + $0x180] ss:$48 sps:$4 sm:$0xff]   ;;  %v6556_v47 = vld [vmem:[#allocation8 + $0x668] ss:$48 sps:$4 sm:$0xff]  }
  0x5c   :  { %1281 = vmatpush1.bf16.msra.mxu1 %v6432_v7  ;;  %1231 = vmatprep.subr.bf16.mxu0 %v6433_v8  ;;  %v6441_v13 = vld [vmem:[#allocation8 + $0x784] ss:$48 sps:$4 sm:$0xff]   ;;  %v6444_v15 = vld [vmem:[#allocation8 + $0x780] ss:$48 sps:$4 sm:$0xff]   ;;  %v6561_v48 = vld [vmem:[#allocation8 + $0xc] ss:$48 sps:$4 sm:$0xff]  }
  0x5d   :  { %1282 = vmatprep.subr.bf16.mxu1 %v6435_v9  ;;  %v6445_v16 = vld [vmem:[#allocation8 + $0x124] ss:$48 sps:$4 sm:$0xff]   ;;  %v6449_v18 = vld [vmem:[#allocation8 + $0x120] ss:$48 sps:$4 sm:$0xff]   ;;  %1310 = vmatprep.mubr.bf16.mxu1 %v7528_v54  ;;  %v6564_v49 = vld [vmem:[#allocation8 + $0x60c] ss:$48 sps:$4 sm:$0xff]  }
  0x5e   :  { %v6447_v17 = vld [vmem:[#allocation8 + $0x724] ss:$48 sps:$4 sm:$0xff]   ;;  %v6450_v19 = vld [vmem:[#allocation8 + $0x720] ss:$48 sps:$4 sm:$0xff]   ;;  %vm3371_vm4 = vcmask 74752   ;;  %vm5707_vm5 = vcmask 1041408  }
  0x5f   :  { %1232 = vmatpush1.bf16.msra.mxu0 %v6437_v10  ;;  %v6451_v20 = vld [vmem:[#allocation8 + $0xc4] ss:$48 sps:$4 sm:$0xff]   ;;  %v6455_v22 = vld [vmem:[#allocation8 + $0xc0] ss:$48 sps:$4 sm:$0xff]   ;;  %v6519_v10 = vld [vmem:[#allocation8 + $0x2ac] ss:$48 sps:$4 sm:$0xff]  }
  0x60   :  { %1283 = vmatpush1.bf16.msra.mxu1 %v6438_v11  ;;  %1233 = vmatprep.subr.bf16.mxu0 %v6439_v12  ;;  %v6453_v21 = vld [vmem:[#allocation8 + $0x6c4] ss:$48 sps:$4 sm:$0xff]   ;;  %v6456_v23 = vld [vmem:[#allocation8 + $0x6c0] ss:$48 sps:$4 sm:$0xff]   ;;  %v6522_v11 = vld [vmem:[#allocation8 + $0x8ac] ss:$48 sps:$4 sm:$0xff]  }
  0x61   :  { %1284 = vmatprep.subr.bf16.mxu1 %v6441_v13  ;;  %v6457_v24 = vld [vmem:[#allocation8 + $0x64] ss:$48 sps:$4 sm:$0xff]   ;;  %v6461_v26 = vld [vmem:[#allocation8 + $0x60] ss:$48 sps:$4 sm:$0xff]   ;;  %v6517_v12 = vld [vmem:[#allocation8 + $0x2a8] ss:$48 sps:$4 sm:$0xff]  }
  0x62   :  { %v6459_v25 = vld [vmem:[#allocation8 + $0x664] ss:$48 sps:$4 sm:$0xff]   ;;  %v6462_v27 = vld [vmem:[#allocation8 + $0x660] ss:$48 sps:$4 sm:$0xff]   ;;  %v6520_v13 = vld [vmem:[#allocation8 + $0x8a8] ss:$48 sps:$4 sm:$0xff]  }
  0x63   :  { %1234 = vmatpush1.bf16.msra.mxu0 %v6443_v14  ;;  %v6463_v28 = vld [vmem:[#allocation8 + $0x4] ss:$48 sps:$4 sm:$0xff]   ;;  %v6467_v30 = vld [vmem:[#allocation8] ss:$48 sps:$4 sm:$0xff]   ;;  %s7455_s4 = smov [#allocation14]  }
  0x64   :  { %1285 = vmatpush1.bf16.msra.mxu1 %v6444_v15  ;;  %1235 = vmatprep.subr.bf16.mxu0 %v6445_v16  ;;  %v6465_v29 = vld [vmem:[#allocation8 + $0x604] ss:$48 sps:$4 sm:$0xff]   ;;  %v6468_v31 = vld [vmem:[#allocation8 + $0x600] ss:$48 sps:$4 sm:$0xff]   ;;  %v128_v16 = vld [vmem:[#allocation2 + $0x48] sm:$0xf] }
  0x65   :  { %1286 = vmatprep.subr.bf16.mxu1 %v6447_v17  ;;  %v6469_v32 = vld [vmem:[#allocation8 + $0x5a4] ss:$48 sps:$4 sm:$0xff]   ;;  %v6473_v34 = vld [vmem:[#allocation8 + $0x5a0] ss:$48 sps:$4 sm:$0xff]   ;;  %v130_v17 = vld [vmem:[#allocation2 + $0x58] sm:$0xf] }
  0x66   :  { %v6471_v33 = vld [vmem:[#allocation8 + $0xba4] ss:$48 sps:$4 sm:$0xff]   ;;  %v6474_v35 = vld [vmem:[#allocation8 + $0xba0] ss:$48 sps:$4 sm:$0xff]   ;;  %s5741_s6 = sshll.u32 %s7455_s4, 4  ;;  %s5742_s6 = int_to_ptr.vmem [resolvable:$true] %s5741_s6 }
  0x67   :  { %1236 = vmatpush1.bf16.msra.mxu0 %v6449_v18  ;;  %v6475_v36 = vld [vmem:[#allocation8 + $0x544] ss:$48 sps:$4 sm:$0xff]   ;;  %v6479_v38 = vld [vmem:[#allocation8 + $0x540] ss:$48 sps:$4 sm:$0xff]   ;;  %v6525_v18 = vld [vmem:[#allocation8 + $0x24c] ss:$48 sps:$4 sm:$0xff]   ;;  %p7414_p8 = scmp.lt.s32.totalorder %s5742_s6, %s5742_s6 }
  0x68   :  { %1287 = vmatpush1.bf16.msra.mxu1 %v6450_v19  ;;  %1237 = vmatprep.subr.bf16.mxu0 %v6451_v20  ;;  %v6477_v37 = vld [vmem:[#allocation8 + $0xb44] ss:$48 sps:$4 sm:$0xff]   ;;  %v6480_v39 = vld [vmem:[#allocation8 + $0xb40] ss:$48 sps:$4 sm:$0xff]   ;;  %v6528_v19 = vld [vmem:[#allocation8 + $0x84c] ss:$48 sps:$4 sm:$0xff]  }
  0x69   :  { %1288 = vmatprep.subr.bf16.mxu1 %v6453_v21  ;;  %v6481_v40 = vld [vmem:[#allocation8 + $0x4e4] ss:$48 sps:$4 sm:$0xff]   ;;  %v6485_v42 = vld [vmem:[#allocation8 + $0x4e0] ss:$48 sps:$4 sm:$0xff]   ;;  %v6523_v20 = vld [vmem:[#allocation8 + $0x248] ss:$48 sps:$4 sm:$0xff]  }
  0x6a   :  { %v6483_v41 = vld [vmem:[#allocation8 + $0xae4] ss:$48 sps:$4 sm:$0xff]   ;;  %v6486_v43 = vld [vmem:[#allocation8 + $0xae0] ss:$48 sps:$4 sm:$0xff]   ;;  %v6526_v21 = vld [vmem:[#allocation8 + $0x848] ss:$48 sps:$4 sm:$0xff]  }
  0x6b   :  { %1238 = vmatpush1.bf16.msra.mxu0 %v6455_v22  ;;  %v6487_v44 = vld [vmem:[#allocation8 + $0x484] ss:$48 sps:$4 sm:$0xff]   ;;  %v6491_v50 = vld [vmem:[#allocation8 + $0x480] ss:$48 sps:$4 sm:$0xff]   ;;  %v7536_v22 = vpack.c.bf16 %v128_v16, %v128_v16  ;;  %v6601_v16 = vld [vmem:[#allocation8 + $0x368] ss:$48 sps:$4 sm:$0xff]  }
  0x6c   :  { %1289 = vmatpush1.bf16.msra.mxu1 %v6456_v23  ;;  %1239 = vmatprep.subr.bf16.mxu0 %v6457_v24  ;;  %v6489_v45 = vld [vmem:[#allocation8 + $0xa84] ss:$48 sps:$4 sm:$0xff]   ;;  %v6492_v51 = vld [vmem:[#allocation8 + $0xa80] ss:$48 sps:$4 sm:$0xff]   ;;  %v7538_v23 = vpack.c.bf16 %v130_v17, %v130_v17  ;;  %v6604_v17 = vld [vmem:[#allocation8 + $0x968] ss:$48 sps:$4 sm:$0xff]  }
  0x6d   :  { %1290 = vmatprep.subr.bf16.mxu1 %v6459_v25  ;;  %v6493_v52 = vld [vmem:[#allocation8 + $0x424] ss:$48 sps:$4 sm:$0xff]   ;;  %v6497_v56 = vld [vmem:[#allocation8 + $0x420] ss:$48 sps:$4 sm:$0xff]   ;;  %v6531_v25 = vld [vmem:[#allocation8 + $0x1ec] ss:$48 sps:$4 sm:$0xff]  }
  0x6e   :  { %v6495_v55 = vld [vmem:[#allocation8 + $0xa24] ss:$48 sps:$4 sm:$0xff]   ;;  %v6498_v57 = vld [vmem:[#allocation8 + $0xa20] ss:$48 sps:$4 sm:$0xff]   ;;  %s7409_s16 = scalar_lea.vmem %s5742_s6, 1536 }
  0x6f   :  { %1240 = vmatpush1.bf16.msra.mxu0 %v6461_v26  ;;  %v6499_v58 = vld [vmem:[#allocation8 + $0x3c4] ss:$48 sps:$4 sm:$0xff]   ;;  %v6503_v60 = vld [vmem:[#allocation8 + $0x3c0] ss:$48 sps:$4 sm:$0xff]   ;;  %p7410_p7 = scmp.ne.s32.totalorder %s5742_s6, %s7409_s16  ;;  %p7415_p9 = scmp.lt.s32.totalorder %s7409_s16, %s7409_s16 }
  0x70   :  { %1291 = vmatpush1.bf16.msra.mxu1 %v6462_v27  ;;  %1241 = vmatprep.subr.bf16.mxu0 %v6463_v28  ;;  %v6501_v59 = vld [vmem:[#allocation8 + $0x9c4] ss:$48 sps:$4 sm:$0xff]   ;;  %v6504_v61 = vld [vmem:[#allocation8 + $0x9c0] ss:$48 sps:$4 sm:$0xff]   ;;  %v6534_v27 = vld [vmem:[#allocation8 + $0x7ec] ss:$48 sps:$4 sm:$0xff]  }
  0x71   :  { %1292 = vmatprep.subr.bf16.mxu1 %v6465_v29  ;;  %v6505_v62 = vld [vmem:[#allocation8 + $0x364] ss:$48 sps:$4 sm:$0xff]   ;;  %v6509_v0 = vld [vmem:[#allocation8 + $0x360] ss:$48 sps:$4 sm:$0xff]   ;;  %v6529_v29 = vld [vmem:[#allocation8 + $0x1e8] ss:$48 sps:$4 sm:$0xff]   ;;  %p7416_p10 = por %p7415_p9, %p7414_p8 }
  0x72   :  { %v6507_v63 = vld [vmem:[#allocation8 + $0x964] ss:$48 sps:$4 sm:$0xff]   ;;  %v6510_v1 = vld [vmem:[#allocation8 + $0x960] ss:$48 sps:$4 sm:$0xff]  }
  0x73   :  { %1242 = vmatpush1.bf16.msra.mxu0 %v6467_v30  ;;  %v6511_v2 = vld [vmem:[#allocation8 + $0x304] ss:$48 sps:$4 sm:$0xff]   ;;  %v6515_v4 = vld [vmem:[#allocation8 + $0x300] ss:$48 sps:$4 sm:$0xff]   ;;  %v6532_v30 = vld [vmem:[#allocation8 + $0x7e8] ss:$48 sps:$4 sm:$0xff]   ;;  %p7417_p11 = pnand %p7416_p10, %p7410_p7 }
  0x74   :  { %1293 = vmatpush1.bf16.msra.mxu1 %v6468_v31  ;;  %1243 = vmatprep.subr.bf16.mxu0 %v6469_v32  ;;  %v6513_v3 = vld [vmem:[#allocation8 + $0x904] ss:$48 sps:$4 sm:$0xff]   ;;  %v6516_v5 = vld [vmem:[#allocation8 + $0x900] ss:$48 sps:$4 sm:$0xff]   ;;  %v6537_v32 = vld [vmem:[#allocation8 + $0x18c] ss:$48 sps:$4 sm:$0xff]  }
  0x75   :  { %1294 = vmatprep.subr.bf16.mxu1 %v6471_v33  ;;  %v119_v6 = vld [vmem:[#allocation2] sm:$0xff]  ;;  %v121_v8 = vld [vmem:[#allocation2 + $0x10] sm:$0xff]  ;;  %v6540_v33 = vld [vmem:[#allocation8 + $0x78c] ss:$48 sps:$4 sm:$0xff]  }
  0x76   :  { %v123_v7 = vld [vmem:[#allocation2 + $0x20] sm:$0xff]  ;;  %v125_v9 = vld [vmem:[#allocation2 + $0x30] sm:$0xff] }
  0x77   :  { %1244 = vmatpush2.bf16.msra.mxu0 %v6473_v34  ;;  %v7532_v14 = vpack.c.bf16 %v123_v7, %v119_v6  ;;  %v7534_v15 = vpack.c.bf16 %v125_v9, %v121_v8  ;;  %v127_v24 = vld [vmem:[#allocation2 + $0x40] sm:$0xf]  ;;  %v129_v26 = vld [vmem:[#allocation2 + $0x50] sm:$0xf]  ;;  %v6535_v34 = vld [vmem:[#allocation8 + $0x188] ss:$48 sps:$4 sm:$0xff]  }
  0x78   :  { %1295 = vmatpush2.bf16.msra.mxu1 %v6474_v35  ;;  %1245 = vmatprep.subr.bf16.mxu0 %v6475_v36  ;;  %v7544_v28 = vpack.c.bf16 %v127_v24, %v127_v24  ;;  %v7546_v31 = vpack.c.bf16 %v129_v26, %v129_v26  ;;  %v6538_v35 = vld [vmem:[#allocation8 + $0x788] ss:$48 sps:$4 sm:$0xff]   ;;  %v6543_v36 = vld [vmem:[#allocation8 + $0x12c] ss:$48 sps:$4 sm:$0xff]   ;;  %v6615_v24 = vld [vmem:[#allocation8 + $0x2b4] ss:$48 sps:$4 sm:$0xff]  }
  0x79   :  { %1296 = vmatprep.subr.bf16.mxu1 %v6477_v37  ;;  %v6546_v37 = vld [vmem:[#allocation8 + $0x72c] ss:$48 sps:$4 sm:$0xff]   ;;  %v6589_v6 = vld [vmem:[#allocation8 + $0x428] ss:$48 sps:$4 sm:$0xff]   ;;  %v6613_v26 = vld [vmem:[#allocation8 + $0x2b0] ss:$48 sps:$4 sm:$0xff]  }
  0x7a   :  { %v6592_v7 = vld [vmem:[#allocation8 + $0xa28] ss:$48 sps:$4 sm:$0xff]   ;;  %v6597_v8 = vld [vmem:[#allocation8 + $0x3cc] ss:$48 sps:$4 sm:$0xff]  }
  0x7b   :  { %1246 = vmatpush2.bf16.msra.mxu0 %v6479_v38  ;;  %v6541_v38 = vld [vmem:[#allocation8 + $0x128] ss:$48 sps:$4 sm:$0xff]   ;;  %v6600_v9 = vld [vmem:[#allocation8 + $0x9cc] ss:$48 sps:$4 sm:$0xff]  }
  0x7c   :  { %1297 = vmatpush2.bf16.msra.mxu1 %v6480_v39  ;;  %1247 = vmatprep.subr.bf16.mxu0 %v6481_v40  ;;  %v6544_v39 = vld [vmem:[#allocation8 + $0x728] ss:$48 sps:$4 sm:$0xff]   ;;  %v6549_v40 = vld [vmem:[#allocation8 + $0xcc] ss:$48 sps:$4 sm:$0xff]  }
  0x7d   :  { %1298 = vmatprep.subr.bf16.mxu1 %v6483_v41  ;;  %v6552_v41 = vld [vmem:[#allocation8 + $0x6cc] ss:$48 sps:$4 sm:$0xff]  }
  0x7f   :  { %1248 = vmatpush2.bf16.msra.mxu0 %v6485_v42  ;;  %v6547_v42 = vld [vmem:[#allocation8 + $0xc8] ss:$48 sps:$4 sm:$0xff]  }
  0x80   :  { %1299 = vmatpush2.bf16.msra.mxu1 %v6486_v43  ;;  %1249 = vmatprep.subr.bf16.mxu0 %v6487_v44  ;;  %v6550_v43 = vld [vmem:[#allocation8 + $0x6c8] ss:$48 sps:$4 sm:$0xff]   ;;  %v6555_v44 = vld [vmem:[#allocation8 + $0x6c] ss:$48 sps:$4 sm:$0xff]  }
  0x81   :  { %1300 = vmatprep.subr.bf16.mxu1 %v6489_v45  ;;  %v6558_v45 = vld [vmem:[#allocation8 + $0x66c] ss:$48 sps:$4 sm:$0xff]  }
  0x83   :  { %1250 = vmatpush2.bf16.msra.mxu0 %v6491_v50  ;;  %v6559_v50 = vld [vmem:[#allocation8 + $0x8] ss:$48 sps:$4 sm:$0xff]  }
  0x84   :  { %1301 = vmatpush2.bf16.msra.mxu1 %v6492_v51  ;;  %1251 = vmatprep.subr.bf16.mxu0 %v6493_v52  ;;  %v6562_v51 = vld [vmem:[#allocation8 + $0x608] ss:$48 sps:$4 sm:$0xff]   ;;  %v6567_v52 = vld [vmem:[#allocation8 + $0x5ac] ss:$48 sps:$4 sm:$0xff]  }
  0x85   :  { %1302 = vmatprep.subr.bf16.mxu1 %v6495_v55  ;;  %v6568_v55 = vld [vmem:[#allocation8 + $0xba8] ss:$48 sps:$4 sm:$0xff]  }
  0x87   :  { %1252 = vmatpush2.bf16.msra.mxu0 %v6497_v56  ;;  %v6573_v56 = vld [vmem:[#allocation8 + $0x54c] ss:$48 sps:$4 sm:$0xff]  }
  0x88   :  { %1303 = vmatpush2.bf16.msra.mxu1 %v6498_v57  ;;  %1253 = vmatprep.subr.bf16.mxu0 %v6499_v58  ;;  %v6576_v57 = vld [vmem:[#allocation8 + $0xb4c] ss:$48 sps:$4 sm:$0xff]   ;;  %v6571_v58 = vld [vmem:[#allocation8 + $0x548] ss:$48 sps:$4 sm:$0xff]  }
  0x89   :  { %1304 = vmatprep.subr.bf16.mxu1 %v6501_v59  ;;  %v6574_v59 = vld [vmem:[#allocation8 + $0xb48] ss:$48 sps:$4 sm:$0xff]  }
  0x8b   :  { %1254 = vmatpush2.bf16.msra.mxu0 %v6503_v60  ;;  %v6579_v60 = vld [vmem:[#allocation8 + $0x4ec] ss:$48 sps:$4 sm:$0xff]  }
  0x8c   :  { %1305 = vmatpush2.bf16.msra.mxu1 %v6504_v61  ;;  %1255 = vmatprep.subr.bf16.mxu0 %v6505_v62  ;;  %v6582_v61 = vld [vmem:[#allocation8 + $0xaec] ss:$48 sps:$4 sm:$0xff]   ;;  %v6577_v62 = vld [vmem:[#allocation8 + $0x4e8] ss:$48 sps:$4 sm:$0xff]  }
  0x8d   :  { %1306 = vmatprep.subr.bf16.mxu1 %v6507_v63  ;;  %v6580_v63 = vld [vmem:[#allocation8 + $0xae8] ss:$48 sps:$4 sm:$0xff]  }
  0x8f   :  { %1256 = vmatpush2.bf16.msra.mxu0 %v6509_v0  ;;  %v6585_v0 = vld [vmem:[#allocation8 + $0x48c] ss:$48 sps:$4 sm:$0xff]  }
  0x90   :  { %1307 = vmatpush2.bf16.msra.mxu1 %v6510_v1  ;;  %1257 = vmatprep.subr.bf16.mxu0 %v6511_v2  ;;  %v6588_v1 = vld [vmem:[#allocation8 + $0xa8c] ss:$48 sps:$4 sm:$0xff]   ;;  %v6583_v2 = vld [vmem:[#allocation8 + $0x488] ss:$48 sps:$4 sm:$0xff]  }
  0x91   :  { %1308 = vmatprep.subr.bf16.mxu1 %v6513_v3  ;;  %v6586_v3 = vld [vmem:[#allocation8 + $0xa88] ss:$48 sps:$4 sm:$0xff]  }
  0x93   :  { %1258 = vmatpush2.bf16.msra.mxu0 %v6515_v4  ;;  %v6591_v4 = vld [vmem:[#allocation8 + $0x42c] ss:$48 sps:$4 sm:$0xff]  }
  0x94   :  { %1309 = vmatpush2.bf16.msra.mxu1 %v6516_v5  ;;  %1329 = vmatprep.subr.bf16.mxu0 %v6519_v10  ;;  %v6594_v5 = vld [vmem:[#allocation8 + $0xa2c] ss:$48 sps:$4 sm:$0xff]   ;;  %v6595_v10 = vld [vmem:[#allocation8 + $0x3c8] ss:$48 sps:$4 sm:$0xff]  }
  0x95   :  { %1380 = vmatprep.subr.bf16.mxu1 %v6522_v11  ;;  %v6598_v11 = vld [vmem:[#allocation8 + $0x9c8] ss:$48 sps:$4 sm:$0xff]  }
  0x96   :  { %1260 = vmatmul.mubr.bf16.vlgmr.msra.gmra.mxu0 %v7532_v14 }
  0x97   :  { %1311 = vmatmul.mubr.bf16.vlgmr.msra.gmra.mxu1 %v7534_v15  ;;  %1330 = vmatpush1.bf16.msra.mxu0 %v6517_v12  ;;  %v6603_v12 = vld [vmem:[#allocation8 + $0x36c] ss:$48 sps:$4 sm:$0xff]  }
  0x98   :  { %1381 = vmatpush1.bf16.msra.mxu1 %v6520_v13  ;;  %1331 = vmatprep.subr.bf16.mxu0 %v6525_v18  ;;  %v6606_v13 = vld [vmem:[#allocation8 + $0x96c] ss:$48 sps:$4 sm:$0xff]  }
  0x99   :  { %1382 = vmatprep.subr.bf16.mxu1 %v6528_v19  ;;  %1269 = vmatprep.mubr.bf16.mxu0 %v7536_v22  ;;  %v6609_v18 = vld [vmem:[#allocation8 + $0x30c] ss:$48 sps:$4 sm:$0xff]  }
  0x9a   :  { %1320 = vmatprep.mubr.bf16.mxu1 %v7538_v23  ;;  %v6612_v19 = vld [vmem:[#allocation8 + $0x90c] ss:$48 sps:$4 sm:$0xff]  }
  0x9b   :  { %1332 = vmatpush1.bf16.msra.mxu0 %v6523_v20  ;;  %v6607_v20 = vld [vmem:[#allocation8 + $0x308] ss:$48 sps:$4 sm:$0xff]  }
  0x9c   :  { %1383 = vmatpush1.bf16.msra.mxu1 %v6526_v21  ;;  %1333 = vmatprep.subr.bf16.mxu0 %v6531_v25  ;;  %v6610_v21 = vld [vmem:[#allocation8 + $0x908] ss:$48 sps:$4 sm:$0xff]   ;;  %v6618_v25 = vld [vmem:[#allocation8 + $0x8b4] ss:$48 sps:$4 sm:$0xff]  }
  0x9d   :  { %1384 = vmatprep.subr.bf16.mxu1 %v6534_v27  ;;  %v6616_v27 = vld [vmem:[#allocation8 + $0x8b0] ss:$48 sps:$4 sm:$0xff]  }
  0x9e   :  { %1270 = vmatmul.mubr.bf16.gmra.mxu0 %v7544_v28 }
  0x9f   :  { %1321 = vmatmul.mubr.bf16.gmra.mxu1 %v7546_v31  ;;  %1334 = vmatpush1.bf16.msra.mxu0 %v6529_v29  ;;  %v6621_v29 = vld [vmem:[#allocation8 + $0x254] ss:$48 sps:$4 sm:$0xff]  }
  0xa0   :  { %1385 = vmatpush1.bf16.msra.mxu1 %v6532_v30  ;;  %1335 = vmatprep.subr.bf16.mxu0 %v6537_v32  ;;  %v6624_v30 = vld [vmem:[#allocation8 + $0x854] ss:$48 sps:$4 sm:$0xff]   ;;  %v6619_v32 = vld [vmem:[#allocation8 + $0x250] ss:$48 sps:$4 sm:$0xff]  }
  0xa1   :  { %1386 = vmatprep.subr.bf16.mxu1 %v6540_v33  ;;  %1361 = vmatprep.mubr.bf16.mxu0 %v7526_v53  ;;  %v6570_v53 = vld [vmem:[#allocation8 + $0xbac] ss:$48 sps:$4 sm:$0xff]   ;;  %v6622_v33 = vld [vmem:[#allocation8 + $0x850] ss:$48 sps:$4 sm:$0xff]  }
  0xa2   :  { %1412 = vmatprep.mubr.bf16.mxu1 %v7528_v54  ;;  %v6565_v54 = vld [vmem:[#allocation8 + $0x5a8] ss:$48 sps:$4 sm:$0xff]  }
  0xa3   :  { %1336 = vmatpush1.bf16.msra.mxu0 %v6535_v34  ;;  %v6627_v34 = vld [vmem:[#allocation8 + $0x1f4] ss:$48 sps:$4 sm:$0xff]  }
  0xa4   :  { %1387 = vmatpush1.bf16.msra.mxu1 %v6538_v35  ;;  %1337 = vmatprep.subr.bf16.mxu0 %v6543_v36  ;;  %v6630_v35 = vld [vmem:[#allocation8 + $0x7f4] ss:$48 sps:$4 sm:$0xff]   ;;  %v6625_v36 = vld [vmem:[#allocation8 + $0x1f0] ss:$48 sps:$4 sm:$0xff]  }
  0xa5   :  { %1388 = vmatprep.subr.bf16.mxu1 %v6546_v37  ;;  %v6628_v37 = vld [vmem:[#allocation8 + $0x7f0] ss:$48 sps:$4 sm:$0xff]  }
  0xa7   :  { %1338 = vmatpush1.bf16.msra.mxu0 %v6541_v38  ;;  %v140_v38 = vld [vmem:[#allocation5 + $0x8] sm:$0xff] }
  0xa8   :  { %1389 = vmatpush1.bf16.msra.mxu1 %v6544_v39  ;;  %1339 = vmatprep.subr.bf16.mxu0 %v6549_v40  ;;  %v144_v39 = vld [vmem:[#allocation5 + $0x28] sm:$0xff]  ;;  %v142_v40 = vld [vmem:[#allocation5 + $0x18] sm:$0xff] }
  0xa9   :  { %1390 = vmatprep.subr.bf16.mxu1 %v6552_v41  ;;  %v6636_v41 = vld [vmem:[#allocation8 + $0x794] ss:$48 sps:$4 sm:$0xff]  }
  0xab   :  { %1340 = vmatpush1.bf16.msra.mxu0 %v6547_v42  ;;  %v7556_v42 = vpack.c.bf16 %v144_v39, %v140_v38  ;;  %v6709_v38 = vld [vmem:[#allocation8 + $0x2b8] ss:$48 sps:$4 sm:$0xff]  }
  0xac   :  { %1391 = vmatpush1.bf16.msra.mxu1 %v6550_v43  ;;  %1341 = vmatprep.subr.bf16.mxu0 %v6555_v44  ;;  %v6639_v44 = vld [vmem:[#allocation8 + $0x134] ss:$48 sps:$4 sm:$0xff]   ;;  %v148_v39 = vld [vmem:[#allocation5 + $0x48] sm:$0xf] }
  0xad   :  { %1392 = vmatprep.subr.bf16.mxu1 %v6558_v45  ;;  %v6642_v45 = vld [vmem:[#allocation8 + $0x734] ss:$48 sps:$4 sm:$0xff]  }
  0xaf   :  { %1342 = vmatpush1.bf16.msra.mxu0 %v6553_v46  ;;  %v6637_v46 = vld [vmem:[#allocation8 + $0x130] ss:$48 sps:$4 sm:$0xff]  }
  0xb0   :  { %1393 = vmatpush1.bf16.msra.mxu1 %v6556_v47  ;;  %1343 = vmatprep.subr.bf16.mxu0 %v6561_v48  ;;  %v6640_v47 = vld [vmem:[#allocation8 + $0x730] ss:$48 sps:$4 sm:$0xff]   ;;  %v6645_v48 = vld [vmem:[#allocation8 + $0xd4] ss:$48 sps:$4 sm:$0xff]  }
  0xb1   :  { %1394 = vmatprep.subr.bf16.mxu1 %v6564_v49  ;;  %v6646_v49 = vld [vmem:[#allocation8 + $0x6d0] ss:$48 sps:$4 sm:$0xff]  }
  0xb3   :  { %1344 = vmatpush1.bf16.msra.mxu0 %v6559_v50  ;;  %v6651_v50 = vld [vmem:[#allocation8 + $0x74] ss:$48 sps:$4 sm:$0xff]  }
  0xb4   :  { %1395 = vmatpush1.bf16.msra.mxu1 %v6562_v51  ;;  %1345 = vmatprep.subr.bf16.mxu0 %v6567_v52  ;;  %v6654_v51 = vld [vmem:[#allocation8 + $0x674] ss:$48 sps:$4 sm:$0xff]   ;;  %v6649_v52 = vld [vmem:[#allocation8 + $0x70] ss:$48 sps:$4 sm:$0xff]  }
  0xb5   :  { %1396 = vmatprep.subr.bf16.mxu1 %v6570_v53  ;;  %v6652_v53 = vld [vmem:[#allocation8 + $0x670] ss:$48 sps:$4 sm:$0xff]  }
  0xb7   :  { %1346 = vmatpush2.bf16.msra.mxu0 %v6565_v54  ;;  %v6657_v54 = vld [vmem:[#allocation8 + $0x14] ss:$48 sps:$4 sm:$0xff]  }
  0xb8   :  { %1397 = vmatpush2.bf16.msra.mxu1 %v6568_v55  ;;  %1347 = vmatprep.subr.bf16.mxu0 %v6573_v56  ;;  %v6660_v55 = vld [vmem:[#allocation8 + $0x614] ss:$48 sps:$4 sm:$0xff]   ;;  %v6655_v56 = vld [vmem:[#allocation8 + $0x10] ss:$48 sps:$4 sm:$0xff]  }
  0xb9   :  { %1398 = vmatprep.subr.bf16.mxu1 %v6576_v57  ;;  %v6658_v57 = vld [vmem:[#allocation8 + $0x610] ss:$48 sps:$4 sm:$0xff]  }
  0xbb   :  { %1348 = vmatpush2.bf16.msra.mxu0 %v6571_v58  ;;  %v6663_v58 = vld [vmem:[#allocation8 + $0x5b4] ss:$48 sps:$4 sm:$0xff]  }
  0xbc   :  { %1399 = vmatpush2.bf16.msra.mxu1 %v6574_v59  ;;  %1349 = vmatprep.subr.bf16.mxu0 %v6579_v60  ;;  %v6666_v59 = vld [vmem:[#allocation8 + $0xbb4] ss:$48 sps:$4 sm:$0xff]   ;;  %v6661_v60 = vld [vmem:[#allocation8 + $0x5b0] ss:$48 sps:$4 sm:$0xff]  }
  0xbd   :  { %1400 = vmatprep.subr.bf16.mxu1 %v6582_v61  ;;  %v6664_v61 = vld [vmem:[#allocation8 + $0xbb0] ss:$48 sps:$4 sm:$0xff]  }
  0xbf   :  { %1350 = vmatpush2.bf16.msra.mxu0 %v6577_v62  ;;  %v6669_v62 = vld [vmem:[#allocation8 + $0x554] ss:$48 sps:$4 sm:$0xff]  }
  0xc0   :  { %1401 = vmatpush2.bf16.msra.mxu1 %v6580_v63  ;;  %1351 = vmatprep.subr.bf16.mxu0 %v6585_v0  ;;  %v6672_v63 = vld [vmem:[#allocation8 + $0xb54] ss:$48 sps:$4 sm:$0xff]   ;;  %v6667_v0 = vld [vmem:[#allocation8 + $0x550] ss:$48 sps:$4 sm:$0xff]  }
  0xc1   :  { %1402 = vmatprep.subr.bf16.mxu1 %v6588_v1  ;;  %v6670_v1 = vld [vmem:[#allocation8 + $0xb50] ss:$48 sps:$4 sm:$0xff]  }
  0xc3   :  { %1352 = vmatpush2.bf16.msra.mxu0 %v6583_v2  ;;  %v6675_v2 = vld [vmem:[#allocation8 + $0x4f4] ss:$48 sps:$4 sm:$0xff]  }
  0xc4   :  { %1403 = vmatpush2.bf16.msra.mxu1 %v6586_v3  ;;  %1353 = vmatprep.subr.bf16.mxu0 %v6591_v4  ;;  %v6678_v3 = vld [vmem:[#allocation8 + $0xaf4] ss:$48 sps:$4 sm:$0xff]   ;;  %v6673_v4 = vld [vmem:[#allocation8 + $0x4f0] ss:$48 sps:$4 sm:$0xff]  }
  0xc5   :  { %1404 = vmatprep.subr.bf16.mxu1 %v6594_v5  ;;  %v6676_v5 = vld [vmem:[#allocation8 + $0xaf0] ss:$48 sps:$4 sm:$0xff]  }
  0xc7   :  { %1354 = vmatpush2.bf16.msra.mxu0 %v6589_v6  ;;  %v6681_v6 = vld [vmem:[#allocation8 + $0x494] ss:$48 sps:$4 sm:$0xff]  }
  0xc8   :  { %1405 = vmatpush2.bf16.msra.mxu1 %v6592_v7  ;;  %1355 = vmatprep.subr.bf16.mxu0 %v6597_v8  ;;  %v6684_v7 = vld [vmem:[#allocation8 + $0xa94] ss:$48 sps:$4 sm:$0xff]   ;;  %v6679_v8 = vld [vmem:[#allocation8 + $0x490] ss:$48 sps:$4 sm:$0xff]  }
  0xc9   :  { %1406 = vmatprep.subr.bf16.mxu1 %v6600_v9  ;;  %v6682_v9 = vld [vmem:[#allocation8 + $0xa90] ss:$48 sps:$4 sm:$0xff]  }
  0xcb   :  { %1356 = vmatpush2.bf16.msra.mxu0 %v6595_v10  ;;  %v6687_v10 = vld [vmem:[#allocation8 + $0x434] ss:$48 sps:$4 sm:$0xff]  }
  0xcc   :  { %1407 = vmatpush2.bf16.msra.mxu1 %v6598_v11  ;;  %1357 = vmatprep.subr.bf16.mxu0 %v6603_v12  ;;  %v6690_v11 = vld [vmem:[#allocation8 + $0xa34] ss:$48 sps:$4 sm:$0xff]   ;;  %v6685_v12 = vld [vmem:[#allocation8 + $0x430] ss:$48 sps:$4 sm:$0xff]  }
  0xcd   :  { %1408 = vmatprep.subr.bf16.mxu1 %v6606_v13  ;;  %v6688_v13 = vld [vmem:[#allocation8 + $0xa30] ss:$48 sps:$4 sm:$0xff]  }
  0xcf   :  { %1358 = vmatpush2.bf16.msra.mxu0 %v6601_v16  ;;  %v6693_v16 = vld [vmem:[#allocation8 + $0x3d4] ss:$48 sps:$4 sm:$0xff]  }
  0xd0   :  { %1409 = vmatpush2.bf16.msra.mxu1 %v6604_v17  ;;  %1359 = vmatprep.subr.bf16.mxu0 %v6609_v18  ;;  %v6696_v17 = vld [vmem:[#allocation8 + $0x9d4] ss:$48 sps:$4 sm:$0xff]   ;;  %v6691_v18 = vld [vmem:[#allocation8 + $0x3d0] ss:$48 sps:$4 sm:$0xff]  }
  0xd1   :  { %1410 = vmatprep.subr.bf16.mxu1 %v6612_v19  ;;  %v6694_v19 = vld [vmem:[#allocation8 + $0x9d0] ss:$48 sps:$4 sm:$0xff]  }
  0xd3   :  { %1360 = vmatpush2.bf16.msra.mxu0 %v6607_v20  ;;  %v6699_v20 = vld [vmem:[#allocation8 + $0x374] ss:$48 sps:$4 sm:$0xff]  }
  0xd4   :  { %1411 = vmatpush2.bf16.msra.mxu1 %v6610_v21  ;;  %2092 = vmatprep.subr.bf16.mxu0 %v6615_v24  ;;  %v6702_v21 = vld [vmem:[#allocation8 + $0x974] ss:$48 sps:$4 sm:$0xff]   ;;  %v6697_v24 = vld [vmem:[#allocation8 + $0x370] ss:$48 sps:$4 sm:$0xff]  }
  0xd5   :  { %2143 = vmatprep.subr.bf16.mxu1 %v6618_v25  ;;  %v6700_v25 = vld [vmem:[#allocation8 + $0x970] ss:$48 sps:$4 sm:$0xff]  }
  0xd6   :  { %1362 = vmatmul.mubr.bf16.vlgmr.msra.gmra.mxu0 %v7532_v14  ;;  %v146_v14 = vld [vmem:[#allocation5 + $0x38] sm:$0xff] }
  0xd7   :  { %1413 = vmatmul.mubr.bf16.vlgmr.msra.gmra.mxu1 %v7534_v15  ;;  %2093 = vmatpush1.bf16.msra.mxu0 %v6613_v26  ;;  %v6633_v15 = vld [vmem:[#allocation8 + $0x194] ss:$48 sps:$4 sm:$0xff]   ;;  %v7558_v43 = vpack.c.bf16 %v146_v14, %v142_v40 }
  0xd8   :  { %2144 = vmatpush1.bf16.msra.mxu1 %v6616_v27  ;;  %2094 = vmatprep.subr.bf16.mxu0 %v6621_v29  ;;  %v6705_v26 = vld [vmem:[#allocation8 + $0x314] ss:$48 sps:$4 sm:$0xff]   ;;  %v6703_v29 = vld [vmem:[#allocation8 + $0x310] ss:$48 sps:$4 sm:$0xff]  }
  0xd9   :  { %2145 = vmatprep.subr.bf16.mxu1 %v6624_v30  ;;  %1371 = vmatprep.mubr.bf16.mxu0 %v7536_v22  ;;  %v6631_v22 = vld [vmem:[#allocation8 + $0x190] ss:$48 sps:$4 sm:$0xff]   ;;  %v6708_v27 = vld [vmem:[#allocation8 + $0x914] ss:$48 sps:$4 sm:$0xff]  }
  0xda   :  { %1422 = vmatprep.mubr.bf16.mxu1 %v7538_v23  ;;  %v6634_v23 = vld [vmem:[#allocation8 + $0x790] ss:$48 sps:$4 sm:$0xff]  }
  0xdb   :  { %2095 = vmatpush1.bf16.msra.mxu0 %v6619_v32  ;;  %v6706_v30 = vld [vmem:[#allocation8 + $0x910] ss:$48 sps:$4 sm:$0xff]  }
  0xdc   :  { %2146 = vmatpush1.bf16.msra.mxu1 %v6622_v33  ;;  %2096 = vmatprep.subr.bf16.mxu0 %v6627_v34  ;;  %v139_v32 = vld [vmem:[#allocation5] sm:$0xff]  ;;  %v141_v34 = vld [vmem:[#allocation5 + $0x10] sm:$0xff] }
  0xdd   :  { %2147 = vmatprep.subr.bf16.mxu1 %v6630_v35  ;;  %v143_v33 = vld [vmem:[#allocation5 + $0x20] sm:$0xff]  ;;  %v145_v35 = vld [vmem:[#allocation5 + $0x30] sm:$0xff] }
  0xde   :  { %1372 = vmatmul.mubr.bf16.gmra.mxu0 %v7544_v28  ;;  %v6648_v28 = vld [vmem:[#allocation8 + $0x6d4] ss:$48 sps:$4 sm:$0xff]   ;;  %v7564_v40 = vpack.c.bf16 %v143_v33, %v139_v32  ;;  %v7566_v14 = vpack.c.bf16 %v145_v35, %v141_v34  ;;  %v6781_v32 = vld [vmem:[#allocation8 + $0x438] ss:$48 sps:$4 sm:$0xff]   ;;  %v6789_v34 = vld [vmem:[#allocation8 + $0x3dc] ss:$48 sps:$4 sm:$0xff]  }
  0xdf   :  { %1423 = vmatmul.mubr.bf16.gmra.mxu1 %v7546_v31  ;;  %2097 = vmatpush1.bf16.msra.mxu0 %v6625_v36  ;;  %v6643_v31 = vld [vmem:[#allocation8 + $0xd0] ss:$48 sps:$4 sm:$0xff]   ;;  %v6711_v36 = vld [vmem:[#allocation8 + $0x2bc] ss:$48 sps:$4 sm:$0xff]   ;;  %v6784_v33 = vld [vmem:[#allocation8 + $0xa38] ss:$48 sps:$4 sm:$0xff]  }
  0xe0   :  { %2148 = vmatpush1.bf16.msra.mxu1 %v6628_v37  ;;  %2098 = vmatprep.subr.bf16.mxu0 %v6633_v15  ;;  %v6714_v37 = vld [vmem:[#allocation8 + $0x8bc] ss:$48 sps:$4 sm:$0xff]   ;;  %v150_v15 = vld [vmem:[#allocation5 + $0x58] sm:$0xf] }
  0xe1   :  { %2149 = vmatprep.subr.bf16.mxu1 %v6636_v41  ;;  %2124 = vmatprep.mubr.bf16.mxu0 %v7556_v42  ;;  %v6712_v41 = vld [vmem:[#allocation8 + $0x8b8] ss:$48 sps:$4 sm:$0xff]   ;;  %v6792_v35 = vld [vmem:[#allocation8 + $0x9dc] ss:$48 sps:$4 sm:$0xff]  }
  0xe2   :  { %2175 = vmatprep.mubr.bf16.mxu1 %v7558_v43 }
  0xe3   :  { %2099 = vmatpush1.bf16.msra.mxu0 %v6631_v22  ;;  %v6717_v22 = vld [vmem:[#allocation8 + $0x25c] ss:$48 sps:$4 sm:$0xff]  }
  0xe4   :  { %2150 = vmatpush1.bf16.msra.mxu1 %v6634_v23  ;;  %2100 = vmatprep.subr.bf16.mxu0 %v6639_v44  ;;  %v6720_v23 = vld [vmem:[#allocation8 + $0x85c] ss:$48 sps:$4 sm:$0xff]   ;;  %v6715_v44 = vld [vmem:[#allocation8 + $0x258] ss:$48 sps:$4 sm:$0xff]  }
  0xe5   :  { %2151 = vmatprep.subr.bf16.mxu1 %v6642_v45  ;;  %v6718_v45 = vld [vmem:[#allocation8 + $0x858] ss:$48 sps:$4 sm:$0xff]  }
  0xe7   :  { %2101 = vmatpush1.bf16.msra.mxu0 %v6637_v46  ;;  %v7568_v46 = vpack.c.bf16 %v148_v39, %v148_v39  ;;  %v6795_v39 = vld [vmem:[#allocation8 + $0x37c] ss:$48 sps:$4 sm:$0xff]  }
  0xe8   :  { %2152 = vmatpush1.bf16.msra.mxu1 %v6640_v47  ;;  %2102 = vmatprep.subr.bf16.mxu0 %v6645_v48  ;;  %v7570_v47 = vpack.c.bf16 %v150_v15, %v150_v15  ;;  %v147_v48 = vld [vmem:[#allocation5 + $0x40] sm:$0xf]  ;;  %v6798_v15 = vld [vmem:[#allocation8 + $0x97c] ss:$48 sps:$4 sm:$0xff]  }
  0xe9   :  { %2153 = vmatprep.subr.bf16.mxu1 %v6648_v28  ;;  %v149_v28 = vld [vmem:[#allocation5 + $0x50] sm:$0xf] }
  0xeb   :  { %2103 = vmatpush1.bf16.msra.mxu0 %v6643_v31  ;;  %v6723_v31 = vld [vmem:[#allocation8 + $0x1fc] ss:$48 sps:$4 sm:$0xff]  }
  0xec   :  { %2154 = vmatpush1.bf16.msra.mxu1 %v6646_v49  ;;  %2104 = vmatprep.subr.bf16.mxu0 %v6651_v50  ;;  %v6726_v49 = vld [vmem:[#allocation8 + $0x7fc] ss:$48 sps:$4 sm:$0xff]   ;;  %v7576_v50 = vpack.c.bf16 %v147_v48, %v147_v48  ;;  %v6799_v48 = vld [vmem:[#allocation8 + $0x318] ss:$48 sps:$4 sm:$0xff]  }
  0xed   :  { %2155 = vmatprep.subr.bf16.mxu1 %v6654_v51  ;;  %v6721_v51 = vld [vmem:[#allocation8 + $0x1f8] ss:$48 sps:$4 sm:$0xff]  }
  0xef   :  { %2105 = vmatpush1.bf16.msra.mxu0 %v6649_v52  ;;  %v7578_v52 = vpack.c.bf16 %v149_v28, %v149_v28  ;;  %v6802_v28 = vld [vmem:[#allocation8 + $0x918] ss:$48 sps:$4 sm:$0xff]  }
  0xf0   :  { %2156 = vmatpush1.bf16.msra.mxu1 %v6652_v53  ;;  %2106 = vmatprep.subr.bf16.mxu0 %v6657_v54  ;;  %v6724_v53 = vld [vmem:[#allocation8 + $0x7f8] ss:$48 sps:$4 sm:$0xff]   ;;  %v6729_v54 = vld [vmem:[#allocation8 + $0x19c] ss:$48 sps:$4 sm:$0xff]  }
  0xf1   :  { %2157 = vmatprep.subr.bf16.mxu1 %v6660_v55  ;;  %v6732_v55 = vld [vmem:[#allocation8 + $0x79c] ss:$48 sps:$4 sm:$0xff]  }
  0xf3   :  { %2107 = vmatpush1.bf16.msra.mxu0 %v6655_v56  ;;  %v6727_v56 = vld [vmem:[#allocation8 + $0x198] ss:$48 sps:$4 sm:$0xff]  }
  0xf4   :  { %2158 = vmatpush1.bf16.msra.mxu1 %v6658_v57  ;;  %2108 = vmatprep.subr.bf16.mxu0 %v6663_v58  ;;  %v6730_v57 = vld [vmem:[#allocation8 + $0x798] ss:$48 sps:$4 sm:$0xff]   ;;  %v6735_v58 = vld [vmem:[#allocation8 + $0x13c] ss:$48 sps:$4 sm:$0xff]  }
  0xf5   :  { %2159 = vmatprep.subr.bf16.mxu1 %v6666_v59  ;;  %v6738_v59 = vld [vmem:[#allocation8 + $0x73c] ss:$48 sps:$4 sm:$0xff]  }
  0xf7   :  { %2109 = vmatpush2.bf16.msra.mxu0 %v6661_v60  ;;  %v6733_v60 = vld [vmem:[#allocation8 + $0x138] ss:$48 sps:$4 sm:$0xff]  }
  0xf8   :  { %2160 = vmatpush2.bf16.msra.mxu1 %v6664_v61  ;;  %2110 = vmatprep.subr.bf16.mxu0 %v6669_v62  ;;  %v6736_v61 = vld [vmem:[#allocation8 + $0x738] ss:$48 sps:$4 sm:$0xff]   ;;  %v6741_v62 = vld [vmem:[#allocation8 + $0xdc] ss:$48 sps:$4 sm:$0xff]  }
  0xf9   :  { %2161 = vmatprep.subr.bf16.mxu1 %v6672_v63  ;;  %v6744_v63 = vld [vmem:[#allocation8 + $0x6dc] ss:$48 sps:$4 sm:$0xff]  }
  0xfb   :  { %2111 = vmatpush2.bf16.msra.mxu0 %v6667_v0  ;;  %v6739_v0 = vld [vmem:[#allocation8 + $0xd8] ss:$48 sps:$4 sm:$0xff]  }
  0xfc   :  { %2162 = vmatpush2.bf16.msra.mxu1 %v6670_v1  ;;  %2112 = vmatprep.subr.bf16.mxu0 %v6675_v2  ;;  %v6742_v1 = vld [vmem:[#allocation8 + $0x6d8] ss:$48 sps:$4 sm:$0xff]   ;;  %v6747_v2 = vld [vmem:[#allocation8 + $0x7c] ss:$48 sps:$4 sm:$0xff]  }
  0xfd   :  { %2163 = vmatprep.subr.bf16.mxu1 %v6678_v3  ;;  %v6750_v3 = vld [vmem:[#allocation8 + $0x67c] ss:$48 sps:$4 sm:$0xff]  }
  0xff   :  { %2113 = vmatpush2.bf16.msra.mxu0 %v6673_v4  ;;  %v6745_v4 = vld [vmem:[#allocation8 + $0x78] ss:$48 sps:$4 sm:$0xff]  }
 0x100   :  { %2164 = vmatpush2.bf16.msra.mxu1 %v6676_v5  ;;  %2114 = vmatprep.subr.bf16.mxu0 %v6681_v6  ;;  %v6756_v5 = vld [vmem:[#allocation8 + $0x61c] ss:$48 sps:$4 sm:$0xff]   ;;  %v6751_v6 = vld [vmem:[#allocation8 + $0x18] ss:$48 sps:$4 sm:$0xff]  }
 0x101   :  { %2165 = vmatprep.subr.bf16.mxu1 %v6684_v7  ;;  %v6754_v7 = vld [vmem:[#allocation8 + $0x618] ss:$48 sps:$4 sm:$0xff]  }
 0x103   :  { %2115 = vmatpush2.bf16.msra.mxu0 %v6679_v8  ;;  %v6759_v8 = vld [vmem:[#allocation8 + $0x5bc] ss:$48 sps:$4 sm:$0xff]  }
 0x104   :  { %2166 = vmatpush2.bf16.msra.mxu1 %v6682_v9  ;;  %2116 = vmatprep.subr.bf16.mxu0 %v6687_v10  ;;  %v6762_v9 = vld [vmem:[#allocation8 + $0xbbc] ss:$48 sps:$4 sm:$0xff]   ;;  %v6757_v10 = vld [vmem:[#allocation8 + $0x5b8] ss:$48 sps:$4 sm:$0xff]  }
 0x105   :  { %2167 = vmatprep.subr.bf16.mxu1 %v6690_v11  ;;  %v6760_v11 = vld [vmem:[#allocation8 + $0xbb8] ss:$48 sps:$4 sm:$0xff]  }
 0x107   :  { %2117 = vmatpush2.bf16.msra.mxu0 %v6685_v12  ;;  %v6765_v12 = vld [vmem:[#allocation8 + $0x55c] ss:$48 sps:$4 sm:$0xff]  }
 0x108   :  { %2168 = vmatpush2.bf16.msra.mxu1 %v6688_v13  ;;  %2118 = vmatprep.subr.bf16.mxu0 %v6693_v16  ;;  %v6768_v13 = vld [vmem:[#allocation8 + $0xb5c] ss:$48 sps:$4 sm:$0xff]   ;;  %v6763_v16 = vld [vmem:[#allocation8 + $0x558] ss:$48 sps:$4 sm:$0xff]  }
 0x109   :  { %2169 = vmatprep.subr.bf16.mxu1 %v6696_v17  ;;  %v6766_v17 = vld [vmem:[#allocation8 + $0xb58] ss:$48 sps:$4 sm:$0xff]  }
 0x10b   :  { %2119 = vmatpush2.bf16.msra.mxu0 %v6691_v18  ;;  %v6771_v18 = vld [vmem:[#allocation8 + $0x4fc] ss:$48 sps:$4 sm:$0xff]  }
 0x10c   :  { %2170 = vmatpush2.bf16.msra.mxu1 %v6694_v19  ;;  %2120 = vmatprep.subr.bf16.mxu0 %v6699_v20  ;;  %v6774_v19 = vld [vmem:[#allocation8 + $0xafc] ss:$48 sps:$4 sm:$0xff]   ;;  %v6769_v20 = vld [vmem:[#allocation8 + $0x4f8] ss:$48 sps:$4 sm:$0xff]  }
 0x10d   :  { %2171 = vmatprep.subr.bf16.mxu1 %v6702_v21  ;;  %v6772_v21 = vld [vmem:[#allocation8 + $0xaf8] ss:$48 sps:$4 sm:$0xff]  }
 0x10f   :  { %2121 = vmatpush2.bf16.msra.mxu0 %v6697_v24  ;;  %v6777_v24 = vld [vmem:[#allocation8 + $0x49c] ss:$48 sps:$4 sm:$0xff]  }
 0x110   :  { %2172 = vmatpush2.bf16.msra.mxu1 %v6700_v25  ;;  %2122 = vmatprep.subr.bf16.mxu0 %v6705_v26  ;;  %v6780_v25 = vld [vmem:[#allocation8 + $0xa9c] ss:$48 sps:$4 sm:$0xff]   ;;  %v6775_v26 = vld [vmem:[#allocation8 + $0x498] ss:$48 sps:$4 sm:$0xff]  }
 0x111   :  { %2173 = vmatprep.subr.bf16.mxu1 %v6708_v27  ;;  %v6778_v27 = vld [vmem:[#allocation8 + $0xa98] ss:$48 sps:$4 sm:$0xff]  }
 0x113   :  { %2123 = vmatpush2.bf16.msra.mxu0 %v6703_v29  ;;  %v6783_v29 = vld [vmem:[#allocation8 + $0x43c] ss:$48 sps:$4 sm:$0xff]  }
 0x114   :  { %2174 = vmatpush2.bf16.msra.mxu1 %v6706_v30  ;;  %2194 = vmatprep.subr.bf16.mxu0 %v6711_v36  ;;  %v6786_v30 = vld [vmem:[#allocation8 + $0xa3c] ss:$48 sps:$4 sm:$0xff]   ;;  %v6787_v36 = vld [vmem:[#allocation8 + $0x3d8] ss:$48 sps:$4 sm:$0xff]  }
 0x115   :  { %2245 = vmatprep.subr.bf16.mxu1 %v6714_v37  ;;  %v6790_v37 = vld [vmem:[#allocation8 + $0x9d8] ss:$48 sps:$4 sm:$0xff]  }
 0x116   :  { %2125 = vmatmul.mubr.bf16.vlgmr.msra.gmra.mxu0 %v7564_v40 }
 0x117   :  { %2176 = vmatmul.mubr.bf16.vlgmr.msra.gmra.mxu1 %v7566_v14  ;;  %2195 = vmatpush1.bf16.msra.mxu0 %v6709_v38  ;;  %v567_v38 = vlaneseq }
 0x118   :  { %2246 = vmatpush1.bf16.msra.mxu1 %v6712_v41  ;;  %2196 = vmatprep.subr.bf16.mxu0 %v6717_v22  ;;  %v6793_v41 = vld [vmem:[#allocation8 + $0x378] ss:$48 sps:$4 sm:$0xff]  }
 0x119   :  { %2247 = vmatprep.subr.bf16.mxu1 %v6720_v23  ;;  %2134 = vmatprep.mubr.bf16.mxu0 %v7568_v46  ;;  %v6796_v22 = vld [vmem:[#allocation8 + $0x978] ss:$48 sps:$4 sm:$0xff]   ;;  %v7584_v23 = vshrl.u32 %v567_v38, 7 }
 0x11a   :  { %2185 = vmatprep.mubr.bf16.mxu1 %v7570_v47 }
 0x11b   :  { %2197 = vmatpush1.bf16.msra.mxu0 %v6715_v44  ;;  %v6801_v44 = vld [vmem:[#allocation8 + $0x31c] ss:$48 sps:$4 sm:$0xff]  }
 0x11c   :  { %2248 = vmatpush1.bf16.msra.mxu1 %v6718_v45  ;;  %2198 = vmatprep.subr.bf16.mxu0 %v6723_v31  ;;  %v6804_v45 = vld [vmem:[#allocation8 + $0x91c] ss:$48 sps:$4 sm:$0xff]   ;;  %v7586_v31 = vld [vmem:[#allocation10] sm:$0xf] }
 0x11d   :  { %2249 = vmatprep.subr.bf16.mxu1 %v6726_v49  ;;  %v7589_v49 = vsub.s32 0, %v7584_v23 }
 0x11e   :  { %2135 = vmatmul.mubr.bf16.gmra.mxu0 %v7576_v50 }
 0x11f   :  { %2186 = vmatmul.mubr.bf16.gmra.mxu1 %v7578_v52  ;;  %2199 = vmatpush1.bf16.msra.mxu0 %v6721_v51  ;;  %v6807_v51 = vld [vmem:[#allocation8 + $0x2c4] ss:$48 sps:$4 sm:$0xff]  }
 0x120   :  { %2250 = vmatpush1.bf16.msra.mxu1 %v6724_v53  ;;  %2200 = vmatprep.subr.bf16.mxu0 %v6729_v54  ;;  %v6810_v53 = vld [vmem:[#allocation8 + $0x8c4] ss:$48 sps:$4 sm:$0xff]   ;;  %v7592_v54 = vsub.s32 1, %v7584_v23 }
 0x121   :  { %2251 = vmatprep.subr.bf16.mxu1 %v6732_v55  ;;  %2226 = vmatprep.mubr.bf16.mxu0 %v7556_v42  ;;  %v6748_v42 = vld [vmem:[#allocation8 + $0x678] ss:$48 sps:$4 sm:$0xff]   ;;  %v6805_v55 = vld [vmem:[#allocation8 + $0x2c0] ss:$48 sps:$4 sm:$0xff]  }
 0x122   :  { %2277 = vmatprep.mubr.bf16.mxu1 %v7558_v43  ;;  %v6753_v43 = vld [vmem:[#allocation8 + $0x1c] ss:$48 sps:$4 sm:$0xff]  }
 0x123   :  { %2201 = vmatpush1.bf16.msra.mxu0 %v6727_v56  ;;  %v570_v56 = vrot.slane %v7586_v31, %v7589_v49 }
 0x124   :  { %2252 = vmatpush1.bf16.msra.mxu1 %v6730_v57  ;;  %2202 = vmatprep.subr.bf16.mxu0 %v6735_v58  ;;  %v6808_v57 = vld [vmem:[#allocation8 + $0x8c0] ss:$48 sps:$4 sm:$0xff]   ;;  %v6813_v58 = vld [vmem:[#allocation8 + $0x264] ss:$48 sps:$4 sm:$0xff]  }
 0x125   :  { %2253 = vmatprep.subr.bf16.mxu1 %v6738_v59  ;;  %v6816_v59 = vld [vmem:[#allocation8 + $0x864] ss:$48 sps:$4 sm:$0xff]  }
 0x127   :  { %2203 = vmatpush1.bf16.msra.mxu0 %v6733_v60  ;;  %v7598_v60 = vrot.slane %v7586_v31, %v7592_v54 }
 0x128   :  { %2254 = vmatpush1.bf16.msra.mxu1 %v6736_v61  ;;  %2204 = vmatprep.subr.bf16.mxu0 %v6741_v62  ;;  %v6811_v61 = vld [vmem:[#allocation8 + $0x260] ss:$48 sps:$4 sm:$0xff]  }
 0x129   :  { %2255 = vmatprep.subr.bf16.mxu1 %v6744_v63 }
 0x12b   :  { %2205 = vmatpush1.bf16.msra.mxu0 %v6739_v0  ;;  %v6814_v0 = vld [vmem:[#allocation8 + $0x860] ss:$48 sps:$4 sm:$0xff]  }
 0x12c   :  { %2256 = vmatpush1.bf16.msra.mxu1 %v6742_v1  ;;  %2206 = vmatprep.subr.bf16.mxu0 %v6747_v2  ;;  %v6819_v2 = vld [vmem:[#allocation8 + $0x204] ss:$48 sps:$4 sm:$0xff]  }
 0x12d   :  { %2257 = vmatprep.subr.bf16.mxu1 %v6750_v3 }
 0x12f   :  { %2207 = vmatpush1.bf16.msra.mxu0 %v6745_v4 }
 0x130   :  { %2258 = vmatpush1.bf16.msra.mxu1 %v6748_v42  ;;  %2208 = vmatprep.subr.bf16.mxu0 %v6753_v43  ;;  %v6822_v42 = vld [vmem:[#allocation8 + $0x804] ss:$48 sps:$4 sm:$0xff]   ;;  %v160_v43 = vld [vmem:[#allocation7 + $0x8] sm:$0xff] }
 0x131   :  { %2259 = vmatprep.subr.bf16.mxu1 %v6756_v5 }
 0x133   :  { %2209 = vmatpush1.bf16.msra.mxu0 %v6751_v6 }
 0x134   :  { %2260 = vmatpush1.bf16.msra.mxu1 %v6754_v7  ;;  %2210 = vmatprep.subr.bf16.mxu0 %v6759_v8  ;;  %v6817_v7 = vld [vmem:[#allocation8 + $0x200] ss:$48 sps:$4 sm:$0xff]  }
 0x135   :  { %2261 = vmatprep.subr.bf16.mxu1 %v6762_v9 }
 0x137   :  { %2211 = vmatpush2.bf16.msra.mxu0 %v6757_v10  ;;  %v166_v10 = vld [vmem:[#allocation7 + $0x38] sm:$0xff] }
 0x138   :  { %2262 = vmatpush2.bf16.msra.mxu1 %v6760_v11  ;;  %2212 = vmatprep.subr.bf16.mxu0 %v6765_v12 }
 0x139   :  { %2263 = vmatprep.subr.bf16.mxu1 %v6768_v13  ;;  %v6820_v13 = vld [vmem:[#allocation8 + $0x800] ss:$48 sps:$4 sm:$0xff]  }
 0x13b   :  { %2213 = vmatpush2.bf16.msra.mxu0 %v6763_v16 }
 0x13c   :  { %2264 = vmatpush2.bf16.msra.mxu1 %v6766_v17  ;;  %2214 = vmatprep.subr.bf16.mxu0 %v6771_v18  ;;  %v6825_v18 = vld [vmem:[#allocation8 + $0x1a4] ss:$48 sps:$4 sm:$0xff]  }
 0x13d   :  { %2265 = vmatprep.subr.bf16.mxu1 %v6774_v19  ;;  %v6828_v19 = vld [vmem:[#allocation8 + $0x7a4] ss:$48 sps:$4 sm:$0xff]  }
 0x13f   :  { %2215 = vmatpush2.bf16.msra.mxu0 %v6769_v20 }
 0x140   :  { %2266 = vmatpush2.bf16.msra.mxu1 %v6772_v21  ;;  %2216 = vmatprep.subr.bf16.mxu0 %v6777_v24 }
 0x141   :  { %2267 = vmatprep.subr.bf16.mxu1 %v6780_v25 }
 0x143   :  { %2217 = vmatpush2.bf16.msra.mxu0 %v6775_v26 }
 0x144   :  { %2268 = vmatpush2.bf16.msra.mxu1 %v6778_v27  ;;  %2218 = vmatprep.subr.bf16.mxu0 %v6783_v29  ;;  %v6826_v27 = vld [vmem:[#allocation8 + $0x7a0] ss:$48 sps:$4 sm:$0xff]   ;;  %v6831_v29 = vld [vmem:[#allocation8 + $0x144] ss:$48 sps:$4 sm:$0xff]  }
 0x145   :  { %2269 = vmatprep.subr.bf16.mxu1 %v6786_v30 }
 0x147   :  { %2219 = vmatpush2.bf16.msra.mxu0 %v6781_v32 }
 0x148   :  { %2270 = vmatpush2.bf16.msra.mxu1 %v6784_v33  ;;  %2220 = vmatprep.subr.bf16.mxu0 %v6789_v34 }
 0x149   :  { %2271 = vmatprep.subr.bf16.mxu1 %v6792_v35  ;;  %v6834_v35 = vld [vmem:[#allocation8 + $0x744] ss:$48 sps:$4 sm:$0xff]  }
 0x14b   :  { %2221 = vmatpush2.bf16.msra.mxu0 %v6787_v36 }
 0x14c   :  { %2272 = vmatpush2.bf16.msra.mxu1 %v6790_v37  ;;  %2222 = vmatprep.subr.bf16.mxu0 %v6795_v39 }
 0x14d   :  { %2273 = vmatprep.subr.bf16.mxu1 %v6798_v15 }
 0x14f   :  { %2223 = vmatpush2.bf16.msra.mxu0 %v6793_v41  ;;  %v6829_v41 = vld [vmem:[#allocation8 + $0x140] ss:$48 sps:$4 sm:$0xff]  }
 0x150   :  { %2274 = vmatpush2.bf16.msra.mxu1 %v6796_v22  ;;  %2224 = vmatprep.subr.bf16.mxu0 %v6801_v44  ;;  %v6832_v22 = vld [vmem:[#allocation8 + $0x740] ss:$48 sps:$4 sm:$0xff]   ;;  %v6837_v44 = vld [vmem:[#allocation8 + $0xe4] ss:$48 sps:$4 sm:$0xff]  }
 0x151   :  { %2275 = vmatprep.subr.bf16.mxu1 %v6804_v45  ;;  %v6840_v45 = vld [vmem:[#allocation8 + $0x6e4] ss:$48 sps:$4 sm:$0xff]  }
 0x153   :  { %2225 = vmatpush2.bf16.msra.mxu0 %v6799_v48 }
 0x154   :  { %2276 = vmatpush2.bf16.msra.mxu1 %v6802_v28  ;;  %2957 = vmatprep.subr.bf16.mxu0 %v6807_v51 }
 0x155   :  { %3008 = vmatprep.subr.bf16.mxu1 %v6810_v53 }
 0x156   :  { %v1261_v62 = vpop.f32.mrf.mxu0  ;;  %2227 = vmatmul.mubr.bf16.vlgmr.msra.gmra.mxu0 %v7564_v40  ;;  %v164_v40 = vld [vmem:[#allocation7 + $0x28] sm:$0xff] }
 0x157   :  { %v1312_v63 = vpop.f32.mrf.mxu1  ;;  %2278 = vmatmul.mubr.bf16.vlgmr.msra.gmra.mxu1 %v7566_v14  ;;  %v1262_v1 = vadd.f32 %v1261_v62, %v570_v56  ;;  %2958 = vmatpush1.bf16.msra.mxu0 %v6805_v55  ;;  %v162_v14 = vld [vmem:[#allocation7 + $0x18] sm:$0xff]  ;;  %v7606_v21 = vpack.c.bf16 %v164_v40, %v160_v43  ;;  %v6844_v62 = vld [vmem:[#allocation8 + $0x680] ss:$48 sps:$4 sm:$0xff]  }
 0x158   :  { %3009 = vmatpush1.bf16.msra.mxu1 %v6808_v57  ;;  %v1263_v3 = vpop.f32.mrf.mxu0  ;;  %2959 = vmatprep.subr.bf16.mxu0 %v6813_v58  ;;  %v7608_v24 = vpack.c.bf16 %v166_v10, %v162_v14  ;;  %v6835_v57 = vld [vmem:[#allocation8 + $0xe0] ss:$48 sps:$4 sm:$0xff]   ;;  %v6867_v14 = vld [vmem:[#allocation8 + $0x504] ss:$48 sps:$4 sm:$0xff]  }
 0x159   :  { %v1314_v4 = vpop.f32.mrf.mxu1  ;;  %3010 = vmatprep.subr.bf16.mxu1 %v6816_v59  ;;  %v1313_v5 = vadd.f32 %v1312_v63, %v1262_v1  ;;  %v1264_v6 = vadd.f32 %v1263_v3, %v7598_v60  ;;  %2236 = vmatprep.mubr.bf16.mxu0 %v7568_v46  ;;  %v6838_v58 = vld [vmem:[#allocation8 + $0x6e0] ss:$48 sps:$4 sm:$0xff]   ;;  %v6843_v59 = vld [vmem:[#allocation8 + $0x84] ss:$48 sps:$4 sm:$0xff]  }
 0x15a   :  { %2287 = vmatprep.mubr.bf16.mxu1 %v7570_v47  ;;  %v1265_v8 = vpop.f32.mrf.mxu0  ;;  %v6823_v47 = vld [vmem:[#allocation8 + $0x1a0] ss:$48 sps:$4 sm:$0xff]   ;;  %v6849_v63 = vld [vmem:[#allocation8 + $0x24] ss:$48 sps:$4 sm:$0xff]  }
 0x15b   :  { %v1316_v9 = vpop.f32.mrf.mxu1  ;;  %v1315_v11 = vadd.f32 %v1314_v4, %v1264_v6  ;;  %v1266_v12 = vadd.f32 %v1265_v8, %v570_v56  ;;  %2960 = vmatpush1.bf16.msra.mxu0 %v6811_v61  ;;  %v3161_v30 = vmul.f32 0.088388346, %v1313_v5  ;;  %v6841_v61 = vld [vmem:[#allocation8 + $0x80] ss:$48 sps:$4 sm:$0xff]   ;;  %v6855_v3 = vld [vmem:[#allocation8 + $0x5c4] ss:$48 sps:$4 sm:$0xff]  }
 0x15c   :  { %3011 = vmatpush1.bf16.msra.mxu1 %v6814_v0  ;;  %v1267_v16 = vpop.f32.mrf.mxu0  ;;  %2961 = vmatprep.subr.bf16.mxu0 %v6819_v2  ;;  %v6852_v0 = vld [vmem:[#allocation8 + $0x624] ss:$48 sps:$4 sm:$0xff]   ;;  %v6847_v1 = vld [vmem:[#allocation8 + $0x20] ss:$48 sps:$4 sm:$0xff]  }
 0x15d   :  { %v1318_v17 = vpop.f32.mrf.mxu1  ;;  %3012 = vmatprep.subr.bf16.mxu1 %v6822_v42  ;;  %v1317_v46 = vadd.f32 %v1316_v9, %v1266_v12  ;;  %v1268_v20 = vadd.f32 %v1267_v16, %v7598_v60  ;;  %v3162_v36 = vmul.f32 0.088388346, %v1315_v11  ;;  %v6850_v2 = vld [vmem:[#allocation8 + $0x620] ss:$48 sps:$4 sm:$0xff]   ;;  %v6858_v4 = vld [vmem:[#allocation8 + $0xbc4] ss:$48 sps:$4 sm:$0xff]  }
 0x15e   :  { %v1271_v25 = vpop.f32.mrf.mxu0  ;;  %2237 = vmatmul.mubr.bf16.gmra.mxu0 %v7576_v50  ;;  %v6853_v42 = vld [vmem:[#allocation8 + $0x5c0] ss:$48 sps:$4 sm:$0xff]   ;;  %v6861_v5 = vld [vmem:[#allocation8 + $0x564] ss:$48 sps:$4 sm:$0xff]  }
 0x15f   :  { %v1322_v26 = vpop.f32.mrf.mxu1  ;;  %2288 = vmatmul.mubr.bf16.gmra.mxu1 %v7578_v52  ;;  %v3165_v32 = vmul.f32 0.088388346, %v1317_v46  ;;  %v1319_v33 = vadd.f32 %v1318_v17, %v1268_v20  ;;  %v1272_v34 = vadd.f32 %v1271_v25, %v570_v56  ;;  %2962 = vmatpush1.bf16.msra.mxu0 %v6817_v7  ;;  %v6856_v43 = vld [vmem:[#allocation8 + $0xbc0] ss:$48 sps:$4 sm:$0xff]   ;;  %v6864_v6 = vld [vmem:[#allocation8 + $0xb64] ss:$48 sps:$4 sm:$0xff]  }
 0x160   :  { %3013 = vmatpush1.bf16.msra.mxu1 %v6820_v13  ;;  %v1273_v37 = vpop.f32.mrf.mxu0  ;;  %2963 = vmatprep.subr.bf16.mxu0 %v6825_v18  ;;  %v6859_v7 = vld [vmem:[#allocation8 + $0x560] ss:$48 sps:$4 sm:$0xff]   ;;  %v6870_v8 = vld [vmem:[#allocation8 + $0xb04] ss:$48 sps:$4 sm:$0xff]  }
 0x161   :  { %v1324_v38 = vpop.f32.mrf.mxu1  ;;  %3014 = vmatprep.subr.bf16.mxu1 %v6828_v19  ;;  %v7612_v39 = vpack.c.bf16 %v3165_v32, %v3161_v30  ;;  %v3166_v50 = vmul.f32 0.088388346, %v1319_v33  ;;  %v1274_v15 = vadd.f32 %v1273_v37, %v7598_v60  ;;  %v7615_v52 = vadd.f32 %v1322_v26, %v1272_v34  ;;  %2989 = vmatprep.mubr.bf16.mxu0 %v7606_v21  ;;  %v6846_v60 = vld [vmem:[#allocation8 + $0x684] ss:$48 sps:$4 sm:$0xff]   ;;  %v6862_v40 = vld [vmem:[#allocation8 + $0xb60] ss:$48 sps:$4 sm:$0xff]  }
 0x162   :  { %3040 = vmatprep.mubr.bf16.mxu1 %v7608_v24  ;;  %v1275_v48 = vpop.f32.mrf.mxu0  ;;  %v6865_v9 = vld [vmem:[#allocation8 + $0x500] ss:$48 sps:$4 sm:$0xff]   ;;  %v6873_v11 = vld [vmem:[#allocation8 + $0x4a4] ss:$48 sps:$4 sm:$0xff]  }
 0x163   :  { %v1326_v28 = vpop.f32.mrf.mxu1  ;;  %v7619_v51 = vpack.c.bf16 %v3166_v50, %v3162_v36  ;;  %v7621_v53 = vadd.f32 %v1324_v38, %v1274_v15  ;;  %2964 = vmatpush1.bf16.msra.mxu0 %v6823_v47  ;;  %v6868_v10 = vld [vmem:[#allocation8 + $0xb00] ss:$48 sps:$4 sm:$0xff]   ;;  %v6876_v12 = vld [vmem:[#allocation8 + $0xaa4] ss:$48 sps:$4 sm:$0xff]   ;;  %v7624_v38 = vsub.s32 2, %v7584_v23 }
 0x164   :  { %3015 = vmatpush1.bf16.msra.mxu1 %v6826_v27  ;;  %2965 = vmatprep.subr.bf16.mxu0 %v6831_v29  ;;  %v1276_v55 = vpop.f32.mrf.mxu0  ;;  %v6871_v13 = vld [vmem:[#allocation8 + $0x4a0] ss:$48 sps:$4 sm:$0xff]   ;;  %v6879_v17 = vld [vmem:[#allocation8 + $0x444] ss:$48 sps:$4 sm:$0xff]  }
 0x165   :  { %3016 = vmatprep.subr.bf16.mxu1 %v6834_v35  ;;  %v1327_v56 = vpop.f32.mrf.mxu1  ;;  %v6874_v16 = vld [vmem:[#allocation8 + $0xaa0] ss:$48 sps:$4 sm:$0xff]   ;;  %v6882_v18 = vld [vmem:[#allocation8 + $0xa44] ss:$48 sps:$4 sm:$0xff]   ;;  %v168_v55 = vld [vmem:[#allocation7 + $0x48] sm:$0xf] }
 0x166   :  { %v6877_v19 = vld [vmem:[#allocation8 + $0x440] ss:$48 sps:$4 sm:$0xff]   ;;  %v6885_v20 = vld [vmem:[#allocation8 + $0x3e4] ss:$48 sps:$4 sm:$0xff]   ;;  %v170_v56 = vld [vmem:[#allocation7 + $0x58] sm:$0xf] }
 0x167   :  { %2966 = vmatpush1.bf16.msra.mxu0 %v6829_v41  ;;  %v6880_v46 = vld [vmem:[#allocation8 + $0xa40] ss:$48 sps:$4 sm:$0xff]   ;;  %v6888_v47 = vld [vmem:[#allocation8 + $0x9e4] ss:$48 sps:$4 sm:$0xff]  }
 0x168   :  { %3017 = vmatpush1.bf16.msra.mxu1 %v6832_v22  ;;  %2967 = vmatprep.subr.bf16.mxu0 %v6837_v44  ;;  %v6883_v25 = vld [vmem:[#allocation8 + $0x3e0] ss:$48 sps:$4 sm:$0xff]   ;;  %v6891_v27 = vld [vmem:[#allocation8 + $0x384] ss:$48 sps:$4 sm:$0xff]   ;;  %v6903_v22 = vld [vmem:[#allocation8 + $0x2cc] ss:$48 sps:$4 sm:$0xff]  }
 0x169   :  { %3018 = vmatprep.subr.bf16.mxu1 %v6840_v45  ;;  %v6886_v26 = vld [vmem:[#allocation8 + $0x9e0] ss:$48 sps:$4 sm:$0xff]   ;;  %v6894_v29 = vld [vmem:[#allocation8 + $0x984] ss:$48 sps:$4 sm:$0xff]   ;;  %v6906_v44 = vld [vmem:[#allocation8 + $0x8cc] ss:$48 sps:$4 sm:$0xff]  }
 0x16a   :  { %v6889_v30 = vld [vmem:[#allocation8 + $0x380] ss:$48 sps:$4 sm:$0xff]   ;;  %v6897_v33 = vld [vmem:[#allocation8 + $0x324] ss:$48 sps:$4 sm:$0xff]   ;;  %v7627_v45 = vsub.s32 3, %v7584_v23 }
 0x16b   :  { %2968 = vmatpush1.bf16.msra.mxu0 %v6835_v57  ;;  %v6892_v32 = vld [vmem:[#allocation8 + $0x980] ss:$48 sps:$4 sm:$0xff]   ;;  %v6900_v34 = vld [vmem:[#allocation8 + $0x924] ss:$48 sps:$4 sm:$0xff]   ;;  %v578_v57 = vrot.slane %v7586_v31, %v7624_v38 }
 0x16c   :  { %3019 = vmatpush1.bf16.msra.mxu1 %v6838_v58  ;;  %2969 = vmatprep.subr.bf16.mxu0 %v6843_v59  ;;  %v6895_v35 = vld [vmem:[#allocation8 + $0x320] ss:$48 sps:$4 sm:$0xff]   ;;  %v6901_v58 = vld [vmem:[#allocation8 + $0x2c8] ss:$48 sps:$4 sm:$0xff]   ;;  %v7637_v23 = vrot.slane %v7586_v31, %v7627_v45 }
 0x16d   :  { %3020 = vmatprep.subr.bf16.mxu1 %v6846_v60  ;;  %v6898_v36 = vld [vmem:[#allocation8 + $0x920] ss:$48 sps:$4 sm:$0xff]   ;;  %v6904_v59 = vld [vmem:[#allocation8 + $0x8c8] ss:$48 sps:$4 sm:$0xff]   ;;  %v6909_v60 = vld [vmem:[#allocation8 + $0x26c] ss:$48 sps:$4 sm:$0xff]  }
 0x16e   :  { %v159_v37 = vld [vmem:[#allocation7] sm:$0xff]  ;;  %v161_v15 = vld [vmem:[#allocation7 + $0x10] sm:$0xff] }
 0x16f   :  { %2970 = vmatpush1.bf16.msra.mxu0 %v6841_v61  ;;  %v163_v50 = vld [vmem:[#allocation7 + $0x20] sm:$0xff]  ;;  %v165_v41 = vld [vmem:[#allocation7 + $0x30] sm:$0xff]  ;;  %v6912_v61 = vld [vmem:[#allocation8 + $0x86c] ss:$48 sps:$4 sm:$0xff]  }
 0x170   :  { %3021 = vmatpush1.bf16.msra.mxu1 %v6844_v62  ;;  %2971 = vmatprep.subr.bf16.mxu0 %v6849_v63  ;;  %v7629_v48 = vpack.c.bf16 %v163_v50, %v159_v37  ;;  %v7631_v28 = vpack.c.bf16 %v165_v41, %v161_v15  ;;  %v7639_v62 = vpack.c.bf16 %v168_v55, %v168_v55  ;;  %v6927_v15 = vld [vmem:[#allocation8 + $0x14c] ss:$48 sps:$4 sm:$0xff]  }
 0x171   :  { %3022 = vmatprep.subr.bf16.mxu1 %v6852_v0  ;;  %v7641_v63 = vpack.c.bf16 %v170_v56, %v170_v56  ;;  %v6930_v41 = vld [vmem:[#allocation8 + $0x74c] ss:$48 sps:$4 sm:$0xff]  }
 0x173   :  { %2972 = vmatpush1.bf16.msra.mxu0 %v6847_v1 }
 0x174   :  { %3023 = vmatpush1.bf16.msra.mxu1 %v6850_v2  ;;  %2973 = vmatprep.subr.bf16.mxu0 %v6855_v3  ;;  %v6907_v2 = vld [vmem:[#allocation8 + $0x268] ss:$48 sps:$4 sm:$0xff]  }
 0x175   :  { %3024 = vmatprep.subr.bf16.mxu1 %v6858_v4  ;;  %v6910_v4 = vld [vmem:[#allocation8 + $0x868] ss:$48 sps:$4 sm:$0xff]  }
 0x177   :  { %2974 = vmatpush2.bf16.msra.mxu0 %v6853_v42  ;;  %v167_v42 = vld [vmem:[#allocation7 + $0x40] sm:$0xf] }
 0x178   :  { %3025 = vmatpush2.bf16.msra.mxu1 %v6856_v43  ;;  %2975 = vmatprep.subr.bf16.mxu0 %v6861_v5  ;;  %v169_v43 = vld [vmem:[#allocation7 + $0x50] sm:$0xf] }
 0x179   :  { %3026 = vmatprep.subr.bf16.mxu1 %v6864_v6  ;;  %v6915_v6 = vld [vmem:[#allocation8 + $0x20c] ss:$48 sps:$4 sm:$0xff]  }
 0x17b   :  { %2976 = vmatpush2.bf16.msra.mxu0 %v6859_v7  ;;  %v6918_v7 = vld [vmem:[#allocation8 + $0x80c] ss:$48 sps:$4 sm:$0xff]  }
 0x17c   :  { %3027 = vmatpush2.bf16.msra.mxu1 %v6862_v40  ;;  %2977 = vmatprep.subr.bf16.mxu0 %v6867_v14 }
 0x17d   :  { %3028 = vmatprep.subr.bf16.mxu1 %v6870_v8 }
 0x17f   :  { %2978 = vmatpush2.bf16.msra.mxu0 %v6865_v9 }
 0x180   :  { %3029 = vmatpush2.bf16.msra.mxu1 %v6868_v10  ;;  %2979 = vmatprep.subr.bf16.mxu0 %v6873_v11  ;;  %v7648_v10 = vpack.c.bf16 %v167_v42, %v167_v42  ;;  %v7650_v11 = vpack.c.bf16 %v169_v43, %v169_v43  ;;  %v6942_v42 = vld [vmem:[#allocation8 + $0x68c] ss:$48 sps:$4 sm:$0xff]   ;;  %v6937_v43 = vld [vmem:[#allocation8 + $0x88] ss:$48 sps:$4 sm:$0xff]  }
 0x181   :  { %3030 = vmatprep.subr.bf16.mxu1 %v6876_v12 }
 0x183   :  { %2980 = vmatpush2.bf16.msra.mxu0 %v6871_v13 }
 0x184   :  { %3031 = vmatpush2.bf16.msra.mxu1 %v6874_v16  ;;  %2981 = vmatprep.subr.bf16.mxu0 %v6879_v17  ;;  %v6913_v16 = vld [vmem:[#allocation8 + $0x208] ss:$48 sps:$4 sm:$0xff]  }
 0x185   :  { %3032 = vmatprep.subr.bf16.mxu1 %v6882_v18  ;;  %v6916_v17 = vld [vmem:[#allocation8 + $0x808] ss:$48 sps:$4 sm:$0xff]  }
 0x187   :  { %2982 = vmatpush2.bf16.msra.mxu0 %v6877_v19 }
 0x188   :  { %3033 = vmatpush2.bf16.msra.mxu1 %v6880_v46  ;;  %2983 = vmatprep.subr.bf16.mxu0 %v6885_v20  ;;  %v6921_v46 = vld [vmem:[#allocation8 + $0x1ac] ss:$48 sps:$4 sm:$0xff]  }
 0x189   :  { %3034 = vmatprep.subr.bf16.mxu1 %v6888_v47  ;;  %v6924_v20 = vld [vmem:[#allocation8 + $0x7ac] ss:$48 sps:$4 sm:$0xff]  }
 0x18b   :  { %2984 = vmatpush2.bf16.msra.mxu0 %v6883_v25 }
 0x18c   :  { %3035 = vmatpush2.bf16.msra.mxu1 %v6886_v26  ;;  %2985 = vmatprep.subr.bf16.mxu0 %v6891_v27 }
 0x18d   :  { %3036 = vmatprep.subr.bf16.mxu1 %v6894_v29  ;;  %v6919_v29 = vld [vmem:[#allocation8 + $0x1a8] ss:$48 sps:$4 sm:$0xff]  }
 0x18f   :  { %2986 = vmatpush2.bf16.msra.mxu0 %v6889_v30 }
 0x190   :  { %3037 = vmatpush2.bf16.msra.mxu1 %v6892_v32  ;;  %2987 = vmatprep.subr.bf16.mxu0 %v6897_v33 }
 0x191   :  { %3038 = vmatprep.subr.bf16.mxu1 %v6900_v34 }
 0x193   :  { %2988 = vmatpush2.bf16.msra.mxu0 %v6895_v35  ;;  %v6922_v35 = vld [vmem:[#allocation8 + $0x7a8] ss:$48 sps:$4 sm:$0xff]  }
 0x194   :  { %3039 = vmatpush2.bf16.msra.mxu1 %v6898_v36  ;;  %3059 = vmatprep.subr.bf16.mxu0 %v6903_v22 }
 0x195   :  { %3110 = vmatprep.subr.bf16.mxu1 %v6906_v44 }
 0x196   :  { %v1363_v0 = vpop.f32.mrf.mxu0  ;;  %2990 = vmatmul.mubr.bf16.vlgmr.msra.gmra.mxu0 %v7629_v48 }
 0x197   :  { %v1414_v1 = vpop.f32.mrf.mxu1  ;;  %3041 = vmatmul.mubr.bf16.vlgmr.msra.gmra.mxu1 %v7631_v28  ;;  %v1364_v3 = vadd.f32 %v1363_v0, %v578_v57  ;;  %3060 = vmatpush1.bf16.msra.mxu0 %v6901_v58  ;;  %v6928_v0 = vld [vmem:[#allocation8 + $0x748] ss:$48 sps:$4 sm:$0xff]  }
 0x198   :  { %3111 = vmatpush1.bf16.msra.mxu1 %v6904_v59  ;;  %v1365_v5 = vpop.f32.mrf.mxu0  ;;  %3061 = vmatprep.subr.bf16.mxu0 %v6909_v60 }
 0x199   :  { %v1416_v31 = vpop.f32.mrf.mxu1  ;;  %3112 = vmatprep.subr.bf16.mxu1 %v6912_v61  ;;  %v1415_v40 = vadd.f32 %v1414_v1, %v1364_v3  ;;  %v1366_v14 = vadd.f32 %v1365_v5, %v7637_v23  ;;  %2999 = vmatprep.mubr.bf16.mxu0 %v7639_v62  ;;  %v6925_v61 = vld [vmem:[#allocation8 + $0x148] ss:$48 sps:$4 sm:$0xff]   ;;  %v6933_v1 = vld [vmem:[#allocation8 + $0xec] ss:$48 sps:$4 sm:$0xff]  }
 0x19a   :  { %3050 = vmatprep.mubr.bf16.mxu1 %v7641_v63  ;;  %v1367_v8 = vpop.f32.mrf.mxu0  ;;  %v6940_v5 = vld [vmem:[#allocation8 + $0x688] ss:$48 sps:$4 sm:$0xff]  }
 0x19b   :  { %v1418_v9 = vpop.f32.mrf.mxu1  ;;  %v1417_v12 = vadd.f32 %v1416_v31, %v1366_v14  ;;  %v1368_v13 = vadd.f32 %v1367_v8, %v578_v57  ;;  %3062 = vmatpush1.bf16.msra.mxu0 %v6907_v2  ;;  %v3163_v30 = vmul.f32 0.088388346, %v1415_v40  ;;  %v6945_v31 = vld [vmem:[#allocation8 + $0x2c] ss:$48 sps:$4 sm:$0xff]   ;;  %v6946_v40 = vld [vmem:[#allocation8 + $0x628] ss:$48 sps:$4 sm:$0xff]  }
 0x19c   :  { %3113 = vmatpush1.bf16.msra.mxu1 %v6910_v4  ;;  %v1369_v18 = vpop.f32.mrf.mxu0  ;;  %3063 = vmatprep.subr.bf16.mxu0 %v6915_v6  ;;  %v6939_v4 = vld [vmem:[#allocation8 + $0x8c] ss:$48 sps:$4 sm:$0xff]  }
 0x19d   :  { %v1420_v19 = vpop.f32.mrf.mxu1  ;;  %3114 = vmatprep.subr.bf16.mxu1 %v6918_v7  ;;  %v1419_v47 = vadd.f32 %v1418_v9, %v1368_v13  ;;  %v1370_v25 = vadd.f32 %v1369_v18, %v7637_v23  ;;  %v3164_v36 = vmul.f32 0.088388346, %v1417_v12  ;;  %v6948_v6 = vld [vmem:[#allocation8 + $0x62c] ss:$48 sps:$4 sm:$0xff]   ;;  %v6943_v7 = vld [vmem:[#allocation8 + $0x28] ss:$48 sps:$4 sm:$0xff]  }
 0x19e   :  { %v1373_v26 = vpop.f32.mrf.mxu0  ;;  %3000 = vmatmul.mubr.bf16.gmra.mxu0 %v7648_v10  ;;  %v6951_v14 = vld [vmem:[#allocation8 + $0x5cc] ss:$48 sps:$4 sm:$0xff]   ;;  %v6949_v9 = vld [vmem:[#allocation8 + $0x5c8] ss:$48 sps:$4 sm:$0xff]  }
 0x19f   :  { %v1424_v27 = vpop.f32.mrf.mxu1  ;;  %3051 = vmatmul.mubr.bf16.gmra.mxu1 %v7650_v11  ;;  %v3167_v32 = vmul.f32 0.088388346, %v1419_v47  ;;  %v1421_v33 = vadd.f32 %v1420_v19, %v1370_v25  ;;  %v1374_v34 = vadd.f32 %v1373_v26, %v578_v57  ;;  %3064 = vmatpush1.bf16.msra.mxu0 %v6913_v16  ;;  %v6954_v8 = vld [vmem:[#allocation8 + $0xbcc] ss:$48 sps:$4 sm:$0xff]   ;;  %v6952_v12 = vld [vmem:[#allocation8 + $0xbc8] ss:$48 sps:$4 sm:$0xff]  }
 0x1a0   :  { %3115 = vmatpush1.bf16.msra.mxu1 %v6916_v17  ;;  %v1375_v37 = vpop.f32.mrf.mxu0  ;;  %3065 = vmatprep.subr.bf16.mxu0 %v6921_v46  ;;  %v6957_v13 = vld [vmem:[#allocation8 + $0x56c] ss:$48 sps:$4 sm:$0xff]   ;;  %v6955_v17 = vld [vmem:[#allocation8 + $0x568] ss:$48 sps:$4 sm:$0xff]  }
 0x1a1   :  { %v1426_v50 = vpop.f32.mrf.mxu1  ;;  %3116 = vmatprep.subr.bf16.mxu1 %v6924_v20  ;;  %v7655_v22 = vpack.c.bf16 %v3167_v32, %v3163_v30  ;;  %v3168_v44 = vmul.f32 0.088388346, %v1421_v33  ;;  %v1376_v55 = vadd.f32 %v1375_v37, %v7637_v23  ;;  %v7658_v56 = vadd.f32 %v1424_v27, %v1374_v34  ;;  %3091 = vmatprep.mubr.bf16.mxu0 %v7606_v21  ;;  %v6936_v23 = vld [vmem:[#allocation8 + $0x6ec] ss:$48 sps:$4 sm:$0xff]   ;;  %v6931_v21 = vld [vmem:[#allocation8 + $0xe8] ss:$48 sps:$4 sm:$0xff]  }
 0x1a2   :  { %3142 = vmatprep.mubr.bf16.mxu1 %v7608_v24  ;;  %v1377_v57 = vpop.f32.mrf.mxu0  ;;  %v6934_v24 = vld [vmem:[#allocation8 + $0x6e8] ss:$48 sps:$4 sm:$0xff]   ;;  %v6960_v16 = vld [vmem:[#allocation8 + $0xb6c] ss:$48 sps:$4 sm:$0xff]  }
 0x1a3   :  { %8552 = vst [vmem:[#allocation20_spill] sm:$0xff] %v7655_v22  ;;  %8553 = vst [vmem:[#allocation21_spill] sm:$0xff] %v7658_v56  ;;  %v1428_v58 = vpop.f32.mrf.mxu1  ;;  %v7662_v59 = vpack.c.bf16 %v3168_v44, %v3164_v36  ;;  %v7664_v60 = vadd.f32 %v1426_v50, %v1376_v55  ;;  %3066 = vmatpush1.bf16.msra.mxu0 %v6919_v29  ;;  %v6958_v18 = vld [vmem:[#allocation8 + $0xb68] ss:$48 sps:$4 sm:$0xff]   ;;  %v6963_v19 = vld [vmem:[#allocation8 + $0x50c] ss:$48 sps:$4 sm:$0xff]  }
 0x1a4   :  { %3117 = vmatpush1.bf16.msra.mxu1 %v6922_v35  ;;  %3067 = vmatprep.subr.bf16.mxu0 %v6927_v15  ;;  %v1378_v2 = vpop.f32.mrf.mxu0  ;;  %v6966_v46 = vld [vmem:[#allocation8 + $0xb0c] ss:$48 sps:$4 sm:$0xff]   ;;  %v6961_v20 = vld [vmem:[#allocation8 + $0x508] ss:$48 sps:$4 sm:$0xff]  }
 0x1a5   :  { %8554 = vst [vmem:[#allocation22_spill] sm:$0xff] %v7662_v59  ;;  %8555 = vst [vmem:[#allocation23_spill] sm:$0xff] %v7664_v60  ;;  %3118 = vmatprep.subr.bf16.mxu1 %v6930_v41  ;;  %v1429_v3 = vpop.f32.mrf.mxu1  ;;  %v6964_v47 = vld [vmem:[#allocation8 + $0xb08] ss:$48 sps:$4 sm:$0xff]   ;;  %v6969_v25 = vld [vmem:[#allocation8 + $0x4ac] ss:$48 sps:$4 sm:$0xff]  }
 0x1a6   :  { %v6972_v26 = vld [vmem:[#allocation8 + $0xaac] ss:$48 sps:$4 sm:$0xff]   ;;  %v6967_v27 = vld [vmem:[#allocation8 + $0x4a8] ss:$48 sps:$4 sm:$0xff]   ;;  %v7870_v60 = vld [vmem:[#allocation11 + $0x48] ss:$16 sps:$4 sm:$0xff]  }
 0x1a7   :  { %3068 = vmatpush1.bf16.msra.mxu0 %v6925_v61  ;;  %v6970_v29 = vld [vmem:[#allocation8 + $0xaa8] ss:$48 sps:$4 sm:$0xff]   ;;  %v6975_v30 = vld [vmem:[#allocation8 + $0x44c] ss:$48 sps:$4 sm:$0xff]   ;;  %8577 = vst [vmem:[#allocation45_spill] sm:$0xff] %v7870_v60 }
 0x1a8   :  { %3119 = vmatpush1.bf16.msra.mxu1 %v6928_v0  ;;  %3069 = vmatprep.subr.bf16.mxu0 %v6933_v1  ;;  %v6978_v32 = vld [vmem:[#allocation8 + $0xa4c] ss:$48 sps:$4 sm:$0xff]   ;;  %v6973_v33 = vld [vmem:[#allocation8 + $0x448] ss:$48 sps:$4 sm:$0xff]   ;;  %v7666_v1 = vld [vmem:[#allocation10 + $0x4] sm:$0xf] }
 0x1a9   :  { %3120 = vmatprep.subr.bf16.mxu1 %v6936_v23  ;;  %v6976_v34 = vld [vmem:[#allocation8 + $0xa48] ss:$48 sps:$4 sm:$0xff]   ;;  %v6981_v35 = vld [vmem:[#allocation8 + $0x3ec] ss:$48 sps:$4 sm:$0xff]   ;;  %v8465_v23 = vmov 0.0   ;;  %v1435_v2 = vrot.slane %v7666_v1, %v7589_v49 }
 0x1aa   :  { %v6984_v36 = vld [vmem:[#allocation8 + $0x9ec] ss:$48 sps:$4 sm:$0xff]   ;;  %v6979_v37 = vld [vmem:[#allocation8 + $0x3e8] ss:$48 sps:$4 sm:$0xff]  }
 0x1ab   :  { %3070 = vmatpush1.bf16.msra.mxu0 %v6931_v21  ;;  %v6982_v50 = vld [vmem:[#allocation8 + $0x9e8] ss:$48 sps:$4 sm:$0xff]   ;;  %v6987_v15 = vld [vmem:[#allocation8 + $0x38c] ss:$48 sps:$4 sm:$0xff]  }
 0x1ac   :  { %3121 = vmatpush1.bf16.msra.mxu1 %v6934_v24  ;;  %3071 = vmatprep.subr.bf16.mxu0 %v6939_v4  ;;  %v6990_v41 = vld [vmem:[#allocation8 + $0x98c] ss:$48 sps:$4 sm:$0xff]   ;;  %v6985_v44 = vld [vmem:[#allocation8 + $0x388] ss:$48 sps:$4 sm:$0xff]  }
 0x1ad   :  { %3122 = vmatprep.subr.bf16.mxu1 %v6942_v42  ;;  %v6988_v55 = vld [vmem:[#allocation8 + $0x988] ss:$48 sps:$4 sm:$0xff]   ;;  %v6993_v57 = vld [vmem:[#allocation8 + $0x32c] ss:$48 sps:$4 sm:$0xff]  }
 0x1ae   :  { %v6996_v58 = vld [vmem:[#allocation8 + $0x92c] ss:$48 sps:$4 sm:$0xff]   ;;  %v6991_v61 = vld [vmem:[#allocation8 + $0x328] ss:$48 sps:$4 sm:$0xff]  }
 0x1af   :  { %3072 = vmatpush1.bf16.msra.mxu0 %v6937_v43  ;;  %v6994_v0 = vld [vmem:[#allocation8 + $0x928] ss:$48 sps:$4 sm:$0xff]   ;;  %v1439_v43 = vrot.slane %v7666_v1, %v7592_v54  ;;  %v7880_v56 = vld [vmem:[#allocation11 + $0x20] ss:$16 sps:$4 sm:$0xff]  }
 0x1b0   :  { %3123 = vmatpush1.bf16.msra.mxu1 %v6940_v5  ;;  %3073 = vmatprep.subr.bf16.mxu0 %v6945_v31  ;;  %8580 = vst [vmem:[#allocation48_spill] sm:$0xff] %v7880_v56 }
 0x1b1   :  { %3124 = vmatprep.subr.bf16.mxu1 %v6948_v6 }
 0x1b3   :  { %3074 = vmatpush1.bf16.msra.mxu0 %v6943_v7 }
 0x1b4   :  { %3125 = vmatpush1.bf16.msra.mxu1 %v6946_v40  ;;  %3075 = vmatprep.subr.bf16.mxu0 %v6951_v14 }
 0x1b5   :  { %3126 = vmatprep.subr.bf16.mxu1 %v6954_v8 }
 0x1b7   :  { %3076 = vmatpush2.bf16.msra.mxu0 %v6949_v9 }
 0x1b8   :  { %3127 = vmatpush2.bf16.msra.mxu1 %v6952_v12  ;;  %3077 = vmatprep.subr.bf16.mxu0 %v6957_v13 }
 0x1b9   :  { %3128 = vmatprep.subr.bf16.mxu1 %v6960_v16 }
 0x1bb   :  { %3078 = vmatpush2.bf16.msra.mxu0 %v6955_v17 }
 0x1bc   :  { %3129 = vmatpush2.bf16.msra.mxu1 %v6958_v18  ;;  %3079 = vmatprep.subr.bf16.mxu0 %v6963_v19 }
 0x1bd   :  { %3130 = vmatprep.subr.bf16.mxu1 %v6966_v46 }
 0x1bf   :  { %3080 = vmatpush2.bf16.msra.mxu0 %v6961_v20 }
 0x1c0   :  { %3131 = vmatpush2.bf16.msra.mxu1 %v6964_v47  ;;  %3081 = vmatprep.subr.bf16.mxu0 %v6969_v25 }
 0x1c1   :  { %3132 = vmatprep.subr.bf16.mxu1 %v6972_v26 }
 0x1c3   :  { %3082 = vmatpush2.bf16.msra.mxu0 %v6967_v27 }
 0x1c4   :  { %3133 = vmatpush2.bf16.msra.mxu1 %v6970_v29  ;;  %3083 = vmatprep.subr.bf16.mxu0 %v6975_v30 }
 0x1c5   :  { %3134 = vmatprep.subr.bf16.mxu1 %v6978_v32 }
 0x1c7   :  { %3084 = vmatpush2.bf16.msra.mxu0 %v6973_v33 }
 0x1c8   :  { %3135 = vmatpush2.bf16.msra.mxu1 %v6976_v34  ;;  %3085 = vmatprep.subr.bf16.mxu0 %v6981_v35 }
 0x1c9   :  { %3136 = vmatprep.subr.bf16.mxu1 %v6984_v36 }
 0x1cb   :  { %3086 = vmatpush2.bf16.msra.mxu0 %v6979_v37  ;;  %v1443_v37 = vrot.slane %v7666_v1, %v7624_v38 }
 0x1cc   :  { %3137 = vmatpush2.bf16.msra.mxu1 %v6982_v50  ;;  %3087 = vmatprep.subr.bf16.mxu0 %v6987_v15  ;;  %v1447_v50 = vrot.slane %v7666_v1, %v7627_v45 }
 0x1cd   :  { %3138 = vmatprep.subr.bf16.mxu1 %v6990_v41 }
 0x1cf   :  { %3088 = vmatpush2.bf16.msra.mxu0 %v6985_v44 }
 0x1d0   :  { %3139 = vmatpush2.bf16.msra.mxu1 %v6988_v55  ;;  %3089 = vmatprep.subr.bf16.mxu0 %v6993_v57 }
 0x1d1   :  { %3140 = vmatprep.subr.bf16.mxu1 %v6996_v58 }
 0x1d3   :  { %3090 = vmatpush2.bf16.msra.mxu0 %v6991_v61 }
 0x1d4   :  { %3141 = vmatpush2.bf16.msra.mxu1 %v6994_v0  ;;  %6308 = vmatprep.subr.bf16.mxu0 %v8465_v23 }
 0x1d5   :  { %6314 = vmatprep.subr.bf16.mxu1 %v8465_v23 }
 0x1d6   :  { %v2126_v3 = vpop.f32.mrf.mxu0  ;;  %3092 = vmatmul.mubr.bf16.vlgmr.msra.gmra.mxu0 %v7629_v48 }
 0x1d7   :  { %v2177_v21 = vpop.f32.mrf.mxu1  ;;  %3143 = vmatmul.mubr.bf16.vlgmr.msra.gmra.mxu1 %v7631_v28  ;;  %3101 = vmatprep.mubr.bf16.mxu0 %v7639_v62  ;;  %v2127_v42 = vadd.f32 %v2126_v3, %v1435_v2 }
 0x1d8   :  { %3152 = vmatprep.mubr.bf16.mxu1 %v7641_v63  ;;  %v2128_v24 = vpop.f32.mrf.mxu0 }
 0x1d9   :  { %v2179_v4 = vpop.f32.mrf.mxu1  ;;  %v2178_v14 = vadd.f32 %v2177_v21, %v2127_v42  ;;  %v2129_v8 = vadd.f32 %v2128_v24, %v1439_v43 }
 0x1da   :  { %v2130_v5 = vpop.f32.mrf.mxu0 }
 0x1db   :  { %v2181_v31 = vpop.f32.mrf.mxu1  ;;  %v2131_v6 = vadd.f32 %v2130_v5, %v1435_v2  ;;  %v2180_v18 = vadd.f32 %v2179_v4, %v2129_v8 }
 0x1dc   :  { %v2132_v7 = vpop.f32.mrf.mxu0 }
 0x1dd   :  { %v2183_v40 = vpop.f32.mrf.mxu1  ;;  %v2182_v48 = vadd.f32 %v2181_v31, %v2131_v6  ;;  %v2133_v9 = vadd.f32 %v2132_v7, %v1439_v43 }
 0x1de   :  { %v2136_v28 = vpop.f32.mrf.mxu0  ;;  %3102 = vmatmul.mubr.bf16.gmra.mxu0 %v7648_v10 }
 0x1df   :  { %v2187_v62 = vpop.f32.mrf.mxu1  ;;  %3153 = vmatmul.mubr.bf16.gmra.mxu1 %v7650_v11  ;;  %v3181_v63 = vpack.c.bf16 %v2182_v48, %v2178_v14  ;;  %v2184_v12 = vadd.f32 %v2183_v40, %v2133_v9  ;;  %v2137_v13 = vadd.f32 %v2136_v28, %v1435_v2  ;;  %6310 = vmatprep.mubr.msk.bf16.mxu0 %vm7453_vm0, %v8465_v23 }
 0x1e0   :  { %6316 = vmatprep.mubr.msk.bf16.mxu1 %vm7453_vm0, %v8465_v23  ;;  %v2138_v16 = vpop.f32.mrf.mxu0 }
 0x1e1   :  { %v2189_v17 = vpop.f32.mrf.mxu1  ;;  %v2139_v19 = vadd.f32 %v2138_v16, %v1439_v43  ;;  %v2188_v46 = vadd.f32 %v2187_v62, %v2137_v13  ;;  %6309 = vmatpush3.bf16.xpose.msra.mxu0 %v3181_v63  ;;  %v3182_v20 = vpack.c.bf16 %v2184_v12, %v2180_v18  ;;  %v4823_v29 = vrot.slane %v3181_v63, 5  ;;  %v565_v16 = vld [vmem:[#allocation10 + $0x8] sm:$0xf] }
 0x1e2   :  { %6320 = vmatprep.subr.bf16.mxu0 %v8465_v23  ;;  %v2140_v10 = vpop.f32.mrf.mxu0  ;;  %v2304_v18 = vrot.slane %v565_v16, %v7592_v54 }
 0x1e3   :  { %v2191_v11 = vpop.f32.mrf.mxu1  ;;  %v3185_v47 = vpack.c.bf16 %v2188_v46, %v2188_v46  ;;  %v2190_v25 = vadd.f32 %v2189_v17, %v2139_v19  ;;  %v4952_v33 = vrot.slane %v3182_v20, 5  ;;  %v2300_v17 = vrot.slane %v565_v16, %v7589_v49 }
 0x1e4   :  { %v2141_v26 = vpop.f32.mrf.mxu0 }
 0x1e5   :  { %v2192_v27 = vpop.f32.mrf.mxu1  ;;  %v4824_v30 = vrot.slane %v3185_v47, 5  ;;  %v3186_v32 = vpack.c.bf16 %v2190_v25, %v2190_v25 }
 0x1e7   :  { %v4953_v34 = vrot.slane %v3186_v32, 5  ;;  %v7686_v35 = vsel %vm4816_vm1, %v4823_v29, %v4824_v30 }
 0x1e8   :  { %6311 = vmatmul.mubr.bf16.vlgmr.msra.gmra.mxu0 %v7612_v39 }
 0x1e9   :  { %6321 = vmatpush3.bf16.xpose.msra.mxu0 %v3182_v20  ;;  %6322 = vmatprep.mubr.msk.bf16.mxu0 %vm7453_vm0, %v8465_v23  ;;  %v7692_v36 = vsel %vm4816_vm1, %v4952_v33, %v4953_v34 }
 0x1f0   :  { %6323 = vmatmul.mubr.bf16.vlgmr.msra.gmra.mxu0 %v7619_v51 }
 0x216   :  { %v2228_v15 = vpop.f32.mrf.mxu0 }
 0x217   :  { %v2279_v41 = vpop.f32.mrf.mxu1  ;;  %v2229_v44 = vadd.f32 %v2228_v15, %v1443_v37 }
 0x218   :  { %v2230_v55 = vpop.f32.mrf.mxu0 }
 0x219   :  { %v2281_v57 = vpop.f32.mrf.mxu1  ;;  %v2231_v58 = vadd.f32 %v2230_v55, %v1447_v50  ;;  %v2280_v61 = vadd.f32 %v2279_v41, %v2229_v44 }
 0x21a   :  { %v2232_v0 = vpop.f32.mrf.mxu0 }
 0x21b   :  { %v2283_v2 = vpop.f32.mrf.mxu1  ;;  %v2233_v3 = vadd.f32 %v2232_v0, %v1443_v37  ;;  %v2282_v21 = vadd.f32 %v2281_v57, %v2231_v58 }
 0x21c   :  { %v2234_v24 = vpop.f32.mrf.mxu0 }
 0x21d   :  { %v2285_v4 = vpop.f32.mrf.mxu1  ;;  %v2235_v42 = vadd.f32 %v2234_v24, %v1447_v50  ;;  %v2284_v43 = vadd.f32 %v2283_v2, %v2233_v3 }
 0x21e   :  { %v2238_v5 = vpop.f32.mrf.mxu0 }
 0x21f   :  { %v2289_v31 = vpop.f32.mrf.mxu1  ;;  %v7699_v6 = vpack.c.bf16 %v2284_v43, %v2280_v61  ;;  %v2239_v1 = vadd.f32 %v2238_v5, %v1443_v37  ;;  %v2286_v7 = vadd.f32 %v2285_v4, %v2235_v42 }
 0x220   :  { %v2240_v40 = vpop.f32.mrf.mxu0 }
 0x221   :  { %8556 = vst [vmem:[#allocation24_spill] sm:$0xff] %v7699_v6  ;;  %v2291_v14 = vpop.f32.mrf.mxu1  ;;  %v7701_v8 = vpack.c.bf16 %v2286_v7, %v2282_v21  ;;  %v2241_v48 = vadd.f32 %v2240_v40, %v1447_v50  ;;  %v7703_v9 = vadd.f32 %v2289_v31, %v2239_v1 }
 0x222   :  { %v2242_v28 = vpop.f32.mrf.mxu0 }
 0x223   :  { %8557 = vst [vmem:[#allocation25_spill] sm:$0xff] %v7701_v8  ;;  %8558 = vst [vmem:[#allocation26_spill] sm:$0xff] %v7703_v9  ;;  %v2293_v62 = vpop.f32.mrf.mxu1  ;;  %v7705_v63 = vadd.f32 %v2291_v14, %v2241_v48  ;;  %v7882_v9 = vld [vmem:[#allocation11 + $0x28] ss:$16 sps:$4 sm:$0xff]  }
 0x224   :  { %v2243_v12 = vpop.f32.mrf.mxu0  ;;  %v2308_v62 = vrot.slane %v565_v16, %v7624_v38  ;;  %8581 = vst [vmem:[#allocation49_spill] sm:$0xff] %v7882_v9 }
 0x225   :  { %8559 = vst [vmem:[#allocation27_spill] sm:$0xff] %v7705_v63  ;;  %v2294_v13 = vpop.f32.mrf.mxu1  ;;  %v2312_v12 = vrot.slane %v565_v16, %v7627_v45  ;;  %v7874_v63 = vld [vmem:[#allocation11 + $0x24] ss:$16 sps:$4 sm:$0xff]  }
 0x226   :  { %8578 = vst [vmem:[#allocation46_spill] sm:$0xff] %v7874_v63 }
 0x256   :  { %v2991_v19 = vpop.f32.mrf.mxu0 }
 0x257   :  { %v3042_v46 = vpop.f32.mrf.mxu1  ;;  %v2992_v10 = vadd.f32 %v2991_v19, %v2300_v17 }
 0x258   :  { %v2993_v11 = vpop.f32.mrf.mxu0 }
 0x259   :  { %v3044_v20 = vpop.f32.mrf.mxu1  ;;  %v2994_v47 = vadd.f32 %v2993_v11, %v2304_v18  ;;  %v3043_v27 = vadd.f32 %v3042_v46, %v2992_v10 }
 0x25a   :  { %v2995_v25 = vpop.f32.mrf.mxu0 }
 0x25b   :  { %v3046_v26 = vpop.f32.mrf.mxu1  ;;  %v2996_v29 = vadd.f32 %v2995_v25, %v2300_v17  ;;  %v3045_v30 = vadd.f32 %v3044_v20, %v2994_v47 }
 0x25c   :  { %v2997_v32 = vpop.f32.mrf.mxu0 }
 0x25d   :  { %v3048_v33 = vpop.f32.mrf.mxu1  ;;  %v2998_v34 = vadd.f32 %v2997_v32, %v2304_v18  ;;  %v3047_v37 = vadd.f32 %v3046_v26, %v2996_v29 }
 0x25e   :  { %v3001_v50 = vpop.f32.mrf.mxu0 }
 0x25f   :  { %v3052_v15 = vpop.f32.mrf.mxu1  ;;  %v3189_v41 = vpack.c.bf16 %v3047_v37, %v3043_v27  ;;  %v3002_v44 = vadd.f32 %v3001_v50, %v2300_v17  ;;  %v3049_v55 = vadd.f32 %v3048_v33, %v2998_v34 }
 0x260   :  { %v3003_v57 = vpop.f32.mrf.mxu0 }
 0x261   :  { %v3054_v58 = vpop.f32.mrf.mxu1  ;;  %v7709_v61 = vpack.c.bf16 %v3049_v55, %v3045_v30  ;;  %v3004_v0 = vadd.f32 %v3003_v57, %v2304_v18  ;;  %v3053_v2 = vadd.f32 %v3052_v15, %v3002_v44  ;;  %v3397_v3 = vsel %vm3395_vm2, %v3189_v41, 0 }
 0x262   :  { %v3005_v21 = vpop.f32.mrf.mxu0  ;;  %6315 = vmatpush3.bf16.msra.mxu1 %v3397_v3  ;;  %v4893_v31 = vrot.slane %v3189_v41, 5 }
 0x263   :  { %v3056_v24 = vpop.f32.mrf.mxu1  ;;  %v3193_v4 = vpack.c.bf16 %v3053_v2, %v3053_v2  ;;  %v3055_v42 = vadd.f32 %v3054_v58, %v3004_v0  ;;  %6326 = vmatprep.subr.bf16.mxu1 %v8465_v23  ;;  %v5022_v40 = vrot.slane %v7709_v61, 5 }
 0x264   :  { %v3006_v43 = vpop.f32.mrf.mxu0 }
 0x265   :  { %v3057_v5 = vpop.f32.mrf.mxu1  ;;  %v4894_v1 = vrot.slane %v3193_v4, 5  ;;  %v3194_v7 = vpack.c.bf16 %v3055_v42, %v3055_v42 }
 0x267   :  { %v5023_v14 = vrot.slane %v3194_v7, 5  ;;  %v7715_v48 = vsel %vm4816_vm1, %v4893_v31, %v4894_v1 }
 0x269   :  { %v7718_v28 = vsel %vm4816_vm1, %v5022_v40, %v5023_v14 }
 0x296   :  { %v3093_v13 = vpop.f32.mrf.mxu0 }
 0x297   :  { %v3144_v17 = vpop.f32.mrf.mxu1  ;;  %v3094_v18 = vadd.f32 %v3093_v13, %v2308_v62 }
 0x298   :  { %v3095_v19 = vpop.f32.mrf.mxu0 }
 0x299   :  { %v3146_v46 = vpop.f32.mrf.mxu1  ;;  %v3096_v10 = vadd.f32 %v3095_v19, %v2312_v12  ;;  %v3145_v11 = vadd.f32 %v3144_v17, %v3094_v18 }
 0x29a   :  { %v3097_v20 = vpop.f32.mrf.mxu0 }
 0x29b   :  { %v3148_v47 = vpop.f32.mrf.mxu1  ;;  %v3098_v25 = vadd.f32 %v3097_v20, %v2308_v62  ;;  %v3147_v26 = vadd.f32 %v3146_v46, %v3096_v10 }
 0x29c   :  { %v3099_v27 = vpop.f32.mrf.mxu0 }
 0x29d   :  { %v3150_v29 = vpop.f32.mrf.mxu1  ;;  %v3100_v30 = vadd.f32 %v3099_v27, %v2312_v12  ;;  %v3149_v32 = vadd.f32 %v3148_v47, %v3098_v25 }
 0x29e   :  { %v3103_v33 = vpop.f32.mrf.mxu0 }
 0x29f   :  { %v3154_v34 = vpop.f32.mrf.mxu1  ;;  %v7722_v37 = vpack.c.bf16 %v3149_v32, %v3145_v11  ;;  %v3104_v16 = vadd.f32 %v3103_v33, %v2308_v62  ;;  %v3151_v50 = vadd.f32 %v3150_v29, %v3100_v30 }
 0x2a0   :  { %v3105_v15 = vpop.f32.mrf.mxu0 }
 0x2a1   :  { %v3156_v41 = vpop.f32.mrf.mxu1  ;;  %v7724_v44 = vpack.c.bf16 %v3151_v50, %v3147_v26  ;;  %v3106_v55 = vadd.f32 %v3105_v15, %v2312_v12  ;;  %v3155_v57 = vadd.f32 %v3154_v34, %v3104_v16  ;;  %v5323_v4 = vrot.slane %v7722_v37, 5 }
 0x2a2   :  { %v3107_v58 = vpop.f32.mrf.mxu0 }
 0x2a3   :  { %v3158_v0 = vpop.f32.mrf.mxu1  ;;  %v3195_v2 = vpack.c.bf16 %v3155_v57, %v3155_v57  ;;  %v3157_v3 = vadd.f32 %v3156_v41, %v3106_v55  ;;  %v5546_v5 = vrot.slane %v7724_v44, 5 }
 0x2a4   :  { %v3108_v21 = vpop.f32.mrf.mxu0 }
 0x2a5   :  { %v3159_v24 = vpop.f32.mrf.mxu1  ;;  %v5324_v42 = vrot.slane %v3195_v2, 5  ;;  %v3196_v43 = vpack.c.bf16 %v3157_v3, %v3157_v3 }
 0x2a6   :  { %v7742_v24 = vld [vmem:[#allocation11 + $0x1e0] ss:$16 sps:$4 sm:$0xff]  }
 0x2a7   :  { %v5547_v31 = vrot.slane %v3196_v43, 5  ;;  %v7729_v1 = vsel %vm4816_vm1, %v5323_v4, %v5324_v42  ;;  %v7744_v4 = vld [vmem:[#allocation11 + $0x1e4] ss:$16 sps:$4 sm:$0xff]   ;;  %v7750_v43 = vld [vmem:[#allocation11 + $0x1c0] ss:$16 sps:$4 sm:$0xff]  }
 0x2a8   :  { %8560 = vst [vmem:[#allocation28_spill] sm:$0xff] %v7729_v1  ;;  %v3360_v7 = vpop.f32.mrf.mxu0  ;;  %v7746_v42 = vld [vmem:[#allocation11 + $0x1c4] ss:$16 sps:$4 sm:$0xff]   ;;  %3713 = vmatprep.subr.bf16.mxu0 %v7744_v4  ;;  %v7876_v1 = vld [vmem:[#allocation11 + $0x2c] ss:$16 sps:$4 sm:$0xff]  }
 0x2a9   :  { %v3368_v40 = vsel %vm3367_vm3, %v3360_v7, -inf  ;;  %v7733_v14 = vsel %vm4816_vm1, %v5546_v5, %v5547_v31  ;;  %3714 = vmatpush1.bf16.msra.mxu0 %v7742_v24  ;;  %v7753_v5 = vld [vmem:[#allocation11 + $0x1a4] ss:$16 sps:$4 sm:$0xff]   ;;  %v7756_v31 = vld [vmem:[#allocation11 + $0x1a0] ss:$16 sps:$4 sm:$0xff]   ;;  %8579 = vst [vmem:[#allocation47_spill] sm:$0xff] %v7876_v1 }
 0x2aa   :  { %8561 = vst [vmem:[#allocation29_spill] sm:$0xff] %v7733_v14  ;;  %3369 = vmax.xlane.f32.xlu0 %v3368_v40  ;;  %v6312_v62 = vpop.f32.mrf.mxu0  ;;  %3715 = vmatprep.subr.bf16.mxu0 %v7746_v42  ;;  %v7762_v40 = vld [vmem:[#allocation11 + $0x180] ss:$16 sps:$4 sm:$0xff]  }
 0x2ab   :  { %v7765_v62 = vld [vmem:[#allocation11 + $0x164] ss:$16 sps:$4 sm:$0xff]   ;;  %v7868_v14 = vld [vmem:[#allocation11 + $0x40] ss:$16 sps:$4 sm:$0xff]  }
 0x2ac   :  { %v3363_v12 = vpop.f32.mrf.mxu0  ;;  %8576 = vst [vmem:[#allocation44_spill] sm:$0xff] %v7868_v14 }
 0x2ad   :  { %v3372_v13 = vsel %vm3371_vm4, %v3363_v12, -inf  ;;  %3716 = vmatpush1.bf16.msra.mxu0 %v7750_v43 }
 0x2ae   :  { %3373 = vmax.xlane.f32.xlu0 %v3372_v13  ;;  %v6313_v17 = vpop.f32.mrf.mxu0  ;;  %3717 = vmatprep.subr.bf16.mxu0 %v7753_v5 }
 0x2b0   :  { %v3475_v18 = vpop.f32.mrf.mxu0 }
 0x2b1   :  { %v3482_v19 = vsel %vm3367_vm3, %v3475_v18, -inf  ;;  %3718 = vmatpush1.bf16.msra.mxu0 %v7756_v31 }
 0x2b2   :  { %3483 = vmax.xlane.f32.xlu1 %v3482_v19  ;;  %v6324_v46 = vpop.f32.mrf.mxu0 }
 0x2b4   :  { %v3478_v10 = vpop.f32.mrf.mxu0 }
 0x2b5   :  { %v3485_v11 = vsel %vm3371_vm4, %v3478_v10, -inf }
 0x2b6   :  { %3486 = vmax.xlane.f32.xlu1 %v3485_v11  ;;  %v6325_v20 = vpop.f32.mrf.mxu0 }
 0x333   :  { %v3370_v47 = vpop.xlane.xlu0 %3369 }
 0x334   :  { %v3375_v25 = vsub.f32 %v3360_v7, %v3370_v47  ;;  %v7759_v7 = vld [vmem:[#allocation11 + $0x184] ss:$16 sps:$4 sm:$0xff]  }
 0x335   :  { %3719 = vmatprep.subr.bf16.mxu0 %v7759_v7 }
 0x336   :  { %v3377_v26 = vmul.f32 1.442695, %v3375_v25  ;;  %3720 = vmatpush1.bf16.msra.mxu0 %v7762_v40  ;;  %v7002_v25 = vld [vmem:[#allocation11 + $0x1ec] ss:$16 sps:$4 sm:$0xff]  }
 0x337   :  { %v3374_v27 = vpop.xlane.xlu0 %3373  ;;  %3721 = vmatprep.subr.bf16.mxu0 %v7765_v62 }
 0x338   :  { %7189 = vpow2.f32 %v3377_v26  ;;  %v3376_v29 = vsub.f32 %v3363_v12, %v3374_v27  ;;  %v7768_v12 = vld [vmem:[#allocation11 + $0x160] ss:$16 sps:$4 sm:$0xff]   ;;  %v3509_v26 = vsel %vm3395_vm2, %v7709_v61, 0  ;;  %v7012_v61 = vld [vmem:[#allocation11 + $0x1a8] ss:$16 sps:$4 sm:$0xff]  }
 0x33a   :  { %v3379_v30 = vmul.f32 1.442695, %v3376_v29  ;;  %3722 = vmatpush1.bf16.msra.mxu0 %v7768_v12 }
 0x33b   :  { %v3484_v32 = vpop.xlane.xlu1 %3483 }
 0x33c   :  { %7191 = vpow2.f32 %v3379_v30  ;;  %v3488_v33 = vsub.f32 %v3475_v18, %v3484_v32 }
 0x33e   :  { %v3490_v34 = vmul.f32 1.442695, %v3488_v33  ;;  %v7000_v33 = vld [vmem:[#allocation11 + $0x1e8] ss:$16 sps:$4 sm:$0xff]  }
 0x33f   :  { %v3487_v16 = vpop.xlane.xlu1 %3486 }
 0x340   :  { %7193 = vpow2.f32 %v3490_v34  ;;  %v3489_v50 = vsub.f32 %v3478_v10, %v3487_v16  ;;  %v7008_v16 = vld [vmem:[#allocation11 + $0x1cc] ss:$16 sps:$4 sm:$0xff]  }
 0x342   :  { %v3492_v15 = vmul.f32 1.442695, %v3489_v50  ;;  %v7006_v50 = vld [vmem:[#allocation11 + $0x1c8] ss:$16 sps:$4 sm:$0xff]  }
 0x344   :  { %7195 = vpow2.f32 %v3492_v15  ;;  %v7014_v15 = vld [vmem:[#allocation11 + $0x1ac] ss:$16 sps:$4 sm:$0xff]  }
 0x345   :  { %v7190_v41 = vpop.eup %7189 }
 0x346   :  { %v3381_v55 = vsel %vm3367_vm3, %v7190_v41, 0.0 }
 0x347   :  { %3382 = vadd.xlane.f32.xlu0 %v3381_v55  ;;  %v7018_v55 = vld [vmem:[#allocation11 + $0x188] ss:$16 sps:$4 sm:$0xff]  }
 0x349   :  { %v7192_v57 = vpop.eup %7191 }
 0x34a   :  { %v3384_v58 = vsel %vm3371_vm4, %v7192_v57, 0.0 }
 0x34b   :  { %3385 = vadd.xlane.f32.xlu1 %v3384_v58  ;;  %v7024_v58 = vld [vmem:[#allocation11 + $0x168] ss:$16 sps:$4 sm:$0xff]  }
 0x34d   :  { %v7194_v0 = vpop.eup %7193 }
 0x34e   :  { %v3494_v2 = vsel %vm3367_vm3, %v7194_v0, 0.0 }
 0x34f   :  { %3495 = vadd.xlane.f32.xlu0 %v3494_v2  ;;  %v7032_v2 = vld [vmem:[#allocation11 + $0x14c] ss:$16 sps:$4 sm:$0xff]  }
 0x351   :  { %v7196_v3 = vpop.eup %7195 }
 0x352   :  { %v3497_v21 = vsel %vm3371_vm4, %v7196_v3, 0.0 }
 0x353   :  { %3498 = vadd.xlane.f32.xlu1 %v3497_v21  ;;  %v7030_v21 = vld [vmem:[#allocation11 + $0x148] ss:$16 sps:$4 sm:$0xff]  }
 0x3d0   :  { %v3383_v13 = vpop.xlane.xlu0 %3382 }
 0x3d1   :  { %7197 = vrcp.f32 %v3383_v13  ;;  %v7784_v13 = vld [vmem:[#allocation11 + $0x124] ss:$16 sps:$4 sm:$0xff]  }
 0x3d4   :  { %v3386_v17 = vpop.xlane.xlu1 %3385 }
 0x3d5   :  { %7199 = vrcp.f32 %v3386_v17  ;;  %v7038_v17 = vld [vmem:[#allocation11 + $0x12c] ss:$16 sps:$4 sm:$0xff]  }
 0x3d8   :  { %v3496_v18 = vpop.xlane.xlu0 %3495 }
 0x3d9   :  { %7201 = vrcp.f32 %v3496_v18  ;;  %v7786_v18 = vld [vmem:[#allocation11 + $0x120] ss:$16 sps:$4 sm:$0xff]  }
 0x3dc   :  { %v3499_v19 = vpop.xlane.xlu1 %3498 }
 0x3dd   :  { %7203 = vrcp.f32 %v3499_v19  ;;  %v7036_v19 = vld [vmem:[#allocation11 + $0x128] ss:$16 sps:$4 sm:$0xff]  }
 0x3de   :  { %v7198_v46 = vpop.eup %7197 }
 0x3df   :  { %v3389_v11 = vmul.f32 %v7198_v46, %v7190_v41  ;;  %v7020_v41 = vld [vmem:[#allocation11 + $0x18c] ss:$16 sps:$4 sm:$0xff]   ;;  %v7790_v46 = vld [vmem:[#allocation11 + $0x104] ss:$16 sps:$4 sm:$0xff]  }
 0x3e2   :  { %v7200_v10 = vpop.eup %7199 }
 0x3e3   :  { %v3390_v20 = vmul.f32 %v7200_v10, %v7192_v57  ;;  %v7026_v57 = vld [vmem:[#allocation11 + $0x16c] ss:$16 sps:$4 sm:$0xff]  }
 0x3e4   :  { %v7044_v10 = vld [vmem:[#allocation11 + $0x10c] ss:$16 sps:$4 sm:$0xff]  }
 0x3e5   :  { %v3391_v47 = vpack.c.bf16 %v3390_v20, %v3389_v11  ;;  %v7792_v11 = vld [vmem:[#allocation11 + $0x100] ss:$16 sps:$4 sm:$0xff]   ;;  %v7042_v20 = vld [vmem:[#allocation11 + $0x108] ss:$16 sps:$4 sm:$0xff]  }
 0x3e6   :  { %v7202_v27 = vpop.eup %7201 }
 0x3e7   :  { %6317 = vmatmul.mubr.msk.bf16.vlgmr.msra.gmra.mxu1 %vm3367_vm3, %v3391_v47  ;;  %v3502_v30 = vmul.f32 %v7202_v27, %v7194_v0  ;;  %v7778_v0 = vld [vmem:[#allocation11 + $0x144] ss:$16 sps:$4 sm:$0xff]  }
 0x3e8   :  { %6327 = vmatpush3.bf16.msra.mxu1 %v3509_v26  ;;  %6328 = vmatprep.mubr.msk.bf16.mxu1 %vm7453_vm0, %v8465_v23  ;;  %v7796_v47 = vld [vmem:[#allocation11 + $0xe4] ss:$16 sps:$4 sm:$0xff]   ;;  %v8463_v26 = vmov 0   ;;  %v7864_v23 = vld [vmem:[#allocation11 + $0x4c] ss:$16 sps:$4 sm:$0xff]  }
 0x3e9   :  { %3756 = vmatprep.subr.bf16.mxu1 %v7002_v25  ;;  %3723 = vmatprep.subr.bf16.mxu0 %v7778_v0  ;;  %v7798_v25 = vld [vmem:[#allocation11 + $0xec] ss:$16 sps:$4 sm:$0xff]   ;;  %8575 = vst [vmem:[#allocation43_spill] sm:$0xff] %v7864_v23 }
 0x3ea   :  { %v7204_v29 = vpop.eup %7203  ;;  %3745 = vmatprep.mubr.bf16.mxu0 %v8463_v26 }
 0x3eb   :  { %v3503_v32 = vmul.f32 %v7204_v29, %v7196_v3  ;;  %v7780_v3 = vld [vmem:[#allocation11 + $0x140] ss:$16 sps:$4 sm:$0xff]  }
 0x3ec   :  { %3724 = vmatpush1.bf16.msra.mxu0 %v7780_v3 }
 0x3ed   :  { %v3504_v34 = vpack.c.bf16 %v3503_v32, %v3502_v30  ;;  %3725 = vmatprep.subr.bf16.mxu0 %v7784_v13 }
 0x3ef   :  { %6329 = vmatmul.mubr.msk.bf16.vlgmr.msra.gmra.mxu1 %vm3367_vm3, %v3504_v34 }
 0x3f0   :  { %3757 = vmatpush1.bf16.msra.mxu1 %v7000_v33  ;;  %3726 = vmatpush1.bf16.msra.mxu0 %v7786_v18 }
 0x3f1   :  { %3758 = vmatprep.subr.bf16.mxu1 %v7008_v16  ;;  %3727 = vmatprep.subr.bf16.mxu0 %v7790_v46 }
 0x3f2   :  { %3788 = vmatprep.mubr.bf16.mxu1 %v8463_v26 }
 0x3f4   :  { %3759 = vmatpush1.bf16.msra.mxu1 %v7006_v50  ;;  %3728 = vmatpush1.bf16.msra.mxu0 %v7792_v11  ;;  %v7808_v50 = vld [vmem:[#allocation11 + $0xe0] ss:$16 sps:$4 sm:$0xff]  }
 0x3f5   :  { %3760 = vmatprep.subr.bf16.mxu1 %v7014_v15  ;;  %3959 = vmatprep.subr.bf16.mxu0 %v7796_v47  ;;  %v7810_v15 = vld [vmem:[#allocation11 + $0xe8] ss:$16 sps:$4 sm:$0xff]  }
 0x3f8   :  { %3761 = vmatpush1.bf16.msra.mxu1 %v7012_v61 }
 0x3f9   :  { %3762 = vmatprep.subr.bf16.mxu1 %v7020_v41  ;;  %v7812_v41 = vld [vmem:[#allocation11 + $0xc4] ss:$16 sps:$4 sm:$0xff]  }
 0x3fc   :  { %3763 = vmatpush1.bf16.msra.mxu1 %v7018_v55  ;;  %v7814_v55 = vld [vmem:[#allocation11 + $0xcc] ss:$16 sps:$4 sm:$0xff]  }
 0x3fd   :  { %3764 = vmatprep.subr.bf16.mxu1 %v7026_v57 }
 0x400   :  { %3765 = vmatpush1.bf16.msra.mxu1 %v7024_v58  ;;  %v7818_v58 = vld [vmem:[#allocation11 + $0xc0] ss:$16 sps:$4 sm:$0xff]  }
 0x401   :  { %3766 = vmatprep.subr.bf16.mxu1 %v7032_v2  ;;  %v7820_v2 = vld [vmem:[#allocation11 + $0xc8] ss:$16 sps:$4 sm:$0xff]  }
 0x404   :  { %3767 = vmatpush1.bf16.msra.mxu1 %v7030_v21  ;;  %v7824_v21 = vld [vmem:[#allocation11 + $0xa4] ss:$16 sps:$4 sm:$0xff]  }
 0x405   :  { %3768 = vmatprep.subr.bf16.mxu1 %v7038_v17  ;;  %8562 = vst [vmem:[#allocation30_spill] sm:$0xff] %v7824_v21  ;;  %v7826_v17 = vld [vmem:[#allocation11 + $0xac] ss:$16 sps:$4 sm:$0xff]  }
 0x406   :  { %8563 = vst [vmem:[#allocation31_spill] sm:$0xff] %v7826_v17 }
 0x408   :  { %3769 = vmatpush1.bf16.msra.mxu1 %v7036_v19  ;;  %v7832_v19 = vld [vmem:[#allocation11 + $0xa0] ss:$16 sps:$4 sm:$0xff]  }
 0x409   :  { %3770 = vmatprep.subr.bf16.mxu1 %v7044_v10  ;;  %8564 = vst [vmem:[#allocation32_spill] sm:$0xff] %v7832_v19  ;;  %v7834_v10 = vld [vmem:[#allocation11 + $0xa8] ss:$16 sps:$4 sm:$0xff]  }
 0x40a   :  { %8565 = vst [vmem:[#allocation33_spill] sm:$0xff] %v7834_v10 }
 0x40c   :  { %3771 = vmatpush1.bf16.msra.mxu1 %v7042_v20  ;;  %v7838_v20 = vld [vmem:[#allocation11 + $0x84] ss:$16 sps:$4 sm:$0xff]  }
 0x40d   :  { %4002 = vmatprep.subr.bf16.mxu1 %v7798_v25  ;;  %8566 = vst [vmem:[#allocation34_spill] sm:$0xff] %v7838_v20 }
 0x4a7   :  { %v7804_v27 = vpop.f32.mrf.mxu1 }
 0x4a9   :  { %v6318_v29 = vpop.f32.mrf.mxu1 }
 0x4aa   :  { %v7840_v29 = vld [vmem:[#allocation11 + $0x8c] ss:$16 sps:$4 sm:$0xff]  }
 0x4ab   :  { %v7806_v30 = vpop.f32.mrf.mxu1  ;;  %8567 = vst [vmem:[#allocation35_spill] sm:$0xff] %v7840_v29 }
 0x4ad   :  { %v6319_v32 = vpop.f32.mrf.mxu1 }
 0x4ae   :  { %v7844_v32 = vld [vmem:[#allocation11 + $0x80] ss:$16 sps:$4 sm:$0xff]  }
 0x4af   :  { %v3545_v33 = vpop.f32.mrf.mxu1  ;;  %8568 = vst [vmem:[#allocation36_spill] sm:$0xff] %v7844_v32 }
 0x4b1   :  { %v6330_v34 = vpop.f32.mrf.mxu1 }
 0x4b2   :  { %v7850_v34 = vld [vmem:[#allocation11 + $0x64] ss:$16 sps:$4 sm:$0xff]  }
 0x4b3   :  { %v3548_v16 = vpop.f32.mrf.mxu1  ;;  %8570 = vst [vmem:[#allocation38_spill] sm:$0xff] %v7850_v34 }
 0x4b4   :  { %v3552_v61 = vpack.c.bf16 %v3548_v16, %v3545_v33  ;;  %v7846_v33 = vld [vmem:[#allocation11 + $0x88] ss:$16 sps:$4 sm:$0xff]   ;;  %v7852_v16 = vld [vmem:[#allocation11 + $0x6c] ss:$16 sps:$4 sm:$0xff]  }
 0x4b5   :  { %v6331_v57 = vpop.f32.mrf.mxu1  ;;  %8569 = vst [vmem:[#allocation37_spill] sm:$0xff] %v7846_v33  ;;  %8571 = vst [vmem:[#allocation39_spill] sm:$0xff] %v7852_v16 }
 0x4b6   :  { %3746 = vmatmul.mubr.bf16.vlgmr.msra.gmra.mxu0 %v3552_v61  ;;  %3789 = vmatmul.mubr.bf16.vlgmr.msra.gmra.mxu1 %v3552_v61  ;;  %v7856_v61 = vld [vmem:[#allocation11 + $0x60] ss:$16 sps:$4 sm:$0xff]   ;;  %v7858_v57 = vld [vmem:[#allocation11 + $0x68] ss:$16 sps:$4 sm:$0xff]  }
 0x4b7   :  { %3960 = vmatpush1.bf16.msra.mxu0 %v7808_v50  ;;  %4003 = vmatpush1.bf16.msra.mxu1 %v7810_v15  ;;  %8572 = vst [vmem:[#allocation40_spill] sm:$0xff] %v7856_v61  ;;  %8573 = vst [vmem:[#allocation41_spill] sm:$0xff] %v7858_v57 }
 0x4b8   :  { %3961 = vmatprep.subr.bf16.mxu0 %v7812_v41  ;;  %4004 = vmatprep.subr.bf16.mxu1 %v7814_v55 }
 0x4b9   :  { %3991 = vmatprep.mubr.bf16.mxu0 %v8463_v26  ;;  %4034 = vmatprep.mubr.bf16.mxu1 %v8463_v26  ;;  %v7862_v26 = vld [vmem:[#allocation11 + $0x44] ss:$16 sps:$4 sm:$0xff]  }
 0x4ba   :  { %8574 = vst [vmem:[#allocation42_spill] sm:$0xff] %v7862_v26 }
 0x4bb   :  { %3962 = vmatpush1.bf16.msra.mxu0 %v7818_v58  ;;  %4005 = vmatpush1.bf16.msra.mxu1 %v7820_v2 }
 0x4bc   :  { %3963 = vmatprep.subr.bf16.mxu0 %v7824_v21  ;;  %4006 = vmatprep.subr.bf16.mxu1 %v7826_v17 }
 0x4bf   :  { %3964 = vmatpush1.bf16.msra.mxu0 %v7832_v19  ;;  %4007 = vmatpush1.bf16.msra.mxu1 %v7834_v10 }
 0x4c0   :  { %3965 = vmatprep.subr.bf16.mxu0 %v7838_v20  ;;  %4008 = vmatprep.subr.bf16.mxu1 %v7840_v29 }
 0x4c3   :  { %3966 = vmatpush1.bf16.msra.mxu0 %v7844_v32  ;;  %4009 = vmatpush1.bf16.msra.mxu1 %v7846_v33 }
 0x4c4   :  { %3967 = vmatprep.subr.bf16.mxu0 %v7850_v34  ;;  %4010 = vmatprep.subr.bf16.mxu1 %v7852_v16 }
 0x4c7   :  { %3968 = vmatpush1.bf16.msra.mxu0 %v7856_v61  ;;  %4011 = vmatpush1.bf16.msra.mxu1 %v7858_v57  ;;  %v7886_v57 = vld [vmem:[#allocation11 + $0x4] ss:$16 sps:$4 sm:$0xff]  }
 0x4c8   :  { %3969 = vmatprep.subr.bf16.mxu0 %v7862_v26  ;;  %4012 = vmatprep.subr.bf16.mxu1 %v7864_v23  ;;  %8582 = vst [vmem:[#allocation50_spill] sm:$0xff] %v7886_v57  ;;  %v7888_v26 = vld [vmem:[#allocation11 + $0xc] ss:$16 sps:$4 sm:$0xff]   ;;  %v7892_v23 = vld [vmem:[#allocation11] ss:$16 sps:$4 sm:$0xff]  }
 0x4c9   :  { %8583 = vst [vmem:[#allocation51_spill] sm:$0xff] %v7888_v26  ;;  %8584 = vst [vmem:[#allocation52_spill] sm:$0xff] %v7892_v23 }
 0x4cb   :  { %3970 = vmatpush1.bf16.msra.mxu0 %v7868_v14  ;;  %4013 = vmatpush1.bf16.msra.mxu1 %v7870_v60  ;;  %v7894_v14 = vld [vmem:[#allocation11 + $0x8] ss:$16 sps:$4 sm:$0xff]  }
 0x4cc   :  { %3971 = vmatprep.subr.bf16.mxu0 %v7874_v63  ;;  %4014 = vmatprep.subr.bf16.mxu1 %v7876_v1  ;;  %8585 = vst [vmem:[#allocation53_spill] sm:$0xff] %v7894_v14  ;;  %v3440_v1 = vpack.c.bf16 %v7806_v30, %v7804_v27  ;;  %v8586_v63 = vmov 0.0   ;;  %v8587_v27 = vmov 0  }
 0x4cf   :  { %3972 = vmatpush1.bf16.msra.mxu0 %v7880_v56  ;;  %4015 = vmatpush1.bf16.msra.mxu1 %v7882_v9  ;;  %v4113_v9 = vsel %vm3395_vm2, %v7722_v37, 0 }
 0x4d0   :  { %3973 = vmatprep.subr.bf16.mxu0 %v7886_v57  ;;  %4016 = vmatprep.subr.bf16.mxu1 %v7888_v26 }
 0x4d3   :  { %3974 = vmatpush1.bf16.msra.mxu0 %v7892_v23  ;;  %4017 = vmatpush1.bf16.msra.mxu1 %v7894_v14 }
 0x4d4   :  { %6332 = vmatprep.subr.bf16.mxu0 %v8586_v63  ;;  %6338 = vmatprep.subr.bf16.mxu1 %v8586_v63 }
 0x4d6   :  { %3992 = vmatmul.mubr.bf16.vlgmr.msra.gmra.mxu0 %v3440_v1  ;;  %4035 = vmatmul.mubr.bf16.vlgmr.msra.gmra.mxu1 %v3440_v1 }
 0x4d7   :  { %6333 = vmatpush3.bf16.xpose.msra.mxu0 %v7699_v6  ;;  %6339 = vmatpush3.bf16.msra.mxu1 %v4113_v9 }
 0x4d8   :  { %6334 = vmatprep.mubr.msk.bf16.mxu0 %vm7453_vm0, %v8586_v63  ;;  %6340 = vmatprep.mubr.msk.bf16.mxu1 %vm7453_vm0, %v8586_v63 }
 0x4de   :  { %6335 = vmatmul.mubr.bf16.vlgmr.msra.gmra.mxu0 %v7655_v22 }
 0x4df   :  { %4349 = vmatprep.mubr.bf16.mxu0 %v8587_v27 }
 0x576   :  { %v3747_v30 = vpop.f32.mrf.mxu0  ;;  %v3790_v14 = vpop.f32.mrf.mxu1 }
 0x578   :  { %v3749_v23 = vpop.f32.mrf.mxu0  ;;  %v3792_v1 = vpop.f32.mrf.mxu1 }
 0x57a   :  { %v3751_v26 = vpop.f32.mrf.mxu0  ;;  %v3794_v57 = vpop.f32.mrf.mxu1 }
 0x57c   :  { %v3753_v37 = vpop.f32.mrf.mxu0  ;;  %v7913_v56 = vpop.f32.mrf.mxu1 }
 0x596   :  { %v3993_v9 = vpop.f32.mrf.mxu0  ;;  %v4036_v6 = vpop.f32.mrf.mxu1 }
 0x597   :  { %v7915_v60 = vadd.f32 %v3993_v9, %v3747_v30  ;;  %v7917_v61 = vadd.f32 %v4036_v6, %v3790_v14 }
 0x598   :  { %v3995_v16 = vpop.f32.mrf.mxu0  ;;  %v4038_v34 = vpop.f32.mrf.mxu1 }
 0x599   :  { %v7919_v22 = vadd.f32 %v3995_v16, %v3749_v23  ;;  %v7921_v33 = vadd.f32 %v4038_v34, %v3792_v1 }
 0x59a   :  { %v3997_v32 = vpop.f32.mrf.mxu0  ;;  %v4040_v29 = vpop.f32.mrf.mxu1 }
 0x59b   :  { %v7923_v20 = vadd.f32 %v3997_v32, %v3751_v26  ;;  %v7925_v10 = vadd.f32 %v4040_v29, %v3794_v57 }
 0x59c   :  { %v3999_v19 = vpop.f32.mrf.mxu0 }
 0x59d   :  { %v7927_v17 = vadd.f32 %v3999_v19, %v3753_v37 }
 0x59e   :  { %v4079_v21 = vpop.f32.mrf.mxu0 }
 0x59f   :  { %v4086_v30 = vsel %vm3367_vm3, %v4079_v21, -inf }
 0x5a0   :  { %4087 = vmax.xlane.f32.xlu0 %v4086_v30  ;;  %v6336_v6 = vpop.f32.mrf.mxu0 }
 0x5a1   :  { %v7933_v6 = vld [vmem:[#allocation11 + $0x2e0] ss:$16 sps:$4 sm:$0xff]  }
 0x5a2   :  { %v4082_v14 = vpop.f32.mrf.mxu0  ;;  %8588 = vst [vmem:[#allocation54_spill] sm:$0xff] %v7933_v6 }
 0x5a3   :  { %v4089_v23 = vsel %vm3371_vm4, %v4082_v14, -inf }
 0x5a4   :  { %4090 = vmax.xlane.f32.xlu1 %v4089_v23  ;;  %v6337_v34 = vpop.f32.mrf.mxu0  ;;  %v7935_v23 = vld [vmem:[#allocation11 + $0x2e4] ss:$16 sps:$4 sm:$0xff]  }
 0x5a5   :  { %v7937_v34 = vld [vmem:[#allocation11 + $0x2ec] ss:$16 sps:$4 sm:$0xff]   ;;  %4317 = vmatprep.subr.bf16.mxu0 %v7935_v23 }
 0x5a6   :  { %8589 = vst [vmem:[#allocation55_spill] sm:$0xff] %v7937_v34  ;;  %4360 = vmatprep.subr.bf16.mxu1 %v7937_v34  ;;  %4318 = vmatpush1.bf16.msra.mxu0 %v7933_v6  ;;  %v7978_v6 = vld [vmem:[#allocation11 + $0x2e8] ss:$16 sps:$4 sm:$0xff]   ;;  %v7980_v34 = vld [vmem:[#allocation11 + $0x2cc] ss:$16 sps:$4 sm:$0xff]  }
 0x5a7   :  { %8601 = vst [vmem:[#allocation67_spill] sm:$0xff] %v7978_v6  ;;  %8602 = vst [vmem:[#allocation68_spill] sm:$0xff] %v7980_v34 }
 0x629   :  { %v4088_v16 = vpop.xlane.xlu0 %4087 }
 0x62a   :  { %v4092_v1 = vsub.f32 %v4079_v21, %v4088_v16  ;;  %v7939_v21 = vld [vmem:[#allocation11 + $0x2c4] ss:$16 sps:$4 sm:$0xff]  }
 0x62b   :  { %8590 = vst [vmem:[#allocation56_spill] sm:$0xff] %v7939_v21  ;;  %4319 = vmatprep.subr.bf16.mxu0 %v7939_v21  ;;  %v7947_v16 = vld [vmem:[#allocation11 + $0x2a4] ss:$16 sps:$4 sm:$0xff]  }
 0x62c   :  { %v4094_v9 = vmul.f32 1.442695, %v4092_v1  ;;  %8592 = vst [vmem:[#allocation58_spill] sm:$0xff] %v7947_v16  ;;  %v7950_v1 = vld [vmem:[#allocation11 + $0x2a0] ss:$16 sps:$4 sm:$0xff]  }
 0x62d   :  { %v4091_v26 = vpop.xlane.xlu1 %4090  ;;  %8593 = vst [vmem:[#allocation59_spill] sm:$0xff] %v7950_v1 }
 0x62e   :  { %7205 = vpow2.f32 %v4094_v9  ;;  %v4093_v29 = vsub.f32 %v4082_v14, %v4091_v26  ;;  %v7944_v14 = vld [vmem:[#allocation11 + $0x2c0] ss:$16 sps:$4 sm:$0xff]   ;;  %v7953_v9 = vld [vmem:[#allocation11 + $0x284] ss:$16 sps:$4 sm:$0xff]  }
 0x62f   :  { %8591 = vst [vmem:[#allocation57_spill] sm:$0xff] %v7944_v14  ;;  %4320 = vmatpush1.bf16.msra.mxu0 %v7944_v14  ;;  %8594 = vst [vmem:[#allocation60_spill] sm:$0xff] %v7953_v9  ;;  %v7956_v26 = vld [vmem:[#allocation11 + $0x280] ss:$16 sps:$4 sm:$0xff]  }
 0x630   :  { %v4096_v32 = vmul.f32 1.442695, %v4093_v29  ;;  %4321 = vmatprep.subr.bf16.mxu0 %v7947_v16  ;;  %8595 = vst [vmem:[#allocation61_spill] sm:$0xff] %v7956_v26  ;;  %v7959_v29 = vld [vmem:[#allocation11 + $0x264] ss:$16 sps:$4 sm:$0xff]  }
 0x631   :  { %8596 = vst [vmem:[#allocation62_spill] sm:$0xff] %v7959_v29 }
 0x632   :  { %7207 = vpow2.f32 %v4096_v32  ;;  %v7962_v32 = vld [vmem:[#allocation11 + $0x260] ss:$16 sps:$4 sm:$0xff]  }
 0x633   :  { %4322 = vmatpush1.bf16.msra.mxu0 %v7950_v1  ;;  %8597 = vst [vmem:[#allocation63_spill] sm:$0xff] %v7962_v32  ;;  %v7971_v1 = vld [vmem:[#allocation11 + $0x224] ss:$16 sps:$4 sm:$0xff]  }
 0x634   :  { %4323 = vmatprep.subr.bf16.mxu0 %v7953_v9  ;;  %8599 = vst [vmem:[#allocation65_spill] sm:$0xff] %v7971_v1  ;;  %v7974_v9 = vld [vmem:[#allocation11 + $0x220] ss:$16 sps:$4 sm:$0xff]  }
 0x635   :  { %8600 = vst [vmem:[#allocation66_spill] sm:$0xff] %v7974_v9 }
 0x637   :  { %4324 = vmatpush1.bf16.msra.mxu0 %v7956_v26 }
 0x638   :  { %4325 = vmatprep.subr.bf16.mxu0 %v7959_v29 }
 0x63b   :  { %v7206_v19 = vpop.eup %7205  ;;  %4326 = vmatpush1.bf16.msra.mxu0 %v7962_v32 }
 0x63c   :  { %v4098_v57 = vsel %vm3367_vm3, %v7206_v19, 0.0 }
 0x63d   :  { %4099 = vadd.xlane.f32.xlu0 %v4098_v57  ;;  %v7965_v57 = vld [vmem:[#allocation11 + $0x244] ss:$16 sps:$4 sm:$0xff]  }
 0x63e   :  { %8598 = vst [vmem:[#allocation64_spill] sm:$0xff] %v7965_v57  ;;  %4327 = vmatprep.subr.bf16.mxu0 %v7965_v57 }
 0x63f   :  { %v7208_v37 = vpop.eup %7207 }
 0x640   :  { %v4101_v30 = vsel %vm3371_vm4, %v7208_v37, 0.0 }
 0x641   :  { %4102 = vadd.xlane.f32.xlu1 %v4101_v30  ;;  %v7968_v30 = vld [vmem:[#allocation11 + $0x240] ss:$16 sps:$4 sm:$0xff]  }
 0x642   :  { %4328 = vmatpush1.bf16.msra.mxu0 %v7968_v30 }
 0x643   :  { %4329 = vmatprep.subr.bf16.mxu0 %v7971_v1  ;;  %v7984_v1 = vld [vmem:[#allocation11 + $0x2c8] ss:$16 sps:$4 sm:$0xff]  }
 0x644   :  { %8603 = vst [vmem:[#allocation69_spill] sm:$0xff] %v7984_v1 }
 0x646   :  { %4330 = vmatpush1.bf16.msra.mxu0 %v7974_v9 }
 0x6c6   :  { %v4100_v26 = vpop.xlane.xlu0 %4099 }
 0x6c7   :  { %7209 = vrcp.f32 %v4100_v26  ;;  %v7988_v26 = vld [vmem:[#allocation11 + $0x2ac] ss:$16 sps:$4 sm:$0xff]  }
 0x6c8   :  { %8604 = vst [vmem:[#allocation70_spill] sm:$0xff] %v7988_v26 }
 0x6ca   :  { %v4103_v29 = vpop.xlane.xlu1 %4102 }
 0x6cb   :  { %7211 = vrcp.f32 %v4103_v29  ;;  %v8006_v29 = vld [vmem:[#allocation11 + $0x24c] ss:$16 sps:$4 sm:$0xff]  }
 0x6cc   :  { %8610 = vst [vmem:[#allocation76_spill] sm:$0xff] %v8006_v29 }
 0x6d4   :  { %v7210_v16 = vpop.eup %7209 }
 0x6d5   :  { %v4106_v14 = vmul.f32 %v7210_v16, %v7206_v19  ;;  %v7991_v19 = vld [vmem:[#allocation11 + $0x2a8] ss:$16 sps:$4 sm:$0xff]  }
 0x6d6   :  { %8605 = vst [vmem:[#allocation71_spill] sm:$0xff] %v7991_v19  ;;  %v8003_v16 = vld [vmem:[#allocation11 + $0x268] ss:$16 sps:$4 sm:$0xff]  }
 0x6d7   :  { %8609 = vst [vmem:[#allocation75_spill] sm:$0xff] %v8003_v16 }
 0x6d8   :  { %v7212_v32 = vpop.eup %7211 }
 0x6d9   :  { %v4107_v21 = vmul.f32 %v7212_v32, %v7208_v37  ;;  %v7994_v37 = vld [vmem:[#allocation11 + $0x28c] ss:$16 sps:$4 sm:$0xff]   ;;  %v8009_v32 = vld [vmem:[#allocation11 + $0x248] ss:$16 sps:$4 sm:$0xff]  }
 0x6da   :  { %8606 = vst [vmem:[#allocation72_spill] sm:$0xff] %v7994_v37  ;;  %8611 = vst [vmem:[#allocation77_spill] sm:$0xff] %v8009_v32 }
 0x6db   :  { %v4108_v57 = vpack.c.bf16 %v4107_v21, %v4106_v14  ;;  %v7997_v21 = vld [vmem:[#allocation11 + $0x288] ss:$16 sps:$4 sm:$0xff]   ;;  %v8000_v14 = vld [vmem:[#allocation11 + $0x26c] ss:$16 sps:$4 sm:$0xff]  }
 0x6dc   :  { %8607 = vst [vmem:[#allocation73_spill] sm:$0xff] %v7997_v21  ;;  %8608 = vst [vmem:[#allocation74_spill] sm:$0xff] %v8000_v14 }
 0x6dd   :  { %6341 = vmatmul.mubr.msk.bf16.vlgmr.msra.gmra.mxu1 %vm3367_vm3, %v4108_v57  ;;  %v8012_v57 = vld [vmem:[#allocation11 + $0x22c] ss:$16 sps:$4 sm:$0xff]  }
 0x6de   :  { %4361 = vmatpush1.bf16.msra.mxu1 %v7978_v6  ;;  %4392 = vmatprep.mubr.bf16.mxu1 %v8587_v27  ;;  %8612 = vst [vmem:[#allocation78_spill] sm:$0xff] %v8012_v57 }
 0x6df   :  { %4362 = vmatprep.subr.bf16.mxu1 %v7980_v34 }
 0x6e2   :  { %4363 = vmatpush1.bf16.msra.mxu1 %v7984_v1 }
 0x6e3   :  { %4364 = vmatprep.subr.bf16.mxu1 %v7988_v26 }
 0x6e6   :  { %4365 = vmatpush1.bf16.msra.mxu1 %v7991_v19  ;;  %v8023_v19 = vld [vmem:[#allocation11 + $0x200] ss:$16 sps:$4 sm:$0xff]  }
 0x6e7   :  { %4366 = vmatprep.subr.bf16.mxu1 %v7994_v37  ;;  %v8015_v37 = vld [vmem:[#allocation11 + $0x228] ss:$16 sps:$4 sm:$0xff]   ;;  %8616 = vst [vmem:[#allocation82_spill] sm:$0xff] %v8023_v19 }
 0x6e8   :  { %8613 = vst [vmem:[#allocation79_spill] sm:$0xff] %v8015_v37 }
 0x6ea   :  { %4367 = vmatpush1.bf16.msra.mxu1 %v7997_v21  ;;  %v8019_v21 = vld [vmem:[#allocation11 + $0x204] ss:$16 sps:$4 sm:$0xff]  }
 0x6eb   :  { %4368 = vmatprep.subr.bf16.mxu1 %v8000_v14  ;;  %8614 = vst [vmem:[#allocation80_spill] sm:$0xff] %v8019_v21  ;;  %v8021_v14 = vld [vmem:[#allocation11 + $0x20c] ss:$16 sps:$4 sm:$0xff]   ;;  %4331 = vmatprep.subr.bf16.mxu0 %v8019_v21 }
 0x6ec   :  { %8615 = vst [vmem:[#allocation81_spill] sm:$0xff] %v8021_v14  ;;  %4332 = vmatpush1.bf16.msra.mxu0 %v8023_v19 }
 0x6ed   :  { %6344 = vmatprep.subr.bf16.mxu0 %v8586_v63 }
 0x6ee   :  { %4369 = vmatpush1.bf16.msra.mxu1 %v8003_v16  ;;  %v8025_v16 = vld [vmem:[#allocation11 + $0x208] ss:$16 sps:$4 sm:$0xff]  }
 0x6ef   :  { %4370 = vmatprep.subr.bf16.mxu1 %v8006_v29  ;;  %8617 = vst [vmem:[#allocation83_spill] sm:$0xff] %v8025_v16 }
 0x6f2   :  { %4371 = vmatpush1.bf16.msra.mxu1 %v8009_v32 }
 0x6f3   :  { %4372 = vmatprep.subr.bf16.mxu1 %v8012_v57 }
 0x6f6   :  { %4373 = vmatpush1.bf16.msra.mxu1 %v8015_v37  ;;  %v8033_v37 = vpop.f32.mrf.mxu1 }
 0x6f7   :  { %4374 = vmatprep.subr.bf16.mxu1 %v8021_v14  ;;  %v4479_v14 = vsel %vm3395_vm2, %v7724_v44, 0 }
 0x6fa   :  { %4375 = vmatpush1.bf16.msra.mxu1 %v8025_v16 }
 0x6fb   :  { %6350 = vmatprep.subr.bf16.mxu1 %v8586_v63 }
 0x79d   :  { %v4149_v57 = vpop.f32.mrf.mxu1 }
 0x79f   :  { %v6342_v32 = vpop.f32.mrf.mxu1 }
 0x7a1   :  { %v4152_v29 = vpop.f32.mrf.mxu1 }
 0x7a2   :  { %v4156_v26 = vpack.c.bf16 %v4152_v29, %v4149_v57 }
 0x7a3   :  { %v6343_v1 = vpop.f32.mrf.mxu1 }
 0x7a4   :  { %4350 = vmatmul.mubr.bf16.vlgmr.msra.gmra.mxu0 %v4156_v26  ;;  %4393 = vmatmul.mubr.bf16.vlgmr.msra.gmra.mxu1 %v4156_v26 }
 0x7a5   :  { %6345 = vmatpush3.bf16.xpose.msra.mxu0 %v7701_v8  ;;  %6351 = vmatpush3.bf16.msra.mxu1 %v4479_v14 }
 0x7a6   :  { %6346 = vmatprep.mubr.msk.bf16.mxu0 %vm7453_vm0, %v8586_v63  ;;  %6352 = vmatprep.mubr.msk.bf16.mxu1 %vm7453_vm0, %v8586_v63 }
 0x7ac   :  { %6347 = vmatmul.mubr.bf16.vlgmr.msra.gmra.mxu0 %v7662_v59 }
 0x7ad   :  { %4715 = vmatprep.mubr.bf16.mxu0 %v8587_v27 }
 0x864   :  { %v4351_v29 = vpop.f32.mrf.mxu0  ;;  %v4394_v1 = vpop.f32.mrf.mxu1 }
 0x865   :  { %v8045_v26 = vadd.f32 %v4351_v29, %v7915_v60  ;;  %v8048_v44 = vadd.f32 %v4394_v1, %v7917_v61 }
 0x866   :  { %v4353_v32 = vpop.f32.mrf.mxu0  ;;  %v4396_v14 = vpop.f32.mrf.mxu1 }
 0x867   :  { %v8051_v57 = vadd.f32 %v4353_v32, %v7919_v22  ;;  %v8054_v8 = vadd.f32 %v4396_v14, %v7921_v33 }
 0x868   :  { %v4355_v16 = vpop.f32.mrf.mxu0  ;;  %v4398_v59 = vpop.f32.mrf.mxu1 }
 0x869   :  { %v8057_v34 = vadd.f32 %v4355_v16, %v7923_v20  ;;  %v8060_v6 = vadd.f32 %v4398_v59, %v7925_v10 }
 0x86a   :  { %v4357_v60 = vpop.f32.mrf.mxu0 }
 0x86b   :  { %v8063_v61 = vadd.f32 %v4357_v60, %v7927_v17 }
 0x86c   :  { %v4445_v29 = vpop.f32.mrf.mxu0 }
 0x86d   :  { %v4452_v1 = vsel %vm3367_vm3, %v4445_v29, -inf }
 0x86e   :  { %4453 = vmax.xlane.f32.xlu0 %v4452_v1  ;;  %v6348_v22 = vpop.f32.mrf.mxu0 }
 0x86f   :  { %v8069_v22 = vld [vmem:[#allocation11 + $0x3e0] ss:$16 sps:$4 sm:$0xff]  }
 0x870   :  { %v4448_v32 = vpop.f32.mrf.mxu0  ;;  %8618 = vst [vmem:[#allocation84_spill] sm:$0xff] %v8069_v22 }
 0x871   :  { %v4455_v33 = vsel %vm3371_vm4, %v4448_v32, -inf }
 0x872   :  { %4456 = vmax.xlane.f32.xlu1 %v4455_v33  ;;  %v6349_v14 = vpop.f32.mrf.mxu0  ;;  %v8071_v33 = vld [vmem:[#allocation11 + $0x3e4] ss:$16 sps:$4 sm:$0xff]  }
 0x873   :  { %v8073_v14 = vld [vmem:[#allocation11 + $0x3ec] ss:$16 sps:$4 sm:$0xff]   ;;  %4683 = vmatprep.subr.bf16.mxu0 %v8071_v33 }
 0x874   :  { %8619 = vst [vmem:[#allocation85_spill] sm:$0xff] %v8073_v14  ;;  %4726 = vmatprep.subr.bf16.mxu1 %v8073_v14  ;;  %4684 = vmatpush1.bf16.msra.mxu0 %v8069_v22  ;;  %v8114_v22 = vld [vmem:[#allocation11 + $0x3e8] ss:$16 sps:$4 sm:$0xff]   ;;  %v8116_v14 = vld [vmem:[#allocation11 + $0x3cc] ss:$16 sps:$4 sm:$0xff]  }
 0x875   :  { %8630 = vst [vmem:[#allocation96_spill] sm:$0xff] %v8114_v22  ;;  %8631 = vst [vmem:[#allocation97_spill] sm:$0xff] %v8116_v14 }
 0x8f7   :  { %v4454_v19 = vpop.xlane.xlu0 %4453 }
 0x8f8   :  { %v4458_v20 = vsub.f32 %v4445_v29, %v4454_v19  ;;  %v8075_v19 = vld [vmem:[#allocation11 + $0x3c4] ss:$16 sps:$4 sm:$0xff]  }
 0x8f9   :  { %8620 = vst [vmem:[#allocation86_spill] sm:$0xff] %v8075_v19  ;;  %4685 = vmatprep.subr.bf16.mxu0 %v8075_v19  ;;  %v8083_v29 = vld [vmem:[#allocation11 + $0x3a4] ss:$16 sps:$4 sm:$0xff]  }
 0x8fa   :  { %v4460_v16 = vmul.f32 1.442695, %v4458_v20  ;;  %8622 = vst [vmem:[#allocation88_spill] sm:$0xff] %v8083_v29  ;;  %v8089_v20 = vld [vmem:[#allocation11 + $0x384] ss:$16 sps:$4 sm:$0xff]  }
 0x8fb   :  { %v4457_v21 = vpop.xlane.xlu1 %4456  ;;  %8624 = vst [vmem:[#allocation90_spill] sm:$0xff] %v8089_v20 }
 0x8fc   :  { %7213 = vpow2.f32 %v4460_v16  ;;  %v4459_v59 = vsub.f32 %v4448_v32, %v4457_v21  ;;  %v8080_v21 = vld [vmem:[#allocation11 + $0x3c0] ss:$16 sps:$4 sm:$0xff]  }
 0x8fd   :  { %8621 = vst [vmem:[#allocation87_spill] sm:$0xff] %v8080_v21  ;;  %4686 = vmatpush1.bf16.msra.mxu0 %v8080_v21  ;;  %v8086_v32 = vld [vmem:[#allocation11 + $0x3a0] ss:$16 sps:$4 sm:$0xff]  }
 0x8fe   :  { %v4462_v10 = vmul.f32 1.442695, %v4459_v59  ;;  %8623 = vst [vmem:[#allocation89_spill] sm:$0xff] %v8086_v32  ;;  %4687 = vmatprep.subr.bf16.mxu0 %v8083_v29  ;;  %v8092_v16 = vld [vmem:[#allocation11 + $0x380] ss:$16 sps:$4 sm:$0xff]  }
 0x8ff   :  { %8625 = vst [vmem:[#allocation91_spill] sm:$0xff] %v8092_v16  ;;  %v8095_v59 = vld [vmem:[#allocation11 + $0x364] ss:$16 sps:$4 sm:$0xff]  }
 0x900   :  { %7215 = vpow2.f32 %v4462_v10  ;;  %8626 = vst [vmem:[#allocation92_spill] sm:$0xff] %v8095_v59  ;;  %v8098_v10 = vld [vmem:[#allocation11 + $0x360] ss:$16 sps:$4 sm:$0xff]  }
 0x901   :  { %4688 = vmatpush1.bf16.msra.mxu0 %v8086_v32  ;;  %8627 = vst [vmem:[#allocation93_spill] sm:$0xff] %v8098_v10  ;;  %v8107_v32 = vld [vmem:[#allocation11 + $0x324] ss:$16 sps:$4 sm:$0xff]  }
 0x902   :  { %4689 = vmatprep.subr.bf16.mxu0 %v8089_v20  ;;  %8629 = vst [vmem:[#allocation95_spill] sm:$0xff] %v8107_v32  ;;  %v8110_v20 = vld [vmem:[#allocation11 + $0x320] ss:$16 sps:$4 sm:$0xff]  }
 0x905   :  { %4690 = vmatpush1.bf16.msra.mxu0 %v8092_v16 }
 0x906   :  { %4691 = vmatprep.subr.bf16.mxu0 %v8095_v59 }
 0x909   :  { %v7214_v17 = vpop.eup %7213  ;;  %4692 = vmatpush1.bf16.msra.mxu0 %v8098_v10 }
 0x90a   :  { %v4464_v60 = vsel %vm3367_vm3, %v7214_v17, 0.0 }
 0x90b   :  { %4465 = vadd.xlane.f32.xlu0 %v4464_v60  ;;  %v8101_v60 = vld [vmem:[#allocation11 + $0x344] ss:$16 sps:$4 sm:$0xff]  }
 0x90c   :  { %8628 = vst [vmem:[#allocation94_spill] sm:$0xff] %v8101_v60  ;;  %4693 = vmatprep.subr.bf16.mxu0 %v8101_v60 }
 0x90d   :  { %v7216_v9 = vpop.eup %7215 }
 0x90e   :  { %v4467_v1 = vsel %vm3371_vm4, %v7216_v9, 0.0 }
 0x90f   :  { %4468 = vadd.xlane.f32.xlu1 %v4467_v1  ;;  %v8104_v1 = vld [vmem:[#allocation11 + $0x340] ss:$16 sps:$4 sm:$0xff]  }
 0x910   :  { %4694 = vmatpush1.bf16.msra.mxu0 %v8104_v1 }
 0x911   :  { %4695 = vmatprep.subr.bf16.mxu0 %v8107_v32  ;;  %v8120_v32 = vld [vmem:[#allocation11 + $0x3c8] ss:$16 sps:$4 sm:$0xff]  }
 0x912   :  { %8632 = vst [vmem:[#allocation98_spill] sm:$0xff] %v8120_v32 }
 0x914   :  { %4696 = vmatpush1.bf16.msra.mxu0 %v8110_v20 }
 0x994   :  { %v4466_v16 = vpop.xlane.xlu0 %4465 }
 0x995   :  { %7217 = vrcp.f32 %v4466_v16  ;;  %v8124_v16 = vld [vmem:[#allocation11 + $0x3ac] ss:$16 sps:$4 sm:$0xff]  }
 0x996   :  { %8633 = vst [vmem:[#allocation99_spill] sm:$0xff] %v8124_v16 }
 0x998   :  { %v4469_v59 = vpop.xlane.xlu1 %4468 }
 0x999   :  { %7219 = vrcp.f32 %v4469_v59  ;;  %v8142_v59 = vld [vmem:[#allocation11 + $0x34c] ss:$16 sps:$4 sm:$0xff]  }
 0x99a   :  { %8639 = vst [vmem:[#allocation105_spill] sm:$0xff] %v8142_v59 }
 0x9a2   :  { %v7218_v29 = vpop.eup %7217 }
 0x9a3   :  { %v4472_v21 = vmul.f32 %v7218_v29, %v7214_v17  ;;  %v8130_v17 = vld [vmem:[#allocation11 + $0x38c] ss:$16 sps:$4 sm:$0xff]   ;;  %v8139_v29 = vld [vmem:[#allocation11 + $0x368] ss:$16 sps:$4 sm:$0xff]  }
 0x9a4   :  { %8635 = vst [vmem:[#allocation101_spill] sm:$0xff] %v8130_v17  ;;  %8638 = vst [vmem:[#allocation104_spill] sm:$0xff] %v8139_v29 }
 0x9a6   :  { %v7220_v10 = vpop.eup %7219 }
 0x9a7   :  { %v4473_v19 = vmul.f32 %v7220_v10, %v7216_v9  ;;  %v8127_v9 = vld [vmem:[#allocation11 + $0x3a8] ss:$16 sps:$4 sm:$0xff]  }
 0x9a8   :  { %8634 = vst [vmem:[#allocation100_spill] sm:$0xff] %v8127_v9  ;;  %v8145_v10 = vld [vmem:[#allocation11 + $0x348] ss:$16 sps:$4 sm:$0xff]  }
 0x9a9   :  { %v4474_v60 = vpack.c.bf16 %v4473_v19, %v4472_v21  ;;  %v8133_v19 = vld [vmem:[#allocation11 + $0x388] ss:$16 sps:$4 sm:$0xff]   ;;  %v8136_v21 = vld [vmem:[#allocation11 + $0x36c] ss:$16 sps:$4 sm:$0xff]   ;;  %8640 = vst [vmem:[#allocation106_spill] sm:$0xff] %v8145_v10 }
 0x9aa   :  { %8636 = vst [vmem:[#allocation102_spill] sm:$0xff] %v8133_v19  ;;  %8637 = vst [vmem:[#allocation103_spill] sm:$0xff] %v8136_v21 }
 0x9ab   :  { %6353 = vmatmul.mubr.msk.bf16.vlgmr.msra.gmra.mxu1 %vm3367_vm3, %v4474_v60  ;;  %v8148_v60 = vld [vmem:[#allocation11 + $0x32c] ss:$16 sps:$4 sm:$0xff]  }
 0x9ac   :  { %4727 = vmatpush1.bf16.msra.mxu1 %v8114_v22  ;;  %4758 = vmatprep.mubr.bf16.mxu1 %v8587_v27  ;;  %8641 = vst [vmem:[#allocation107_spill] sm:$0xff] %v8148_v60 }
 0x9ad   :  { %4728 = vmatprep.subr.bf16.mxu1 %v8116_v14 }
 0x9b0   :  { %4729 = vmatpush1.bf16.msra.mxu1 %v8120_v32 }
 0x9b1   :  { %4730 = vmatprep.subr.bf16.mxu1 %v8124_v16 }
 0x9b4   :  { %4731 = vmatpush1.bf16.msra.mxu1 %v8127_v9  ;;  %v8159_v9 = vld [vmem:[#allocation11 + $0x300] ss:$16 sps:$4 sm:$0xff]  }
 0x9b5   :  { %4732 = vmatprep.subr.bf16.mxu1 %v8130_v17  ;;  %v8151_v17 = vld [vmem:[#allocation11 + $0x328] ss:$16 sps:$4 sm:$0xff]  }
 0x9b6   :  { %8642 = vst [vmem:[#allocation108_spill] sm:$0xff] %v8151_v17 }
 0x9b8   :  { %4733 = vmatpush1.bf16.msra.mxu1 %v8133_v19  ;;  %v8155_v19 = vld [vmem:[#allocation11 + $0x304] ss:$16 sps:$4 sm:$0xff]  }
 0x9b9   :  { %4734 = vmatprep.subr.bf16.mxu1 %v8136_v21  ;;  %v8157_v21 = vld [vmem:[#allocation11 + $0x30c] ss:$16 sps:$4 sm:$0xff]   ;;  %4697 = vmatprep.subr.bf16.mxu0 %v8155_v19 }
 0x9ba   :  { %8643 = vst [vmem:[#allocation109_spill] sm:$0xff] %v8157_v21  ;;  %4698 = vmatpush1.bf16.msra.mxu0 %v8159_v9 }
 0x9bb   :  { %6356 = vmatprep.subr.bf16.mxu0 %v8586_v63 }
 0x9bc   :  { %4735 = vmatpush1.bf16.msra.mxu1 %v8139_v29  ;;  %v8161_v29 = vld [vmem:[#allocation11 + $0x308] ss:$16 sps:$4 sm:$0xff]  }
 0x9bd   :  { %4736 = vmatprep.subr.bf16.mxu1 %v8142_v59  ;;  %8644 = vst [vmem:[#allocation110_spill] sm:$0xff] %v8161_v29 }
 0x9c0   :  { %4737 = vmatpush1.bf16.msra.mxu1 %v8145_v10  ;;  %v3169_v10 = vmul.f32 0.088388346, %v7615_v52  ;;  %v3170_v52 = vmul.f32 0.088388346, %v7621_v53  ;;  %v4946_v53 = vrot.slane %v7619_v51, 5 }
 0x9c1   :  { %4738 = vmatprep.subr.bf16.mxu1 %v8148_v60 }
 0x9c2   :  { %v3177_v14 = vpack.c.bf16 %v3169_v10, %v3169_v10 }
 0x9c4   :  { %4739 = vmatpush1.bf16.msra.mxu1 %v8151_v17  ;;  %v8169_v17 = vpop.f32.mrf.mxu1 }
 0x9c5   :  { %4740 = vmatprep.subr.bf16.mxu1 %v8157_v21  ;;  %v4900_v21 = vsel %vm3395_vm2, %v7715_v48, 0 }
 0x9c8   :  { %4741 = vmatpush1.bf16.msra.mxu1 %v8161_v29  ;;  %v4818_v29 = vrot.slane %v3177_v14, 5 }
 0x9c9   :  { %6362 = vmatprep.subr.bf16.mxu1 %v8586_v63 }
 0xa6b   :  { %v4515_v60 = vpop.f32.mrf.mxu1 }
 0xa6d   :  { %v6354_v59 = vpop.f32.mrf.mxu1 }
 0xa6f   :  { %v4518_v16 = vpop.f32.mrf.mxu1 }
 0xa70   :  { %v4522_v32 = vpack.c.bf16 %v4518_v16, %v4515_v60 }
 0xa71   :  { %v6355_v22 = vpop.f32.mrf.mxu1 }
 0xa72   :  { %4716 = vmatmul.mubr.bf16.vlgmr.msra.gmra.mxu0 %v4522_v32  ;;  %4759 = vmatmul.mubr.bf16.vlgmr.msra.gmra.mxu1 %v4522_v32  ;;  %v4817_v22 = vrot.slane %v7612_v39, 5  ;;  %v3178_v32 = vpack.c.bf16 %v3170_v52, %v3170_v52  ;;  %v3325_v39 = vld [vmem:[#allocation13] sm:$0xf] }
 0xa73   :  { %6357 = vmatpush3.bf16.xpose.msra.mxu0 %v7686_v35  ;;  %6363 = vmatpush3.bf16.msra.mxu1 %v4900_v21  ;;  %v8208_v51 = vrot.slane %v3325_v39, %v7589_v49 }
 0xa74   :  { %6358 = vmatprep.mubr.msk.bf16.mxu0 %vm7453_vm0, %v8586_v63  ;;  %6368 = vmatprep.subr.bf16.mxu0 %v8586_v63  ;;  %v4819_v48 = vsel %vm4816_vm1, %v4817_v22, %v4818_v29  ;;  %v4947_v35 = vrot.slane %v3178_v32, 5 }
 0xa75   :  { %6364 = vmatprep.mubr.msk.bf16.mxu1 %vm7453_vm0, %v8586_v63  ;;  %6374 = vmatprep.subr.bf16.mxu1 %v8586_v63 }
 0xa76   :  { %v4948_v14 = vsel %vm4816_vm1, %v4946_v53, %v4947_v35 }
 0xa7a   :  { %6359 = vmatmul.mubr.bf16.vlgmr.msra.gmra.mxu0 %v4819_v48 }
 0xa7b   :  { %6369 = vmatpush3.bf16.xpose.msra.mxu0 %v7692_v36  ;;  %6370 = vmatprep.mubr.msk.bf16.mxu0 %vm7453_vm0, %v8586_v63  ;;  %v8211_v36 = vrot.slane %v3325_v39, %v7624_v38 }
 0xa7c   :  { %5073 = vmatprep.subr.bf16.mxu0 %v7744_v4 }
 0xa82   :  { %6371 = vmatmul.mubr.bf16.vlgmr.msra.gmra.mxu0 %v4948_v14 }
 0xa83   :  { %5074 = vmatpush1.bf16.msra.mxu0 %v7742_v24  ;;  %5105 = vmatprep.mubr.bf16.mxu0 %v8587_v27 }
 0xa84   :  { %5075 = vmatprep.subr.bf16.mxu0 %v7746_v42 }
 0xa87   :  { %5076 = vmatpush1.bf16.msra.mxu0 %v7750_v43 }
 0xa88   :  { %5077 = vmatprep.subr.bf16.mxu0 %v7753_v5  ;;  %v8216_v5 = vrot.slane %v3325_v39, %v7592_v54 }
 0xa8b   :  { %5078 = vmatpush1.bf16.msra.mxu0 %v7756_v31  ;;  %v8219_v31 = vrot.slane %v3325_v39, %v7627_v45 }
 0xa8c   :  { %5079 = vmatprep.subr.bf16.mxu0 %v7759_v7  ;;  %v4043_v7 = vadd.f32 %v8033_v37, %v7913_v56 }
 0xa8f   :  { %5080 = vmatpush1.bf16.msra.mxu0 %v7762_v40 }
 0xa90   :  { %5081 = vmatprep.subr.bf16.mxu0 %v7765_v62 }
 0xa93   :  { %5082 = vmatpush1.bf16.msra.mxu0 %v7768_v12 }
 0xa94   :  { %5083 = vmatprep.subr.bf16.mxu0 %v7778_v0 }
 0xa97   :  { %5084 = vmatpush1.bf16.msra.mxu0 %v7780_v3  ;;  %v4410_v3 = vadd.f32 %v8169_v17, %v4043_v7 }
 0xa98   :  { %5085 = vmatprep.subr.bf16.mxu0 %v7784_v13 }
 0xa9b   :  { %5086 = vmatpush1.bf16.msra.mxu0 %v7786_v18 }
 0xa9c   :  { %5087 = vmatprep.subr.bf16.mxu0 %v7790_v46 }
 0xa9f   :  { %5088 = vmatpush1.bf16.msra.mxu0 %v7792_v11 }
 0xaa0   :  { %5159 = vmatprep.subr.bf16.mxu0 %v7796_v47 }
 0xb32   :  { %v4717_v24 = vpop.f32.mrf.mxu0  ;;  %v4760_v4 = vpop.f32.mrf.mxu1 }
 0xb33   :  { %v4769_v42 = vadd.f32 %v4717_v24, %v8045_v26  ;;  %v4771_v43 = vadd.f32 %v4760_v4, %v8048_v44 }
 0xb34   :  { %v4719_v49 = vpop.f32.mrf.mxu0  ;;  %v4762_v40 = vpop.f32.mrf.mxu1 }
 0xb35   :  { %v4798_v38 = vadd.f32 %v8208_v51, %v4769_v42  ;;  %v4800_v62 = vadd.f32 %v8211_v36, %v4771_v43  ;;  %v4770_v12 = vadd.f32 %v4719_v49, %v8051_v57  ;;  %v4772_v0 = vadd.f32 %v4762_v40, %v8054_v8 }
 0xb36   :  { %v4721_v54 = vpop.f32.mrf.mxu0  ;;  %v4764_v13 = vpop.f32.mrf.mxu1 }
 0xb37   :  { %4806 = vst [vmem:[#allocation14] sm:$0xff] %v4798_v38  ;;  %4808 = vst [vmem:[#allocation14 + $0x10] sm:$0xff] %v4800_v62  ;;  %v4799_v45 = vadd.f32 %v8216_v5, %v4770_v12  ;;  %v4801_v56 = vadd.f32 %v8219_v31, %v4772_v0  ;;  %v4773_v18 = vadd.f32 %v4721_v54, %v8057_v34 }
 0xb38   :  { %v4775_v46 = vadd.f32 %v4764_v13, %v8060_v6  ;;  %v4723_v11 = vpop.f32.mrf.mxu0  ;;  %v4766_v47 = vpop.f32.mrf.mxu1 }
 0xb39   :  { %4807 = vst [vmem:[#allocation14 + $0x8] sm:$0xff] %v4799_v45  ;;  %4809 = vst [vmem:[#allocation14 + $0x18] sm:$0xff] %v4801_v56  ;;  %v4802_v8 = vadd.f32 %v8208_v51, %v4773_v18  ;;  %v4774_v26 = vadd.f32 %v4723_v11, %v8063_v61  ;;  %v4776_v44 = vadd.f32 %v4766_v47, %v4410_v3 }
 0xb3a   :  { %v4804_v37 = vadd.f32 %v8211_v36, %v4775_v46  ;;  %v4861_v57 = vpop.f32.mrf.mxu0 }
 0xb3b   :  { %4810 = vst [vmem:[#allocation14 + $0x20] sm:$0x3] %v4802_v8  ;;  %v4803_v16 = vadd.f32 %v8216_v5, %v4774_v26  ;;  %v4805_v34 = vadd.f32 %v8219_v31, %v4776_v44  ;;  %v4868_v6 = vsel %vm3367_vm3, %v4861_v57, -inf }
 0xb3c   :  { %4812 = vst [vmem:[#allocation14 + $0x30] sm:$0x3] %v4804_v37  ;;  %4869 = vmax.xlane.f32.xlu0 %v4868_v6  ;;  %v6360_v17 = vpop.f32.mrf.mxu0 }
 0xb3d   :  { %4811 = vst [vmem:[#allocation14 + $0x28] sm:$0x3] %v4803_v16  ;;  %4813 = vst [vmem:[#allocation14 + $0x38] sm:$0x3] %v4805_v34  ;;  %v7253_v34 = vld [vmem:[#allocation11 + $0x1ec] ss:$16 sps:$4 sm:$0xff]  }
 0xb3e   :  { %v4864_v21 = vpop.f32.mrf.mxu0 }
 0xb3f   :  { %v4871_v29 = vsel %vm3371_vm4, %v4864_v21, -inf }
 0xb40   :  { %4872 = vmax.xlane.f32.xlu1 %v4871_v29  ;;  %v6361_v59 = vpop.f32.mrf.mxu0 }
 0xb41   :  { %v7254_v59 = vld [vmem:[#allocation11 + $0x1e8] ss:$16 sps:$4 sm:$0xff]  }
 0xb42   :  { %v4990_v61 = vpop.f32.mrf.mxu0 }
 0xb43   :  { %v4997_v10 = vsel %vm3367_vm3, %v4990_v61, -inf }
 0xb44   :  { %4998 = vmax.xlane.f32.xlu0 %v4997_v10  ;;  %v6372_v60 = vpop.f32.mrf.mxu0  ;;  %v7257_v10 = vld [vmem:[#allocation11 + $0x1ac] ss:$16 sps:$4 sm:$0xff]  }
 0xb45   :  { %v7258_v60 = vld [vmem:[#allocation11 + $0x1a8] ss:$16 sps:$4 sm:$0xff]  }
 0xb46   :  { %v4993_v52 = vpop.f32.mrf.mxu0 }
 0xb47   :  { %v5000_v22 = vsel %vm3371_vm4, %v4993_v52, -inf }
 0xb48   :  { %5001 = vmax.xlane.f32.xlu1 %v5000_v22  ;;  %v6373_v32 = vpop.f32.mrf.mxu0  ;;  %v7260_v22 = vld [vmem:[#allocation11 + $0x188] ss:$16 sps:$4 sm:$0xff]  }
 0xb49   :  { %v7261_v32 = vld [vmem:[#allocation11 + $0x16c] ss:$16 sps:$4 sm:$0xff]  }
 0xbc5   :  { %v4870_v48 = vpop.xlane.xlu0 %4869 }
 0xbc6   :  { %v4874_v35 = vsub.f32 %v4861_v57, %v4870_v48  ;;  %v5029_v57 = vsel %vm3395_vm2, %v7718_v28, 0  ;;  %v7256_v28 = vld [vmem:[#allocation11 + $0x1c8] ss:$16 sps:$4 sm:$0xff]  }
 0xbc7   :  { %v7262_v48 = vld [vmem:[#allocation11 + $0x168] ss:$16 sps:$4 sm:$0xff]  }
 0xbc8   :  { %v4876_v53 = vmul.f32 1.442695, %v4874_v35  ;;  %v7263_v35 = vld [vmem:[#allocation11 + $0x14c] ss:$16 sps:$4 sm:$0xff]  }
 0xbc9   :  { %v4873_v14 = vpop.xlane.xlu1 %4872 }
 0xbca   :  { %7221 = vpow2.f32 %v4876_v53  ;;  %v4875_v39 = vsub.f32 %v4864_v21, %v4873_v14  ;;  %v7264_v53 = vld [vmem:[#allocation11 + $0x148] ss:$16 sps:$4 sm:$0xff]   ;;  %v7265_v14 = vld [vmem:[#allocation11 + $0x12c] ss:$16 sps:$4 sm:$0xff]  }
 0xbcc   :  { %v4878_v24 = vmul.f32 1.442695, %v4875_v39  ;;  %v7266_v39 = vld [vmem:[#allocation11 + $0x128] ss:$16 sps:$4 sm:$0xff]  }
 0xbcd   :  { %v4999_v4 = vpop.xlane.xlu0 %4998 }
 0xbce   :  { %7223 = vpow2.f32 %v4878_v24  ;;  %v5003_v42 = vsub.f32 %v4990_v61, %v4999_v4  ;;  %v7255_v61 = vld [vmem:[#allocation11 + $0x1cc] ss:$16 sps:$4 sm:$0xff]   ;;  %v7268_v4 = vld [vmem:[#allocation11 + $0x108] ss:$16 sps:$4 sm:$0xff]  }
 0xbcf   :  { %v7267_v24 = vld [vmem:[#allocation11 + $0x10c] ss:$16 sps:$4 sm:$0xff]  }
 0xbd0   :  { %v5005_v43 = vmul.f32 1.442695, %v5003_v42 }
 0xbd1   :  { %v5002_v7 = vpop.xlane.xlu1 %5001 }
 0xbd2   :  { %7225 = vpow2.f32 %v5005_v43  ;;  %v5004_v49 = vsub.f32 %v4993_v52, %v5002_v7  ;;  %v7259_v52 = vld [vmem:[#allocation11 + $0x18c] ss:$16 sps:$4 sm:$0xff]  }
 0xbd4   :  { %v5007_v40 = vmul.f32 1.442695, %v5004_v49 }
 0xbd6   :  { %7227 = vpow2.f32 %v5007_v40 }
 0xbd7   :  { %v7222_v38 = vpop.eup %7221 }
 0xbd8   :  { %v4880_v62 = vsel %vm3367_vm3, %v7222_v38, 0.0 }
 0xbd9   :  { %4881 = vadd.xlane.f32.xlu0 %v4880_v62 }
 0xbdb   :  { %v7224_v12 = vpop.eup %7223 }
 0xbdc   :  { %v4883_v0 = vsel %vm3371_vm4, %v7224_v12, 0.0 }
 0xbdd   :  { %4884 = vadd.xlane.f32.xlu1 %v4883_v0 }
 0xbdf   :  { %v7226_v3 = vpop.eup %7225 }
 0xbe0   :  { %v5009_v54 = vsel %vm3367_vm3, %v7226_v3, 0.0 }
 0xbe1   :  { %5010 = vadd.xlane.f32.xlu0 %v5009_v54  ;;  %v8647_v54 = vld [vmem:[#allocation32_spill] sm:$0xff] }
 0xbe3   :  { %v7228_v13 = vpop.eup %7227 }
 0xbe4   :  { %v5012_v45 = vsel %vm3371_vm4, %v7228_v13, 0.0 }
 0xbe5   :  { %5013 = vadd.xlane.f32.xlu1 %v5012_v45  ;;  %v8653_v45 = vld [vmem:[#allocation38_spill] sm:$0xff] }
 0xc62   :  { %v4882_v56 = vpop.xlane.xlu0 %4881 }
 0xc63   :  { %7229 = vrcp.f32 %v4882_v56  ;;  %v8656_v56 = vld [vmem:[#allocation41_spill] sm:$0xff] }
 0xc66   :  { %v4885_v18 = vpop.xlane.xlu1 %4884 }
 0xc67   :  { %7231 = vrcp.f32 %v4885_v18  ;;  %v8657_v18 = vld [vmem:[#allocation42_spill] sm:$0xff] }
 0xc6a   :  { %v5011_v46 = vpop.xlane.xlu0 %5010 }
 0xc6b   :  { %7233 = vrcp.f32 %v5011_v46  ;;  %v8658_v46 = vld [vmem:[#allocation43_spill] sm:$0xff] }
 0xc6e   :  { %v5014_v11 = vpop.xlane.xlu1 %5013 }
 0xc6f   :  { %7235 = vrcp.f32 %v5014_v11  ;;  %v8659_v11 = vld [vmem:[#allocation44_spill] sm:$0xff] }
 0xc70   :  { %v7230_v47 = vpop.eup %7229 }
 0xc71   :  { %v4888_v37 = vmul.f32 %v7230_v47, %v7222_v38  ;;  %v8660_v47 = vld [vmem:[#allocation45_spill] sm:$0xff] }
 0xc74   :  { %v7232_v8 = vpop.eup %7231 }
 0xc75   :  { %v4889_v26 = vmul.f32 %v7232_v8, %v7224_v12  ;;  %v8661_v8 = vld [vmem:[#allocation46_spill] sm:$0xff] }
 0xc77   :  { %v4890_v44 = vpack.c.bf16 %v4889_v26, %v4888_v37  ;;  %v8662_v37 = vld [vmem:[#allocation47_spill] sm:$0xff]  ;;  %v8663_v26 = vld [vmem:[#allocation26_spill] sm:$0xff] }
 0xc78   :  { %v7234_v16 = vpop.eup %7233 }
 0xc79   :  { %6365 = vmatmul.mubr.msk.bf16.vlgmr.msra.gmra.mxu1 %vm3367_vm3, %v4890_v44  ;;  %v5017_v17 = vmul.f32 %v7234_v16, %v7226_v3  ;;  %v8646_v3 = vld [vmem:[#allocation31_spill] sm:$0xff]  ;;  %v3187_v44 = vpack.c.bf16 %v8663_v26, %v8663_v26  ;;  %v8665_v16 = vld [vmem:[#allocation49_spill] sm:$0xff] }
 0xc7a   :  { %6375 = vmatpush3.bf16.msra.mxu1 %v5029_v57  ;;  %6376 = vmatprep.mubr.msk.bf16.mxu1 %vm7453_vm0, %v8586_v63  ;;  %v8664_v57 = vld [vmem:[#allocation48_spill] sm:$0xff] }
 0xc7b   :  { %5116 = vmatprep.subr.bf16.mxu1 %v7253_v34  ;;  %v8666_v34 = vld [vmem:[#allocation50_spill] sm:$0xff] }
 0xc7c   :  { %v7236_v6 = vpop.eup %7235 }
 0xc7d   :  { %v5018_v21 = vmul.f32 %v7236_v6, %v7228_v13  ;;  %v8652_v13 = vld [vmem:[#allocation37_spill] sm:$0xff]  ;;  %v8667_v6 = vld [vmem:[#allocation51_spill] sm:$0xff] }
 0xc7f   :  { %v5019_v29 = vpack.c.bf16 %v5018_v21, %v5017_v17  ;;  %v8668_v17 = vld [vmem:[#allocation21_spill] sm:$0xff] }
 0xc80   :  { %v3171_v21 = vmul.f32 0.088388346, %v8668_v17 }
 0xc81   :  { %6377 = vmatmul.mubr.msk.bf16.vlgmr.msra.gmra.mxu1 %vm3367_vm3, %v5019_v29  ;;  %v5254_v29 = vrot.slane %v3187_v44, 5 }
 0xc82   :  { %5117 = vmatpush1.bf16.msra.mxu1 %v7254_v59  ;;  %5148 = vmatprep.mubr.bf16.mxu1 %v8587_v27  ;;  %v8669_v59 = vld [vmem:[#allocation52_spill] sm:$0xff] }
 0xc83   :  { %5118 = vmatprep.subr.bf16.mxu1 %v7255_v61  ;;  %v8670_v61 = vld [vmem:[#allocation53_spill] sm:$0xff] }
 0xc86   :  { %5119 = vmatpush1.bf16.msra.mxu1 %v7256_v28  ;;  %v8671_v28 = vld [vmem:[#allocation24_spill] sm:$0xff] }
 0xc87   :  { %5120 = vmatprep.subr.bf16.mxu1 %v7257_v10  ;;  %v5253_v10 = vrot.slane %v8671_v28, 5 }
 0xc8a   :  { %5121 = vmatpush1.bf16.msra.mxu1 %v7258_v60 }
 0xc8b   :  { %5122 = vmatprep.subr.bf16.mxu1 %v7259_v52  ;;  %v3179_v52 = vpack.c.bf16 %v3171_v21, %v3171_v21 }
 0xc8e   :  { %5123 = vmatpush1.bf16.msra.mxu1 %v7260_v22  ;;  %v5255_v22 = vsel %vm4816_vm1, %v5253_v10, %v5254_v29 }
 0xc8f   :  { %5124 = vmatprep.subr.bf16.mxu1 %v7261_v32  ;;  %v8672_v32 = vld [vmem:[#allocation28_spill] sm:$0xff] }
 0xc92   :  { %5125 = vmatpush1.bf16.msra.mxu1 %v7262_v48  ;;  %v5330_v48 = vsel %vm3395_vm2, %v8672_v32, 0 }
 0xc93   :  { %5126 = vmatprep.subr.bf16.mxu1 %v7263_v35  ;;  %v5248_v35 = vrot.slane %v3179_v52, 5 }
 0xc96   :  { %5127 = vmatpush1.bf16.msra.mxu1 %v7264_v53  ;;  %v8673_v53 = vld [vmem:[#allocation55_spill] sm:$0xff] }
 0xc97   :  { %5128 = vmatprep.subr.bf16.mxu1 %v7265_v14  ;;  %v8674_v14 = vld [vmem:[#allocation20_spill] sm:$0xff] }
 0xc9a   :  { %5129 = vmatpush1.bf16.msra.mxu1 %v7266_v39  ;;  %v5247_v39 = vrot.slane %v8674_v14, 5 }
 0xc9b   :  { %5130 = vmatprep.subr.bf16.mxu1 %v7267_v24 }
 0xc9c   :  { %v5249_v24 = vsel %vm4816_vm1, %v5247_v39, %v5248_v35 }
 0xc9e   :  { %5131 = vmatpush1.bf16.msra.mxu1 %v7268_v4  ;;  %v8675_v4 = vld [vmem:[#allocation54_spill] sm:$0xff] }
 0xc9f   :  { %5202 = vmatprep.subr.bf16.mxu1 %v7798_v25  ;;  %v8645_v25 = vld [vmem:[#allocation30_spill] sm:$0xff] }
 0xd39   :  { %v4936_v42 = vpop.f32.mrf.mxu1 }
 0xd3b   :  { %v6366_v43 = vpop.f32.mrf.mxu1 }
 0xd3c   :  { %v8677_v43 = vld [vmem:[#allocation57_spill] sm:$0xff] }
 0xd3d   :  { %v4939_v7 = vpop.f32.mrf.mxu1 }
 0xd3e   :  { %v4943_v60 = vpack.c.bf16 %v4939_v7, %v4936_v42  ;;  %v8676_v42 = vld [vmem:[#allocation56_spill] sm:$0xff]  ;;  %v8678_v7 = vld [vmem:[#allocation58_spill] sm:$0xff] }
 0xd3f   :  { %v6367_v49 = vpop.f32.mrf.mxu1 }
 0xd40   :  { %v8679_v49 = vld [vmem:[#allocation59_spill] sm:$0xff] }
 0xd41   :  { %v5065_v40 = vpop.f32.mrf.mxu1 }
 0xd43   :  { %v6378_v38 = vpop.f32.mrf.mxu1 }
 0xd44   :  { %v8682_v38 = vld [vmem:[#allocation62_spill] sm:$0xff] }
 0xd45   :  { %v5068_v62 = vpop.f32.mrf.mxu1 }
 0xd46   :  { %v5072_v12 = vpack.c.bf16 %v5068_v62, %v5065_v40  ;;  %v8681_v40 = vld [vmem:[#allocation61_spill] sm:$0xff]  ;;  %v8683_v62 = vld [vmem:[#allocation63_spill] sm:$0xff] }
 0xd47   :  { %v6379_v0 = vpop.f32.mrf.mxu1 }
 0xd48   :  { %5106 = vmatmul.mubr.bf16.vlgmr.msra.gmra.mxu0 %v5072_v12  ;;  %5149 = vmatmul.mubr.bf16.vlgmr.msra.gmra.mxu1 %v5072_v12  ;;  %v8684_v12 = vld [vmem:[#allocation64_spill] sm:$0xff]  ;;  %v8685_v0 = vld [vmem:[#allocation65_spill] sm:$0xff] }
 0xd49   :  { %5160 = vmatpush1.bf16.msra.mxu0 %v7808_v50  ;;  %5203 = vmatpush1.bf16.msra.mxu1 %v7810_v15  ;;  %v8648_v50 = vld [vmem:[#allocation33_spill] sm:$0xff]  ;;  %v8649_v15 = vld [vmem:[#allocation34_spill] sm:$0xff] }
 0xd4a   :  { %5161 = vmatprep.subr.bf16.mxu0 %v7812_v41  ;;  %5204 = vmatprep.subr.bf16.mxu1 %v7814_v55  ;;  %v8650_v41 = vld [vmem:[#allocation35_spill] sm:$0xff]  ;;  %v8651_v55 = vld [vmem:[#allocation36_spill] sm:$0xff] }
 0xd4b   :  { %5191 = vmatprep.mubr.bf16.mxu0 %v8587_v27  ;;  %5234 = vmatprep.mubr.bf16.mxu1 %v8587_v27 }
 0xd4d   :  { %5162 = vmatpush1.bf16.msra.mxu0 %v7818_v58  ;;  %5205 = vmatpush1.bf16.msra.mxu1 %v7820_v2  ;;  %v8654_v58 = vld [vmem:[#allocation39_spill] sm:$0xff]  ;;  %v8655_v2 = vld [vmem:[#allocation40_spill] sm:$0xff] }
 0xd4e   :  { %5163 = vmatprep.subr.bf16.mxu0 %v8645_v25  ;;  %5206 = vmatprep.subr.bf16.mxu1 %v8646_v3  ;;  %v8686_v25 = vld [vmem:[#allocation66_spill] sm:$0xff]  ;;  %v8687_v3 = vld [vmem:[#allocation80_spill] sm:$0xff] }
 0xd51   :  { %5164 = vmatpush1.bf16.msra.mxu0 %v8647_v54  ;;  %5207 = vmatpush1.bf16.msra.mxu1 %v8648_v50  ;;  %v8688_v54 = vld [vmem:[#allocation82_spill] sm:$0xff] }
 0xd52   :  { %5165 = vmatprep.subr.bf16.mxu0 %v8649_v15  ;;  %5208 = vmatprep.subr.bf16.mxu1 %v8650_v41 }
 0xd55   :  { %5166 = vmatpush1.bf16.msra.mxu0 %v8651_v55  ;;  %5209 = vmatpush1.bf16.msra.mxu1 %v8652_v13 }
 0xd56   :  { %5167 = vmatprep.subr.bf16.mxu0 %v8653_v45  ;;  %5210 = vmatprep.subr.bf16.mxu1 %v8654_v58 }
 0xd59   :  { %5168 = vmatpush1.bf16.msra.mxu0 %v8655_v2  ;;  %5211 = vmatpush1.bf16.msra.mxu1 %v8656_v56 }
 0xd5a   :  { %5169 = vmatprep.subr.bf16.mxu0 %v8657_v18  ;;  %5212 = vmatprep.subr.bf16.mxu1 %v8658_v46 }
 0xd5d   :  { %5170 = vmatpush1.bf16.msra.mxu0 %v8659_v11  ;;  %5213 = vmatpush1.bf16.msra.mxu1 %v8660_v47 }
 0xd5e   :  { %5171 = vmatprep.subr.bf16.mxu0 %v8661_v8  ;;  %5214 = vmatprep.subr.bf16.mxu1 %v8662_v37 }
 0xd61   :  { %5172 = vmatpush1.bf16.msra.mxu0 %v8664_v57  ;;  %5215 = vmatpush1.bf16.msra.mxu1 %v8665_v16 }
 0xd62   :  { %5173 = vmatprep.subr.bf16.mxu0 %v8666_v34  ;;  %5216 = vmatprep.subr.bf16.mxu1 %v8667_v6 }
 0xd65   :  { %5174 = vmatpush1.bf16.msra.mxu0 %v8669_v59  ;;  %5217 = vmatpush1.bf16.msra.mxu1 %v8670_v61 }
 0xd66   :  { %6380 = vmatprep.subr.bf16.mxu0 %v8586_v63  ;;  %6386 = vmatprep.subr.bf16.mxu1 %v8586_v63 }
 0xd68   :  { %5192 = vmatmul.mubr.bf16.vlgmr.msra.gmra.mxu0 %v4943_v60  ;;  %5235 = vmatmul.mubr.bf16.vlgmr.msra.gmra.mxu1 %v4943_v60 }
 0xd69   :  { %6381 = vmatpush3.bf16.xpose.msra.mxu0 %v5255_v22  ;;  %6387 = vmatpush3.bf16.msra.mxu1 %v5330_v48 }
 0xd6a   :  { %6382 = vmatprep.mubr.msk.bf16.mxu0 %vm7453_vm0, %v8586_v63  ;;  %6388 = vmatprep.mubr.msk.bf16.mxu1 %vm7453_vm0, %v8586_v63 }
 0xd6b   :  { %5374 = vmatprep.subr.bf16.mxu0 %v7935_v23  ;;  %5417 = vmatprep.subr.bf16.mxu1 %v8673_v53  ;;  %v8680_v23 = vld [vmem:[#allocation60_spill] sm:$0xff] }
 0xd70   :  { %6383 = vmatmul.mubr.bf16.vlgmr.msra.gmra.mxu0 %v5249_v24 }
 0xd71   :  { %5375 = vmatpush1.bf16.msra.mxu0 %v8675_v4  ;;  %5406 = vmatprep.mubr.bf16.mxu0 %v8587_v27 }
 0xd72   :  { %5376 = vmatprep.subr.bf16.mxu0 %v8676_v42 }
 0xd75   :  { %5377 = vmatpush1.bf16.msra.mxu0 %v8677_v43 }
 0xd76   :  { %5378 = vmatprep.subr.bf16.mxu0 %v8678_v7 }
 0xd79   :  { %5379 = vmatpush1.bf16.msra.mxu0 %v8679_v49 }
 0xd7a   :  { %5380 = vmatprep.subr.bf16.mxu0 %v8680_v23 }
 0xd7d   :  { %5381 = vmatpush1.bf16.msra.mxu0 %v8681_v40  ;;  %v8689_v40 = vld [vmem:[#allocation67_spill] sm:$0xff] }
 0xd7e   :  { %5382 = vmatprep.subr.bf16.mxu0 %v8682_v38  ;;  %v8690_v38 = vld [vmem:[#allocation68_spill] sm:$0xff] }
 0xd81   :  { %5383 = vmatpush1.bf16.msra.mxu0 %v8683_v62  ;;  %v8691_v62 = vld [vmem:[#allocation69_spill] sm:$0xff] }
 0xd82   :  { %5384 = vmatprep.subr.bf16.mxu0 %v8684_v12  ;;  %v8692_v12 = vld [vmem:[#allocation70_spill] sm:$0xff] }
 0xd85   :  { %5385 = vmatpush1.bf16.msra.mxu0 %v7968_v30 }
 0xd86   :  { %5386 = vmatprep.subr.bf16.mxu0 %v8685_v0  ;;  %v8693_v0 = vld [vmem:[#allocation71_spill] sm:$0xff] }
 0xd89   :  { %5387 = vmatpush1.bf16.msra.mxu0 %v8686_v25  ;;  %v8694_v25 = vld [vmem:[#allocation72_spill] sm:$0xff] }
 0xd8a   :  { %5388 = vmatprep.subr.bf16.mxu0 %v8687_v3  ;;  %v8695_v3 = vld [vmem:[#allocation73_spill] sm:$0xff] }
 0xd8d   :  { %5389 = vmatpush1.bf16.msra.mxu0 %v8688_v54  ;;  %v8696_v54 = vld [vmem:[#allocation74_spill] sm:$0xff] }
 0xd8e   :  { %6392 = vmatprep.subr.bf16.mxu0 %v8586_v63 }
 0xe08   :  { %v5107_v50 = vpop.f32.mrf.mxu0  ;;  %v5150_v15 = vpop.f32.mrf.mxu1 }
 0xe0a   :  { %v5109_v41 = vpop.f32.mrf.mxu0  ;;  %v5152_v55 = vpop.f32.mrf.mxu1 }
 0xe0c   :  { %v5111_v13 = vpop.f32.mrf.mxu0  ;;  %v5154_v45 = vpop.f32.mrf.mxu1 }
 0xe0e   :  { %v5113_v58 = vpop.f32.mrf.mxu0  ;;  %v8319_v2 = vpop.f32.mrf.mxu1 }
 0xe28   :  { %v5193_v30 = vpop.f32.mrf.mxu0  ;;  %v5236_v56 = vpop.f32.mrf.mxu1 }
 0xe29   :  { %v8321_v18 = vadd.f32 %v5193_v30, %v5107_v50  ;;  %v8323_v46 = vadd.f32 %v5236_v56, %v5150_v15  ;;  %v8697_v50 = vld [vmem:[#allocation75_spill] sm:$0xff]  ;;  %v8698_v15 = vld [vmem:[#allocation76_spill] sm:$0xff] }
 0xe2a   :  { %v5195_v11 = vpop.f32.mrf.mxu0  ;;  %v5238_v47 = vpop.f32.mrf.mxu1  ;;  %v8704_v56 = vld [vmem:[#allocation27_spill] sm:$0xff] }
 0xe2b   :  { %v8325_v8 = vadd.f32 %v5195_v11, %v5109_v41  ;;  %v8327_v37 = vadd.f32 %v5238_v47, %v5152_v55  ;;  %v8699_v41 = vld [vmem:[#allocation77_spill] sm:$0xff]  ;;  %v8700_v55 = vld [vmem:[#allocation78_spill] sm:$0xff]  ;;  %v3188_v11 = vpack.c.bf16 %v8704_v56, %v8704_v56 }
 0xe2c   :  { %v5197_v26 = vpop.f32.mrf.mxu0  ;;  %v5240_v44 = vpop.f32.mrf.mxu1 }
 0xe2d   :  { %v8329_v57 = vadd.f32 %v5197_v26, %v5111_v13  ;;  %v8331_v16 = vadd.f32 %v5240_v44, %v5154_v45  ;;  %v8701_v13 = vld [vmem:[#allocation79_spill] sm:$0xff]  ;;  %v8702_v45 = vld [vmem:[#allocation81_spill] sm:$0xff] }
 0xe2e   :  { %v5199_v34 = vpop.f32.mrf.mxu0  ;;  %v8357_v30 = vpop.f32.mrf.mxu1  ;;  %v8705_v26 = vld [vmem:[#allocation23_spill] sm:$0xff] }
 0xe2f   :  { %v8333_v6 = vadd.f32 %v5199_v34, %v5113_v58  ;;  %v8703_v58 = vld [vmem:[#allocation83_spill] sm:$0xff]  ;;  %v3172_v44 = vmul.f32 0.088388346, %v8705_v26 }
 0xe30   :  { %v5291_v17 = vpop.f32.mrf.mxu0 }
 0xe31   :  { %v5298_v21 = vsel %vm3367_vm3, %v5291_v17, -inf }
 0xe32   :  { %5299 = vmax.xlane.f32.xlu0 %v5298_v21  ;;  %v6384_v29 = vpop.f32.mrf.mxu0 }
 0xe33   :  { %v8706_v29 = vld [vmem:[#allocation25_spill] sm:$0xff] }
 0xe34   :  { %v5294_v59 = vpop.f32.mrf.mxu0 }
 0xe35   :  { %v5301_v61 = vsel %vm3371_vm4, %v5294_v59, -inf }
 0xe36   :  { %5302 = vmax.xlane.f32.xlu1 %v5301_v61  ;;  %v6385_v28 = vpop.f32.mrf.mxu0 }
 0xe37   :  { %v3180_v28 = vpack.c.bf16 %v3172_v44, %v3172_v44 }
 0xebb   :  { %v5300_v10 = vpop.xlane.xlu0 %5299 }
 0xebc   :  { %v5304_v60 = vsub.f32 %v5291_v17, %v5300_v10  ;;  %v5477_v17 = vrot.slane %v3188_v11, 5 }
 0xebe   :  { %v5306_v52 = vmul.f32 1.442695, %v5304_v60 }
 0xebf   :  { %v5303_v22 = vpop.xlane.xlu1 %5302 }
 0xec0   :  { %7237 = vpow2.f32 %v5306_v52  ;;  %v5305_v32 = vsub.f32 %v5294_v59, %v5303_v22  ;;  %v5476_v59 = vrot.slane %v8706_v29, 5  ;;  %v8707_v52 = vld [vmem:[#allocation29_spill] sm:$0xff] }
 0xec1   :  { %v5553_v22 = vsel %vm3395_vm2, %v8707_v52, 0  ;;  %v8723_v52 = vld [vmem:[#allocation98_spill] sm:$0xff] }
 0xec2   :  { %v5308_v48 = vmul.f32 1.442695, %v5305_v32  ;;  %v5478_v60 = vsel %vm4816_vm1, %v5476_v59, %v5477_v17  ;;  %v5471_v32 = vrot.slane %v3180_v28, 5 }
 0xec4   :  { %7239 = vpow2.f32 %v5308_v48  ;;  %v8708_v48 = vld [vmem:[#allocation85_spill] sm:$0xff] }
 0xecd   :  { %v7238_v35 = vpop.eup %7237 }
 0xece   :  { %v5310_v53 = vsel %vm3367_vm3, %v7238_v35, 0.0 }
 0xecf   :  { %5311 = vadd.xlane.f32.xlu0 %v5310_v53 }
 0xed1   :  { %v7240_v14 = vpop.eup %7239 }
 0xed2   :  { %v5313_v39 = vsel %vm3371_vm4, %v7240_v14, 0.0 }
 0xed3   :  { %5314 = vadd.xlane.f32.xlu1 %v5313_v39  ;;  %v8710_v39 = vld [vmem:[#allocation84_spill] sm:$0xff] }
 0xf58   :  { %v5312_v24 = vpop.xlane.xlu0 %5311 }
 0xf59   :  { %7241 = vrcp.f32 %v5312_v24  ;;  %v8711_v24 = vld [vmem:[#allocation86_spill] sm:$0xff] }
 0xf5c   :  { %v5315_v4 = vpop.xlane.xlu1 %5314 }
 0xf5d   :  { %7243 = vrcp.f32 %v5315_v4  ;;  %v8712_v4 = vld [vmem:[#allocation87_spill] sm:$0xff] }
 0xf66   :  { %v7242_v42 = vpop.eup %7241 }
 0xf67   :  { %v5318_v7 = vmul.f32 %v7242_v42, %v7238_v35  ;;  %v8709_v35 = vld [vmem:[#allocation22_spill] sm:$0xff]  ;;  %v8713_v42 = vld [vmem:[#allocation88_spill] sm:$0xff] }
 0xf68   :  { %v5470_v53 = vrot.slane %v8709_v35, 5  ;;  %v8727_v35 = vld [vmem:[#allocation102_spill] sm:$0xff] }
 0xf6a   :  { %v7244_v43 = vpop.eup %7243 }
 0xf6b   :  { %v5319_v49 = vmul.f32 %v7244_v43, %v7240_v14  ;;  %v5472_v14 = vsel %vm4816_vm1, %v5470_v53, %v5471_v32  ;;  %v8716_v43 = vld [vmem:[#allocation91_spill] sm:$0xff]  ;;  %v8725_v32 = vld [vmem:[#allocation100_spill] sm:$0xff] }
 0xf6c   :  { %v8728_v53 = vld [vmem:[#allocation103_spill] sm:$0xff] }
 0xf6d   :  { %v5320_v23 = vpack.c.bf16 %v5319_v49, %v5318_v7  ;;  %v8717_v7 = vld [vmem:[#allocation92_spill] sm:$0xff]  ;;  %v8718_v49 = vld [vmem:[#allocation93_spill] sm:$0xff] }
 0xf6f   :  { %6389 = vmatmul.mubr.msk.bf16.vlgmr.msra.gmra.mxu1 %vm3367_vm3, %v5320_v23  ;;  %v8719_v23 = vld [vmem:[#allocation94_spill] sm:$0xff] }
 0xf70   :  { %5418 = vmatpush1.bf16.msra.mxu1 %v8689_v40  ;;  %5449 = vmatprep.mubr.bf16.mxu1 %v8587_v27  ;;  %v8720_v40 = vld [vmem:[#allocation95_spill] sm:$0xff] }
 0xf71   :  { %5419 = vmatprep.subr.bf16.mxu1 %v8690_v38 }
 0xf74   :  { %5420 = vmatpush1.bf16.msra.mxu1 %v8691_v62 }
 0xf75   :  { %5421 = vmatprep.subr.bf16.mxu1 %v8692_v12 }
 0xf78   :  { %5422 = vmatpush1.bf16.msra.mxu1 %v8693_v0 }
 0xf79   :  { %5423 = vmatprep.subr.bf16.mxu1 %v8694_v25 }
 0xf7c   :  { %5424 = vmatpush1.bf16.msra.mxu1 %v8695_v3 }
 0xf7d   :  { %5425 = vmatprep.subr.bf16.mxu1 %v8696_v54 }
 0xf80   :  { %5426 = vmatpush1.bf16.msra.mxu1 %v8697_v50 }
 0xf81   :  { %5427 = vmatprep.subr.bf16.mxu1 %v8698_v15 }
 0xf84   :  { %5428 = vmatpush1.bf16.msra.mxu1 %v8699_v41 }
 0xf85   :  { %5429 = vmatprep.subr.bf16.mxu1 %v8700_v55 }
 0xf88   :  { %5430 = vmatpush1.bf16.msra.mxu1 %v8701_v13 }
 0xf89   :  { %5431 = vmatprep.subr.bf16.mxu1 %v8702_v45 }
 0xf8c   :  { %5432 = vmatpush1.bf16.msra.mxu1 %v8703_v58 }
 0xf8d   :  { %6398 = vmatprep.subr.bf16.mxu1 %v8586_v63 }
0x102f   :  { %v5366_v47 = vpop.f32.mrf.mxu1 }
0x1031   :  { %v6390_v34 = vpop.f32.mrf.mxu1 }
0x1033   :  { %v5369_v21 = vpop.f32.mrf.mxu1 }
0x1034   :  { %v5373_v61 = vpack.c.bf16 %v5369_v21, %v5366_v47 }
0x1035   :  { %v6391_v10 = vpop.f32.mrf.mxu1 }
0x1036   :  { %5407 = vmatmul.mubr.bf16.vlgmr.msra.gmra.mxu0 %v5373_v61  ;;  %5450 = vmatmul.mubr.bf16.vlgmr.msra.gmra.mxu1 %v5373_v61  ;;  %v8721_v10 = vld [vmem:[#allocation96_spill] sm:$0xff] }
0x1037   :  { %6393 = vmatpush3.bf16.xpose.msra.mxu0 %v5478_v60  ;;  %6399 = vmatpush3.bf16.msra.mxu1 %v5553_v22  ;;  %v8722_v60 = vld [vmem:[#allocation97_spill] sm:$0xff]  ;;  %v8724_v22 = vld [vmem:[#allocation99_spill] sm:$0xff] }
0x1038   :  { %6394 = vmatprep.mubr.msk.bf16.mxu0 %vm7453_vm0, %v8586_v63  ;;  %6400 = vmatprep.mubr.msk.bf16.mxu1 %vm7453_vm0, %v8586_v63  ;;  %v8714_v63 = vld [vmem:[#allocation89_spill] sm:$0xff] }
0x1039   :  { %5597 = vmatprep.subr.bf16.mxu0 %v8071_v33  ;;  %5640 = vmatprep.subr.bf16.mxu1 %v8708_v48  ;;  %v8715_v33 = vld [vmem:[#allocation90_spill] sm:$0xff]  ;;  %v8726_v48 = vld [vmem:[#allocation101_spill] sm:$0xff] }
0x103e   :  { %6395 = vmatmul.mubr.bf16.vlgmr.msra.gmra.mxu0 %v5472_v14  ;;  %v8729_v14 = vld [vmem:[#allocation104_spill] sm:$0xff] }
0x103f   :  { %5598 = vmatpush1.bf16.msra.mxu0 %v8710_v39  ;;  %5629 = vmatprep.mubr.bf16.mxu0 %v8587_v27  ;;  %v8730_v39 = vld [vmem:[#allocation105_spill] sm:$0xff] }
0x1040   :  { %5599 = vmatprep.subr.bf16.mxu0 %v8711_v24  ;;  %v8731_v24 = vld [vmem:[#allocation106_spill] sm:$0xff] }
0x1043   :  { %5600 = vmatpush1.bf16.msra.mxu0 %v8712_v4  ;;  %v8733_v4 = vld [vmem:[#allocation108_spill] sm:$0xff] }
0x1044   :  { %5601 = vmatprep.subr.bf16.mxu0 %v8713_v42  ;;  %v8734_v42 = vld [vmem:[#allocation109_spill] sm:$0xff] }
0x1047   :  { %5602 = vmatpush1.bf16.msra.mxu0 %v8714_v63  ;;  %v8735_v63 = vld [vmem:[#allocation110_spill] sm:$0xff] }
0x1048   :  { %5603 = vmatprep.subr.bf16.mxu0 %v8715_v33 }
0x104b   :  { %5604 = vmatpush1.bf16.msra.mxu0 %v8716_v43 }
0x104c   :  { %5605 = vmatprep.subr.bf16.mxu0 %v8717_v7 }
0x104f   :  { %5606 = vmatpush1.bf16.msra.mxu0 %v8718_v49 }
0x1050   :  { %5607 = vmatprep.subr.bf16.mxu0 %v8719_v23 }
0x1053   :  { %5608 = vmatpush1.bf16.msra.mxu0 %v8104_v1 }
0x1054   :  { %5609 = vmatprep.subr.bf16.mxu0 %v8720_v40 }
0x1057   :  { %5610 = vmatpush1.bf16.msra.mxu0 %v8110_v20 }
0x1058   :  { %5611 = vmatprep.subr.bf16.mxu0 %v8155_v19 }
0x105b   :  { %5612 = vmatpush1.bf16.msra.mxu0 %v8159_v9 }
0x10f6   :  { %v5408_v38 = vpop.f32.mrf.mxu0  ;;  %v5451_v62 = vpop.f32.mrf.mxu1 }
0x10f7   :  { %v8391_v12 = vadd.f32 %v5408_v38, %v8321_v18  ;;  %v8394_v0 = vadd.f32 %v5451_v62, %v8323_v46 }
0x10f8   :  { %v5410_v25 = vpop.f32.mrf.mxu0  ;;  %v5453_v3 = vpop.f32.mrf.mxu1 }
0x10f9   :  { %v8397_v1 = vadd.f32 %v5410_v25, %v8325_v8  ;;  %v8400_v54 = vadd.f32 %v5453_v3, %v8327_v37 }
0x10fa   :  { %v5412_v20 = vpop.f32.mrf.mxu0  ;;  %v5455_v19 = vpop.f32.mrf.mxu1 }
0x10fb   :  { %v8403_v9 = vadd.f32 %v5412_v20, %v8329_v57  ;;  %v8406_v50 = vadd.f32 %v5455_v19, %v8331_v16  ;;  %v5243_v20 = vadd.f32 %v8357_v30, %v8319_v2 }
0x10fc   :  { %v5414_v18 = vpop.f32.mrf.mxu0  ;;  %v5457_v33 = vpop.f32.mrf.mxu1 }
0x10fd   :  { %v8409_v46 = vadd.f32 %v5414_v18, %v8333_v6 }
0x10fe   :  { %v5514_v15 = vpop.f32.mrf.mxu0 }
0x10ff   :  { %v5521_v41 = vsel %vm3367_vm3, %v5514_v15, -inf }
0x1100   :  { %5522 = vmax.xlane.f32.xlu0 %v5521_v41  ;;  %v6396_v8 = vpop.f32.mrf.mxu0 }
0x1102   :  { %v5517_v55 = vpop.f32.mrf.mxu0 }
0x1103   :  { %v5524_v37 = vsel %vm3371_vm4, %v5517_v55, -inf }
0x1104   :  { %5525 = vmax.xlane.f32.xlu1 %v5524_v37  ;;  %v6397_v13 = vpop.f32.mrf.mxu0  ;;  %v5467_v37 = vadd.f32 %v5457_v33, %v5243_v20 }
0x1189   :  { %v5523_v45 = vpop.xlane.xlu0 %5522 }
0x118a   :  { %v5527_v57 = vsub.f32 %v5514_v15, %v5523_v45 }
0x118c   :  { %v5529_v58 = vmul.f32 1.442695, %v5527_v57 }
0x118d   :  { %v5526_v56 = vpop.xlane.xlu1 %5525 }
0x118e   :  { %7245 = vpow2.f32 %v5529_v58  ;;  %v5528_v16 = vsub.f32 %v5517_v55, %v5526_v56 }
0x1190   :  { %v5531_v11 = vmul.f32 1.442695, %v5528_v16 }
0x1192   :  { %7247 = vpow2.f32 %v5531_v11 }
0x119b   :  { %v7246_v6 = vpop.eup %7245 }
0x119c   :  { %v5533_v47 = vsel %vm3367_vm3, %v7246_v6, 0.0 }
0x119d   :  { %5534 = vadd.xlane.f32.xlu0 %v5533_v47 }
0x119f   :  { %v7248_v26 = vpop.eup %7247 }
0x11a0   :  { %v5536_v44 = vsel %vm3371_vm4, %v7248_v26, 0.0 }
0x11a1   :  { %5537 = vadd.xlane.f32.xlu1 %v5536_v44 }
0x1226   :  { %v5535_v34 = vpop.xlane.xlu0 %5534 }
0x1227   :  { %7249 = vrcp.f32 %v5535_v34 }
0x122a   :  { %v5538_v17 = vpop.xlane.xlu1 %5537 }
0x122b   :  { %7251 = vrcp.f32 %v5538_v17 }
0x1234   :  { %v7250_v21 = vpop.eup %7249 }
0x1235   :  { %v5541_v59 = vmul.f32 %v7250_v21, %v7246_v6 }
0x1238   :  { %v7252_v29 = vpop.eup %7251 }
0x1239   :  { %v5542_v61 = vmul.f32 %v7252_v29, %v7248_v26 }
0x123b   :  { %v5543_v28 = vpack.c.bf16 %v5542_v61, %v5541_v59 }
0x123d   :  { %6401 = vmatmul.mubr.msk.bf16.vlgmr.msra.gmra.mxu1 %vm3367_vm3, %v5543_v28 }
0x123e   :  { %5641 = vmatpush1.bf16.msra.mxu1 %v8721_v10  ;;  %5672 = vmatprep.mubr.bf16.mxu1 %v8587_v27  ;;  %v8732_v27 = vld [vmem:[#allocation107_spill] sm:$0xff] }
0x123f   :  { %5642 = vmatprep.subr.bf16.mxu1 %v8722_v60 }
0x1242   :  { %5643 = vmatpush1.bf16.msra.mxu1 %v8723_v52 }
0x1243   :  { %5644 = vmatprep.subr.bf16.mxu1 %v8724_v22 }
0x1246   :  { %5645 = vmatpush1.bf16.msra.mxu1 %v8725_v32 }
0x1247   :  { %5646 = vmatprep.subr.bf16.mxu1 %v8726_v48 }
0x124a   :  { %5647 = vmatpush1.bf16.msra.mxu1 %v8727_v35 }
0x124b   :  { %5648 = vmatprep.subr.bf16.mxu1 %v8728_v53 }
0x124e   :  { %5649 = vmatpush1.bf16.msra.mxu1 %v8729_v14 }
0x124f   :  { %5650 = vmatprep.subr.bf16.mxu1 %v8730_v39 }
0x1252   :  { %5651 = vmatpush1.bf16.msra.mxu1 %v8731_v24 }
0x1253   :  { %5652 = vmatprep.subr.bf16.mxu1 %v8732_v27 }
0x1256   :  { %5653 = vmatpush1.bf16.msra.mxu1 %v8733_v4 }
0x1257   :  { %5654 = vmatprep.subr.bf16.mxu1 %v8734_v42 }
0x125a   :  { %5655 = vmatpush1.bf16.msra.mxu1 %v8735_v63 }
0x12fd   :  { %v5589_v43 = vpop.f32.mrf.mxu1 }
0x12ff   :  { %v6402_v7 = vpop.f32.mrf.mxu1 }
0x1301   :  { %v5592_v49 = vpop.f32.mrf.mxu1 }
0x1302   :  { %v5596_v23 = vpack.c.bf16 %v5592_v49, %v5589_v43 }
0x1303   :  { %v6403_v40 = vpop.f32.mrf.mxu1 }
0x1304   :  { %5630 = vmatmul.mubr.bf16.vlgmr.msra.gmra.mxu0 %v5596_v23  ;;  %5673 = vmatmul.mubr.bf16.vlgmr.msra.gmra.mxu1 %v5596_v23 }
0x13c4   :  { %v5631_v38 = vpop.f32.mrf.mxu0  ;;  %v5674_v62 = vpop.f32.mrf.mxu1 }
0x13c5   :  { %v5683_v25 = vadd.f32 %v5631_v38, %v8391_v12  ;;  %v5685_v3 = vadd.f32 %v5674_v62, %v8394_v0 }
0x13c6   :  { %v5633_v19 = vpop.f32.mrf.mxu0  ;;  %v5676_v18 = vpop.f32.mrf.mxu1 }
0x13c7   :  { %v5691_v15 = vadd.f32 %v5683_v25, %v8208_v51  ;;  %v5693_v41 = vadd.f32 %v5685_v3, %v8211_v36  ;;  %v5684_v8 = vadd.f32 %v5633_v19, %v8397_v1  ;;  %v5686_v55 = vadd.f32 %v5676_v18, %v8400_v54 }
0x13c8   :  { %v5635_v13 = vpop.f32.mrf.mxu0  ;;  %v5678_v45 = vpop.f32.mrf.mxu1 }
0x13c9   :  { %v5708_v57 = vrot.slane %v5691_v15, 6  ;;  %v5710_v12 = vrot.slane %v5693_v41, 6  ;;  %v5692_v0 = vadd.f32 %v5684_v8, %v8216_v5  ;;  %v5694_v58 = vadd.f32 %v5686_v55, %v8219_v31 }
0x13ca   :  { %v5687_v2 = vadd.f32 %v5635_v13, %v8403_v9  ;;  %v5689_v30 = vadd.f32 %v5678_v45, %v8406_v50  ;;  %v5637_v56 = vpop.f32.mrf.mxu0  ;;  %v5680_v16 = vpop.f32.mrf.mxu1 }
0x13cb   :  { %5728 = vst [vmem:[#allocation14 + $0x20] sm:$0xfc] %v5708_v57  ;;  %5730 = vst [vmem:[#allocation14 + $0x30] sm:$0xfc] %v5710_v12  ;;  %v5709_v1 = vrot.slane %v5692_v0, 6  ;;  %v5711_v11 = vrot.slane %v5694_v58, 6  ;;  %v5688_v54 = vadd.f32 %v5637_v56, %v8409_v46  ;;  %v5690_v6 = vadd.f32 %v5680_v16, %v5467_v37 }
0x13cc   :  { %v5695_v47 = vadd.f32 %v5687_v2, %v8208_v51  ;;  %v5697_v26 = vadd.f32 %v5689_v30, %v8211_v36 }
0x13cd   :  { %5729 = vst [vmem:[#allocation14 + $0x28] sm:$0xfc] %v5709_v1  ;;  %5731 = vst [vmem:[#allocation14 + $0x38] sm:$0xfc] %v5711_v11  ;;  %v5696_v9 = vadd.f32 %v5688_v54, %v8216_v5  ;;  %v5698_v50 = vadd.f32 %v5690_v6, %v8219_v31 }
0x13ce   :  { %v5712_v44 = vrot.slane %v5695_v47, 6  ;;  %v5716_v34 = vrot.slane %v5697_v26, 6 }
0x13cf   :  { %v5714_v17 = vrot.slane %v5696_v9, 6  ;;  %v5718_v21 = vrot.slane %v5698_v50, 6 }
0x13d0   :  { %v5713_v29 = vsel %vm5707_vm5, %v5708_v57, %v5712_v44  ;;  %v5717_v46 = vsel %vm5707_vm5, %v5710_v12, %v5716_v34 }
0x13d1   :  { %5732 = vst [vmem:[#allocation14 + $0x40] sm:$0xf] %v5713_v29  ;;  %5734 = vst [vmem:[#allocation14 + $0x50] sm:$0xf] %v5717_v46  ;;  %v5715_v51 = vsel %vm5707_vm5, %v5709_v1, %v5714_v17  ;;  %v5719_v36 = vsel %vm5707_vm5, %v5711_v11, %v5718_v21 }
0x13d2   :  { %5733 = vst [vmem:[#allocation14 + $0x48] sm:$0xf] %v5715_v51  ;;  %5735 = vst [vmem:[#allocation14 + $0x58] sm:$0xf] %v5719_v36 }
0x13d3   :  { %7420 = shalt.err (!%p7417_p11)
}
0x13d4   :  { %5747 = dma.vmem_to_hbm [thread:$0]  %s5742_s6, 1536, %s8462_s7, [#allocation4], %s7441_s29, %s7441_s29, %s7442_s30  }
0x13d5   :  { %7437 = dma.done.wait [#allocation4], 1536  }
0x13d6   :  { %7438 = vsyncadd [#allocation4], 4294965760 }
0x13d7   :  { %5751 = vsyncpa [#allocation3], 1 }
0x13d8   :  { %5752 = vsyncpa [#allocation6], 1 }
0x13d9   :  { %5753 = vsyncpa [#allocation9], 1 }
0x13da   :  { %5754 = vsyncpa [#allocation12], 1 }
0x13db   :  { %5755 = vsyncpa [#allocation4], 1 }

</bundles_post_ra>
